<compile_context>
chip_gen: v7x
topology: tpu7x:2x2x1
jax: 0.10.0
libtpu: 0.0.40
codegen_flags: <defaults>
</compile_context>

<pallas_src>
import functools

import jax
import jax.numpy as jnp
from jax import lax
from jax.experimental import pallas as pl
from jax.experimental.pallas import tpu as pltpu


# ----------------------------------------------------------------------------
# Fused kernel: inner-loop adaptation + query evaluation for a block of tasks
# ----------------------------------------------------------------------------
def _make_meta_kernel(update_step: int, inner_lr: float):
    inner_lr = float(inner_lr)
    inv_steps = 1.0 / float(update_step)

    def kernel(xs_ref, ohs_ref, xq_ref, ohq_ref, w_ref, b_ref, out_ref):
        xs = xs_ref[...]          # [B, Ns, D] f32  support features
        ohs = ohs_ref[...]        # [B, Ns, C] f32  support one-hot targets
        xq = xq_ref[...]          # [B, Nq, D] f32  query features
        ohq = ohq_ref[...]        # [B, Nq, C] f32  query one-hot targets
        w0 = w_ref[...]           # [D, C]     f32  shared initial weights
        b0 = b_ref[...]           # [1, 1, C]  f32  shared initial bias

        bsz, ns, d = xs.shape
        nq = xq.shape[1]
        c = w0.shape[1]

        # Per-task fast weights (replicated initial params; diverge per task).
        fw = jnp.broadcast_to(w0, (bsz, d, c))
        fb = jnp.broadcast_to(b0, (bsz, 1, c))

        # Loop-invariant support transpose, hoisted out of the inner loop.
        xs_t = jnp.swapaxes(xs, 1, 2)                          # [B, D, Ns]

        lane_s = lax.broadcasted_iota(jnp.int32, (bsz, ns, c), 2)
        lane_q = lax.broadcasted_iota(jnp.int32, (bsz, nq, c), 2)

        def xent_stats(logits, onehot, lane, n):
            # Mean softmax cross-entropy, accuracy and dLoss/dlogits per task.
            m = jnp.max(logits, axis=-1, keepdims=True)        # [B, N, 1]
            e = jnp.exp(logits - m)                            # [B, N, C]
            s = jnp.sum(e, axis=-1, keepdims=True)             # [B, N, 1]
            p = e * pl.reciprocal(s, approx=True)              # EUP vrcp
            lse = m + jnp.log(s)                               # [B, N, 1]
            nll = lse - jnp.sum(onehot * logits, axis=-1, keepdims=True)
            loss = jnp.sum(nll, axis=1) * (1.0 / n)            # [B, 1]
            # argmax (first maximal index) = min lane whose logit equals max.
            pred = jnp.min(jnp.where(logits == m, lane, c),
                           axis=-1, keepdims=True)             # [B, N, 1]
            hit = jnp.sum(onehot * (lane == pred).astype(jnp.float32),
                          axis=-1, keepdims=True)              # [B, N, 1]
            acc = jnp.sum(hit, axis=1) * (1.0 / n)             # [B, 1]
            dlogits = (p - onehot) * (1.0 / n)                 # [B, N, C]
            return loss, acc, dlogits

        loss_sum = jnp.zeros((bsz, 1), jnp.float32)
        acc_sum = jnp.zeros((bsz, 1), jnp.float32)

        # Inner SGD adaptation on the support set.  The reference records the
        # pre-update loss/acc at each of the `update_step` steps and averages
        # exactly those `update_step` values, as done here.
        for _ in range(update_step):
            logits = jnp.einsum('bnd,bdc->bnc', xs, fw,
                                preferred_element_type=jnp.float32) + fb
            loss, acc, dlogits = xent_stats(logits, ohs, lane_s, ns)
            loss_sum = loss_sum + loss
            acc_sum = acc_sum + acc
            # NaN/Inf-loss guard (reference: None grads -> zeros -> no update).
            finite = jnp.abs(loss) < jnp.inf                   # [B, 1] bool
            dlogits = jnp.where(finite[:, :, None], dlogits, 0.0)
            # dW = xs^T @ dlogits, db = column-sum of dlogits (per task).
            dw = jnp.einsum('bdn,bnc->bdc', xs_t, dlogits,
                            preferred_element_type=jnp.float32)  # [B, D, C]
            db = jnp.sum(dlogits, axis=1, keepdims=True)          # [B, 1, C]
            fw = fw - inner_lr * dw
            fb = fb - inner_lr * db

        # Query evaluation with the adapted weights.
        logits_q = jnp.einsum('bnd,bdc->bnc', xq, fw,
                              preferred_element_type=jnp.float32) + fb
        qloss, qacc, _ = xent_stats(logits_q, ohq, lane_q, nq)
        iloss = loss_sum * inv_steps
        iacc = acc_sum * inv_steps

        # Lane-dense packed output: one unmasked (B, 128) store; lanes 0..3
        # carry [query_loss, query_acc, avg_inner_loss, avg_inner_acc].
        lane_o = lax.broadcasted_iota(jnp.int32, (bsz, 128), 1)
        out = jnp.where(lane_o == 0, qloss, jnp.zeros((bsz, 128), jnp.float32))
        out = jnp.where(lane_o == 1, qacc, out)
        out = jnp.where(lane_o == 2, iloss, out)
        out = jnp.where(lane_o == 3, iacc, out)
        out_ref[...] = out

    return kernel


# ----------------------------------------------------------------------------
# Meta.forward equivalent, batched over meta-learning tasks
# ----------------------------------------------------------------------------
@functools.partial(jax.jit,
                   static_argnames=("update_step", "inner_lr", "task_block"))
def meta_forward(x_spt, y_spt, x_qry, y_qry, w, b, *,
                 update_step=3, inner_lr=0.1, task_block=8):
    """Per-task results are identical to running the reference Meta.forward
    independently on each task (x_spt[t], y_spt[t], x_qry[t], y_qry[t])."""
    n_tasks, n_spt, d = x_spt.shape
    n_qry = x_qry.shape[1]
    c = w.shape[-1]
    assert n_tasks % task_block == 0, "n_tasks must be a multiple of task_block"

    xs = x_spt.astype(jnp.float32)
    xq = x_qry.astype(jnp.float32)
    # One-hot targets precomputed outside the kernel (trivially fused XLA op);
    # avoids padded [N,1] int32 VMEM tiles and in-kernel label broadcasts.
    ohs = jax.nn.one_hot(y_spt, c, dtype=jnp.float32)          # [T, Ns, C]
    ohq = jax.nn.one_hot(y_qry, c, dtype=jnp.float32)          # [T, Nq, C]
    w32 = w.astype(jnp.float32)                                # [D, C]
    b3d = b.astype(jnp.float32).reshape(1, 1, c)               # [1, 1, C]

    kernel = _make_meta_kernel(update_step, inner_lr)
    tb = task_block

    packed = pl.pallas_call(
        kernel,
        out_shape=jax.ShapeDtypeStruct((n_tasks, 128), jnp.float32),
        grid_spec=pltpu.PrefetchScalarGridSpec(
            num_scalar_prefetch=0,
            grid=(n_tasks // tb,),
            in_specs=[
                pl.BlockSpec((tb, n_spt, d), lambda t: (t, 0, 0)),
                pl.BlockSpec((tb, n_spt, c), lambda t: (t, 0, 0)),
                pl.BlockSpec((tb, n_qry, d), lambda t: (t, 0, 0)),
                pl.BlockSpec((tb, n_qry, c), lambda t: (t, 0, 0)),
                pl.BlockSpec((d, c), lambda t: (0, 0)),
                pl.BlockSpec((1, 1, c), lambda t: (0, 0, 0)),
            ],
            out_specs=pl.BlockSpec((tb, 128), lambda t: (t, 0)),
        ),
        compiler_params=pltpu.CompilerParams(
            dimension_semantics=("parallel",)),
    )(xs, ohs, xq, ohq, w32, b3d)

    qry_loss = packed[:, 0]        # [T]
    qry_acc = packed[:, 1]         # [T]
    avg_inner_loss = packed[:, 2]  # [T]
    avg_inner_acc = packed[:, 3]   # [T]
    return qry_loss, qry_acc, avg_inner_loss, avg_inner_acc


# ----------------------------------------------------------------------------
# Driver
# ----------------------------------------------------------------------------
if __name__ == "__main__":
    key = jax.random.PRNGKey(0)
    k_w, k_spt, k_qry, k_ys, k_yq = jax.random.split(key, 5)

    N_TASKS, N_SPT, N_QRY, D, C = 16, 8, 8, 32, 8

    # Deterministic synthetic parameters for the base classifier net
    # (shared initial weights, adapted independently per task).
    w = 0.1 * jax.random.normal(k_w, (D, C), dtype=jnp.float32)
    b = jnp.zeros((C,), dtype=jnp.float32)

    x_spt = jax.random.normal(k_spt, (N_TASKS, N_SPT, D), dtype=jnp.float32)
    x_qry = jax.random.normal(k_qry, (N_TASKS, N_QRY, D), dtype=jnp.float32)
    y_spt = jax.random.randint(k_ys, (N_TASKS, N_SPT), 0, C, dtype=jnp.int32)
    y_qry = jax.random.randint(k_yq, (N_TASKS, N_QRY), 0, C, dtype=jnp.int32)

    qry_loss, qry_acc, avg_in_loss, avg_in_acc = meta_forward(
        x_spt, y_spt, x_qry, y_qry, w, b,
        update_step=3, inner_lr=0.1, task_block=8)
    jax.block_until_ready((qry_loss, qry_acc, avg_in_loss, avg_in_acc))
    print("KERNEL_OK")
</pallas_src>

<mosaic_0001>
module attributes {stable_mosaic.version = 11 : i64} {
  func.func @kernel(%arg0: i32, %arg1: memref<8x8x32xf32, #tpu.memory_space<vmem>>, %arg2: memref<8x8x8xf32, #tpu.memory_space<vmem>>, %arg3: memref<8x8x32xf32, #tpu.memory_space<vmem>>, %arg4: memref<8x8x8xf32, #tpu.memory_space<vmem>>, %arg5: memref<32x8xf32, #tpu.memory_space<vmem>>, %arg6: memref<1x1x8xf32, #tpu.memory_space<vmem>>, %arg7: memref<8x128xf32, #tpu.memory_space<vmem>>) attributes {dimension_semantics = [#tpu.dimension_semantics<parallel>], iteration_bounds = array<i64: 2>, scalar_prefetch = 0 : i64, scratch_operands = 0 : i64, tpu.core_type = #tpu.core_type<tc>, window_params = [{transform_indices = @transform_0, window_bounds = array<i64: 8, 8, 32>}, {transform_indices = @transform_1, window_bounds = array<i64: 8, 8, 8>}, {transform_indices = @transform_2, window_bounds = array<i64: 8, 8, 32>}, {transform_indices = @transform_3, window_bounds = array<i64: 8, 8, 8>}, {pipeline_mode = #tpu.pipeline_mode<synchronous>, transform_indices = @transform_4, window_bounds = array<i64: 32, 8>}, {pipeline_mode = #tpu.pipeline_mode<synchronous>, transform_indices = @transform_5, window_bounds = array<i64: 1, 1, 8>}, {transform_indices = @transform_6, window_bounds = array<i64: 8, 128>}]} {
    %c0 = arith.constant 0 : index
    %c0_0 = arith.constant 0 : index
    %c0_1 = arith.constant 0 : index
    %0 = vector.load %arg1[%c0, %c0_0, %c0_1] : memref<8x8x32xf32, #tpu.memory_space<vmem>>, vector<8x8x32xf32>
    %c0_2 = arith.constant 0 : index
    %c0_3 = arith.constant 0 : index
    %c0_4 = arith.constant 0 : index
    %1 = vector.load %arg2[%c0_2, %c0_3, %c0_4] : memref<8x8x8xf32, #tpu.memory_space<vmem>>, vector<8x8x8xf32>
    %c0_5 = arith.constant 0 : index
    %c0_6 = arith.constant 0 : index
    %c0_7 = arith.constant 0 : index
    %2 = vector.load %arg3[%c0_5, %c0_6, %c0_7] : memref<8x8x32xf32, #tpu.memory_space<vmem>>, vector<8x8x32xf32>
    %c0_8 = arith.constant 0 : index
    %c0_9 = arith.constant 0 : index
    %c0_10 = arith.constant 0 : index
    %3 = vector.load %arg4[%c0_8, %c0_9, %c0_10] : memref<8x8x8xf32, #tpu.memory_space<vmem>>, vector<8x8x8xf32>
    %c0_11 = arith.constant 0 : index
    %c0_12 = arith.constant 0 : index
    %4 = vector.load %arg5[%c0_11, %c0_12] : memref<32x8xf32, #tpu.memory_space<vmem>>, vector<32x8xf32>
    %c0_13 = arith.constant 0 : index
    %c0_14 = arith.constant 0 : index
    %c0_15 = arith.constant 0 : index
    %5 = vector.load %arg6[%c0_13, %c0_14, %c0_15] : memref<1x1x8xf32, #tpu.memory_space<vmem>>, vector<1x1x8xf32>
    %6 = vector.shape_cast %4 : vector<32x8xf32> to vector<1x32x8xf32>
    %7 = vector.broadcast %6 : vector<1x32x8xf32> to vector<8x32x8xf32>
    %8 = vector.shape_cast %5 : vector<1x1x8xf32> to vector<1x1x8xf32>
    %9 = vector.broadcast %8 : vector<1x1x8xf32> to vector<8x1x8xf32>
    %10 = tpu.transpose %0, [0, 2, 1] : vector<8x8x32xf32> -> vector<8x32x8xf32>
    %11 = tpu.iota {dimensions = array<i32: 2>} : vector<8x8x8xi32>
    %12 = tpu.iota {dimensions = array<i32: 2>} : vector<8x8x8xi32>
    %cst = arith.constant 0.000000e+00 : f32
    %13 = vector.broadcast %cst : f32 to vector<8x1xf32>
    %cst_16 = arith.constant 0.000000e+00 : f32
    %14 = vector.broadcast %cst_16 : f32 to vector<8x1xf32>
    "tpu.trace_start"() <{level = 10 : i32, message = "bnd,bdc->bnc"}> : () -> ()
    %cst_17 = arith.constant dense<0.000000e+00> : vector<8x8x8xf32>
    %15 = tpu.matmul %0, %7, %cst_17 {dimension_numbers = #tpu.dot_dimension_numbers<[2], [1], [1], [2], [0, 0, 0, 1, 1, 2], [0], [0]>} : vector<8x8x32xf32>, vector<8x32x8xf32>, vector<8x8x8xf32> -> vector<8x8x8xf32>
    "tpu.trace_stop"() : () -> ()
    %16 = vector.broadcast %9 : vector<8x1x8xf32> to vector<8x8x8xf32>
    %17 = arith.addf %15, %16 : vector<8x8x8xf32>
    %cst_18 = arith.constant dense<0xFF800000> : vector<8x8xf32>
    %18 = vector.multi_reduction <maximumf>, %17, %cst_18 [2] : vector<8x8x8xf32> to vector<8x8xf32>
    %19 = vector.shape_cast %18 : vector<8x8xf32> to vector<8x8x1xf32>
    %20 = vector.broadcast %19 : vector<8x8x1xf32> to vector<8x8x8xf32>
    %21 = arith.subf %17, %20 : vector<8x8x8xf32>
    %22 = math.exp %21 : vector<8x8x8xf32>
    %cst_19 = arith.constant dense<0.000000e+00> : vector<8x8xf32>
    %23 = vector.multi_reduction <add>, %22, %cst_19 [2] : vector<8x8x8xf32> to vector<8x8xf32>
    %24 = vector.shape_cast %23 : vector<8x8xf32> to vector<8x8x1xf32>
    %25 = tpu.reciprocal %24 {approx = true} : vector<8x8x1xf32> -> vector<8x8x1xf32>
    %26 = vector.broadcast %25 : vector<8x8x1xf32> to vector<8x8x8xf32>
    %27 = arith.mulf %22, %26 : vector<8x8x8xf32>
    %28 = math.log %24 : vector<8x8x1xf32>
    %29 = arith.addf %19, %28 : vector<8x8x1xf32>
    %30 = arith.mulf %1, %17 : vector<8x8x8xf32>
    %cst_20 = arith.constant dense<0.000000e+00> : vector<8x8xf32>
    %31 = vector.multi_reduction <add>, %30, %cst_20 [2] : vector<8x8x8xf32> to vector<8x8xf32>
    %32 = vector.shape_cast %31 : vector<8x8xf32> to vector<8x8x1xf32>
    %33 = arith.subf %29, %32 : vector<8x8x1xf32>
    %cst_21 = arith.constant dense<0.000000e+00> : vector<8x1xf32>
    %34 = vector.multi_reduction <add>, %33, %cst_21 [1] : vector<8x8x1xf32> to vector<8x1xf32>
    %cst_22 = arith.constant 1.250000e-01 : f32
    %35 = vector.broadcast %cst_22 : f32 to vector<8x1xf32>
    %36 = arith.mulf %34, %35 : vector<8x1xf32>
    %37 = vector.broadcast %19 : vector<8x8x1xf32> to vector<8x8x8xf32>
    %38 = arith.cmpf oeq, %17, %37 : vector<8x8x8xf32>
    %c8_i32 = arith.constant 8 : i32
    %39 = vector.broadcast %c8_i32 : i32 to vector<8x8x8xi32>
    %40 = arith.select %38, %11, %39 : vector<8x8x8xi1>, vector<8x8x8xi32>
    %cst_23 = arith.constant dense<2147483647> : vector<8x8xi32>
    %41 = vector.multi_reduction <minsi>, %40, %cst_23 [2] : vector<8x8x8xi32> to vector<8x8xi32>
    %42 = vector.shape_cast %41 : vector<8x8xi32> to vector<8x8x1xi32>
    %43 = vector.broadcast %42 : vector<8x8x1xi32> to vector<8x8x8xi32>
    %44 = arith.cmpi eq, %11, %43 : vector<8x8x8xi32>
    %45 = arith.extui %44 : vector<8x8x8xi1> to vector<8x8x8xi32>
    %46 = arith.sitofp %45 : vector<8x8x8xi32> to vector<8x8x8xf32>
    %47 = arith.mulf %1, %46 : vector<8x8x8xf32>
    %cst_24 = arith.constant dense<0.000000e+00> : vector<8x8xf32>
    %48 = vector.multi_reduction <add>, %47, %cst_24 [2] : vector<8x8x8xf32> to vector<8x8xf32>
    %49 = vector.shape_cast %48 : vector<8x8xf32> to vector<8x8x1xf32>
    %cst_25 = arith.constant dense<0.000000e+00> : vector<8x1xf32>
    %50 = vector.multi_reduction <add>, %49, %cst_25 [1] : vector<8x8x1xf32> to vector<8x1xf32>
    %cst_26 = arith.constant 1.250000e-01 : f32
    %51 = vector.broadcast %cst_26 : f32 to vector<8x1xf32>
    %52 = arith.mulf %50, %51 : vector<8x1xf32>
    %53 = arith.subf %27, %1 : vector<8x8x8xf32>
    %cst_27 = arith.constant 1.250000e-01 : f32
    %54 = vector.broadcast %cst_27 : f32 to vector<8x8x8xf32>
    %55 = arith.mulf %53, %54 : vector<8x8x8xf32>
    %56 = arith.addf %13, %36 : vector<8x1xf32>
    %57 = arith.addf %14, %52 : vector<8x1xf32>
    %58 = math.absf %36 : vector<8x1xf32>
    %cst_28 = arith.constant 0x7F800000 : f32
    %59 = vector.broadcast %cst_28 : f32 to vector<8x1xf32>
    %60 = arith.cmpf olt, %58, %59 : vector<8x1xf32>
    %61 = vector.shape_cast %60 : vector<8x1xi1> to vector<8x1x1xi1>
    %cst_29 = arith.constant 0.000000e+00 : f32
    %62 = vector.shape_cast %61 : vector<8x1x1xi1> to vector<8x1x1xi1>
    %63 = vector.broadcast %62 : vector<8x1x1xi1> to vector<8x8x8xi1>
    %64 = vector.broadcast %cst_29 : f32 to vector<8x8x8xf32>
    %65 = arith.select %63, %55, %64 : vector<8x8x8xi1>, vector<8x8x8xf32>
    "tpu.trace_start"() <{level = 10 : i32, message = "bdn,bnc->bdc"}> : () -> ()
    %cst_30 = arith.constant dense<0.000000e+00> : vector<8x32x8xf32>
    %66 = tpu.matmul %10, %65, %cst_30 {dimension_numbers = #tpu.dot_dimension_numbers<[2], [1], [1], [2], [0, 0, 0, 1, 1, 2], [0], [0]>} : vector<8x32x8xf32>, vector<8x8x8xf32>, vector<8x32x8xf32> -> vector<8x32x8xf32>
    "tpu.trace_stop"() : () -> ()
    %cst_31 = arith.constant dense<0.000000e+00> : vector<8x8xf32>
    %67 = vector.multi_reduction <add>, %65, %cst_31 [1] : vector<8x8x8xf32> to vector<8x8xf32>
    %68 = vector.shape_cast %67 : vector<8x8xf32> to vector<8x1x8xf32>
    %cst_32 = arith.constant 1.000000e-01 : f32
    %69 = vector.broadcast %cst_32 : f32 to vector<8x32x8xf32>
    %70 = arith.mulf %69, %66 : vector<8x32x8xf32>
    %71 = arith.subf %7, %70 : vector<8x32x8xf32>
    %cst_33 = arith.constant 1.000000e-01 : f32
    %72 = vector.broadcast %cst_33 : f32 to vector<8x1x8xf32>
    %73 = arith.mulf %72, %68 : vector<8x1x8xf32>
    %74 = arith.subf %9, %73 : vector<8x1x8xf32>
    "tpu.trace_start"() <{level = 10 : i32, message = "bnd,bdc->bnc"}> : () -> ()
    %cst_34 = arith.constant dense<0.000000e+00> : vector<8x8x8xf32>
    %75 = tpu.matmul %0, %71, %cst_34 {dimension_numbers = #tpu.dot_dimension_numbers<[2], [1], [1], [2], [0, 0, 0, 1, 1, 2], [0], [0]>} : vector<8x8x32xf32>, vector<8x32x8xf32>, vector<8x8x8xf32> -> vector<8x8x8xf32>
    "tpu.trace_stop"() : () -> ()
    %76 = vector.broadcast %74 : vector<8x1x8xf32> to vector<8x8x8xf32>
    %77 = arith.addf %75, %76 : vector<8x8x8xf32>
    %cst_35 = arith.constant dense<0xFF800000> : vector<8x8xf32>
    %78 = vector.multi_reduction <maximumf>, %77, %cst_35 [2] : vector<8x8x8xf32> to vector<8x8xf32>
    %79 = vector.shape_cast %78 : vector<8x8xf32> to vector<8x8x1xf32>
    %80 = vector.broadcast %79 : vector<8x8x1xf32> to vector<8x8x8xf32>
    %81 = arith.subf %77, %80 : vector<8x8x8xf32>
    %82 = math.exp %81 : vector<8x8x8xf32>
    %cst_36 = arith.constant dense<0.000000e+00> : vector<8x8xf32>
    %83 = vector.multi_reduction <add>, %82, %cst_36 [2] : vector<8x8x8xf32> to vector<8x8xf32>
    %84 = vector.shape_cast %83 : vector<8x8xf32> to vector<8x8x1xf32>
    %85 = tpu.reciprocal %84 {approx = true} : vector<8x8x1xf32> -> vector<8x8x1xf32>
    %86 = vector.broadcast %85 : vector<8x8x1xf32> to vector<8x8x8xf32>
    %87 = arith.mulf %82, %86 : vector<8x8x8xf32>
    %88 = math.log %84 : vector<8x8x1xf32>
    %89 = arith.addf %79, %88 : vector<8x8x1xf32>
    %90 = arith.mulf %1, %77 : vector<8x8x8xf32>
    %cst_37 = arith.constant dense<0.000000e+00> : vector<8x8xf32>
    %91 = vector.multi_reduction <add>, %90, %cst_37 [2] : vector<8x8x8xf32> to vector<8x8xf32>
    %92 = vector.shape_cast %91 : vector<8x8xf32> to vector<8x8x1xf32>
    %93 = arith.subf %89, %92 : vector<8x8x1xf32>
    %cst_38 = arith.constant dense<0.000000e+00> : vector<8x1xf32>
    %94 = vector.multi_reduction <add>, %93, %cst_38 [1] : vector<8x8x1xf32> to vector<8x1xf32>
    %cst_39 = arith.constant 1.250000e-01 : f32
    %95 = vector.broadcast %cst_39 : f32 to vector<8x1xf32>
    %96 = arith.mulf %94, %95 : vector<8x1xf32>
    %97 = vector.broadcast %79 : vector<8x8x1xf32> to vector<8x8x8xf32>
    %98 = arith.cmpf oeq, %77, %97 : vector<8x8x8xf32>
    %c8_i32_40 = arith.constant 8 : i32
    %99 = vector.broadcast %c8_i32_40 : i32 to vector<8x8x8xi32>
    %100 = arith.select %98, %11, %99 : vector<8x8x8xi1>, vector<8x8x8xi32>
    %cst_41 = arith.constant dense<2147483647> : vector<8x8xi32>
    %101 = vector.multi_reduction <minsi>, %100, %cst_41 [2] : vector<8x8x8xi32> to vector<8x8xi32>
    %102 = vector.shape_cast %101 : vector<8x8xi32> to vector<8x8x1xi32>
    %103 = vector.broadcast %102 : vector<8x8x1xi32> to vector<8x8x8xi32>
    %104 = arith.cmpi eq, %11, %103 : vector<8x8x8xi32>
    %105 = arith.extui %104 : vector<8x8x8xi1> to vector<8x8x8xi32>
    %106 = arith.sitofp %105 : vector<8x8x8xi32> to vector<8x8x8xf32>
    %107 = arith.mulf %1, %106 : vector<8x8x8xf32>
    %cst_42 = arith.constant dense<0.000000e+00> : vector<8x8xf32>
    %108 = vector.multi_reduction <add>, %107, %cst_42 [2] : vector<8x8x8xf32> to vector<8x8xf32>
    %109 = vector.shape_cast %108 : vector<8x8xf32> to vector<8x8x1xf32>
    %cst_43 = arith.constant dense<0.000000e+00> : vector<8x1xf32>
    %110 = vector.multi_reduction <add>, %109, %cst_43 [1] : vector<8x8x1xf32> to vector<8x1xf32>
    %cst_44 = arith.constant 1.250000e-01 : f32
    %111 = vector.broadcast %cst_44 : f32 to vector<8x1xf32>
    %112 = arith.mulf %110, %111 : vector<8x1xf32>
    %113 = arith.subf %87, %1 : vector<8x8x8xf32>
    %cst_45 = arith.constant 1.250000e-01 : f32
    %114 = vector.broadcast %cst_45 : f32 to vector<8x8x8xf32>
    %115 = arith.mulf %113, %114 : vector<8x8x8xf32>
    %116 = arith.addf %56, %96 : vector<8x1xf32>
    %117 = arith.addf %57, %112 : vector<8x1xf32>
    %118 = math.absf %96 : vector<8x1xf32>
    %cst_46 = arith.constant 0x7F800000 : f32
    %119 = vector.broadcast %cst_46 : f32 to vector<8x1xf32>
    %120 = arith.cmpf olt, %118, %119 : vector<8x1xf32>
    %121 = vector.shape_cast %120 : vector<8x1xi1> to vector<8x1x1xi1>
    %cst_47 = arith.constant 0.000000e+00 : f32
    %122 = vector.shape_cast %121 : vector<8x1x1xi1> to vector<8x1x1xi1>
    %123 = vector.broadcast %122 : vector<8x1x1xi1> to vector<8x8x8xi1>
    %124 = vector.broadcast %cst_47 : f32 to vector<8x8x8xf32>
    %125 = arith.select %123, %115, %124 : vector<8x8x8xi1>, vector<8x8x8xf32>
    "tpu.trace_start"() <{level = 10 : i32, message = "bdn,bnc->bdc"}> : () -> ()
    %cst_48 = arith.constant dense<0.000000e+00> : vector<8x32x8xf32>
    %126 = tpu.matmul %10, %125, %cst_48 {dimension_numbers = #tpu.dot_dimension_numbers<[2], [1], [1], [2], [0, 0, 0, 1, 1, 2], [0], [0]>} : vector<8x32x8xf32>, vector<8x8x8xf32>, vector<8x32x8xf32> -> vector<8x32x8xf32>
    "tpu.trace_stop"() : () -> ()
    %cst_49 = arith.constant dense<0.000000e+00> : vector<8x8xf32>
    %127 = vector.multi_reduction <add>, %125, %cst_49 [1] : vector<8x8x8xf32> to vector<8x8xf32>
    %128 = vector.shape_cast %127 : vector<8x8xf32> to vector<8x1x8xf32>
    %cst_50 = arith.constant 1.000000e-01 : f32
    %129 = vector.broadcast %cst_50 : f32 to vector<8x32x8xf32>
    %130 = arith.mulf %129, %126 : vector<8x32x8xf32>
    %131 = arith.subf %71, %130 : vector<8x32x8xf32>
    %cst_51 = arith.constant 1.000000e-01 : f32
    %132 = vector.broadcast %cst_51 : f32 to vector<8x1x8xf32>
    %133 = arith.mulf %132, %128 : vector<8x1x8xf32>
    %134 = arith.subf %74, %133 : vector<8x1x8xf32>
    "tpu.trace_start"() <{level = 10 : i32, message = "bnd,bdc->bnc"}> : () -> ()
    %cst_52 = arith.constant dense<0.000000e+00> : vector<8x8x8xf32>
    %135 = tpu.matmul %0, %131, %cst_52 {dimension_numbers = #tpu.dot_dimension_numbers<[2], [1], [1], [2], [0, 0, 0, 1, 1, 2], [0], [0]>} : vector<8x8x32xf32>, vector<8x32x8xf32>, vector<8x8x8xf32> -> vector<8x8x8xf32>
    "tpu.trace_stop"() : () -> ()
    %136 = vector.broadcast %134 : vector<8x1x8xf32> to vector<8x8x8xf32>
    %137 = arith.addf %135, %136 : vector<8x8x8xf32>
    %cst_53 = arith.constant dense<0xFF800000> : vector<8x8xf32>
    %138 = vector.multi_reduction <maximumf>, %137, %cst_53 [2] : vector<8x8x8xf32> to vector<8x8xf32>
    %139 = vector.shape_cast %138 : vector<8x8xf32> to vector<8x8x1xf32>
    %140 = vector.broadcast %139 : vector<8x8x1xf32> to vector<8x8x8xf32>
    %141 = arith.subf %137, %140 : vector<8x8x8xf32>
    %142 = math.exp %141 : vector<8x8x8xf32>
    %cst_54 = arith.constant dense<0.000000e+00> : vector<8x8xf32>
    %143 = vector.multi_reduction <add>, %142, %cst_54 [2] : vector<8x8x8xf32> to vector<8x8xf32>
    %144 = vector.shape_cast %143 : vector<8x8xf32> to vector<8x8x1xf32>
    %145 = tpu.reciprocal %144 {approx = true} : vector<8x8x1xf32> -> vector<8x8x1xf32>
    %146 = vector.broadcast %145 : vector<8x8x1xf32> to vector<8x8x8xf32>
    %147 = arith.mulf %142, %146 : vector<8x8x8xf32>
    %148 = math.log %144 : vector<8x8x1xf32>
    %149 = arith.addf %139, %148 : vector<8x8x1xf32>
    %150 = arith.mulf %1, %137 : vector<8x8x8xf32>
    %cst_55 = arith.constant dense<0.000000e+00> : vector<8x8xf32>
    %151 = vector.multi_reduction <add>, %150, %cst_55 [2] : vector<8x8x8xf32> to vector<8x8xf32>
    %152 = vector.shape_cast %151 : vector<8x8xf32> to vector<8x8x1xf32>
    %153 = arith.subf %149, %152 : vector<8x8x1xf32>
    %cst_56 = arith.constant dense<0.000000e+00> : vector<8x1xf32>
    %154 = vector.multi_reduction <add>, %153, %cst_56 [1] : vector<8x8x1xf32> to vector<8x1xf32>
    %cst_57 = arith.constant 1.250000e-01 : f32
    %155 = vector.broadcast %cst_57 : f32 to vector<8x1xf32>
    %156 = arith.mulf %154, %155 : vector<8x1xf32>
    %157 = vector.broadcast %139 : vector<8x8x1xf32> to vector<8x8x8xf32>
    %158 = arith.cmpf oeq, %137, %157 : vector<8x8x8xf32>
    %c8_i32_58 = arith.constant 8 : i32
    %159 = vector.broadcast %c8_i32_58 : i32 to vector<8x8x8xi32>
    %160 = arith.select %158, %11, %159 : vector<8x8x8xi1>, vector<8x8x8xi32>
    %cst_59 = arith.constant dense<2147483647> : vector<8x8xi32>
    %161 = vector.multi_reduction <minsi>, %160, %cst_59 [2] : vector<8x8x8xi32> to vector<8x8xi32>
    %162 = vector.shape_cast %161 : vector<8x8xi32> to vector<8x8x1xi32>
    %163 = vector.broadcast %162 : vector<8x8x1xi32> to vector<8x8x8xi32>
    %164 = arith.cmpi eq, %11, %163 : vector<8x8x8xi32>
    %165 = arith.extui %164 : vector<8x8x8xi1> to vector<8x8x8xi32>
    %166 = arith.sitofp %165 : vector<8x8x8xi32> to vector<8x8x8xf32>
    %167 = arith.mulf %1, %166 : vector<8x8x8xf32>
    %cst_60 = arith.constant dense<0.000000e+00> : vector<8x8xf32>
    %168 = vector.multi_reduction <add>, %167, %cst_60 [2] : vector<8x8x8xf32> to vector<8x8xf32>
    %169 = vector.shape_cast %168 : vector<8x8xf32> to vector<8x8x1xf32>
    %cst_61 = arith.constant dense<0.000000e+00> : vector<8x1xf32>
    %170 = vector.multi_reduction <add>, %169, %cst_61 [1] : vector<8x8x1xf32> to vector<8x1xf32>
    %cst_62 = arith.constant 1.250000e-01 : f32
    %171 = vector.broadcast %cst_62 : f32 to vector<8x1xf32>
    %172 = arith.mulf %170, %171 : vector<8x1xf32>
    %173 = arith.subf %147, %1 : vector<8x8x8xf32>
    %cst_63 = arith.constant 1.250000e-01 : f32
    %174 = vector.broadcast %cst_63 : f32 to vector<8x8x8xf32>
    %175 = arith.mulf %173, %174 : vector<8x8x8xf32>
    %176 = arith.addf %116, %156 : vector<8x1xf32>
    %177 = arith.addf %117, %172 : vector<8x1xf32>
    %178 = math.absf %156 : vector<8x1xf32>
    %cst_64 = arith.constant 0x7F800000 : f32
    %179 = vector.broadcast %cst_64 : f32 to vector<8x1xf32>
    %180 = arith.cmpf olt, %178, %179 : vector<8x1xf32>
    %181 = vector.shape_cast %180 : vector<8x1xi1> to vector<8x1x1xi1>
    %cst_65 = arith.constant 0.000000e+00 : f32
    %182 = vector.shape_cast %181 : vector<8x1x1xi1> to vector<8x1x1xi1>
    %183 = vector.broadcast %182 : vector<8x1x1xi1> to vector<8x8x8xi1>
    %184 = vector.broadcast %cst_65 : f32 to vector<8x8x8xf32>
    %185 = arith.select %183, %175, %184 : vector<8x8x8xi1>, vector<8x8x8xf32>
    "tpu.trace_start"() <{level = 10 : i32, message = "bdn,bnc->bdc"}> : () -> ()
    %cst_66 = arith.constant dense<0.000000e+00> : vector<8x32x8xf32>
    %186 = tpu.matmul %10, %185, %cst_66 {dimension_numbers = #tpu.dot_dimension_numbers<[2], [1], [1], [2], [0, 0, 0, 1, 1, 2], [0], [0]>} : vector<8x32x8xf32>, vector<8x8x8xf32>, vector<8x32x8xf32> -> vector<8x32x8xf32>
    "tpu.trace_stop"() : () -> ()
    %cst_67 = arith.constant dense<0.000000e+00> : vector<8x8xf32>
    %187 = vector.multi_reduction <add>, %185, %cst_67 [1] : vector<8x8x8xf32> to vector<8x8xf32>
    %188 = vector.shape_cast %187 : vector<8x8xf32> to vector<8x1x8xf32>
    %cst_68 = arith.constant 1.000000e-01 : f32
    %189 = vector.broadcast %cst_68 : f32 to vector<8x32x8xf32>
    %190 = arith.mulf %189, %186 : vector<8x32x8xf32>
    %191 = arith.subf %131, %190 : vector<8x32x8xf32>
    %cst_69 = arith.constant 1.000000e-01 : f32
    %192 = vector.broadcast %cst_69 : f32 to vector<8x1x8xf32>
    %193 = arith.mulf %192, %188 : vector<8x1x8xf32>
    %194 = arith.subf %134, %193 : vector<8x1x8xf32>
    "tpu.trace_start"() <{level = 10 : i32, message = "bnd,bdc->bnc"}> : () -> ()
    %cst_70 = arith.constant dense<0.000000e+00> : vector<8x8x8xf32>
    %195 = tpu.matmul %2, %191, %cst_70 {dimension_numbers = #tpu.dot_dimension_numbers<[2], [1], [1], [2], [0, 0, 0, 1, 1, 2], [0], [0]>} : vector<8x8x32xf32>, vector<8x32x8xf32>, vector<8x8x8xf32> -> vector<8x8x8xf32>
    "tpu.trace_stop"() : () -> ()
    %196 = vector.broadcast %194 : vector<8x1x8xf32> to vector<8x8x8xf32>
    %197 = arith.addf %195, %196 : vector<8x8x8xf32>
    %cst_71 = arith.constant dense<0xFF800000> : vector<8x8xf32>
    %198 = vector.multi_reduction <maximumf>, %197, %cst_71 [2] : vector<8x8x8xf32> to vector<8x8xf32>
    %199 = vector.shape_cast %198 : vector<8x8xf32> to vector<8x8x1xf32>
    %200 = vector.broadcast %199 : vector<8x8x1xf32> to vector<8x8x8xf32>
    %201 = arith.subf %197, %200 : vector<8x8x8xf32>
    %202 = math.exp %201 : vector<8x8x8xf32>
    %cst_72 = arith.constant dense<0.000000e+00> : vector<8x8xf32>
    %203 = vector.multi_reduction <add>, %202, %cst_72 [2] : vector<8x8x8xf32> to vector<8x8xf32>
    %204 = vector.shape_cast %203 : vector<8x8xf32> to vector<8x8x1xf32>
    %205 = math.log %204 : vector<8x8x1xf32>
    %206 = arith.addf %199, %205 : vector<8x8x1xf32>
    %207 = arith.mulf %3, %197 : vector<8x8x8xf32>
    %cst_73 = arith.constant dense<0.000000e+00> : vector<8x8xf32>
    %208 = vector.multi_reduction <add>, %207, %cst_73 [2] : vector<8x8x8xf32> to vector<8x8xf32>
    %209 = vector.shape_cast %208 : vector<8x8xf32> to vector<8x8x1xf32>
    %210 = arith.subf %206, %209 : vector<8x8x1xf32>
    %cst_74 = arith.constant dense<0.000000e+00> : vector<8x1xf32>
    %211 = vector.multi_reduction <add>, %210, %cst_74 [1] : vector<8x8x1xf32> to vector<8x1xf32>
    %cst_75 = arith.constant 1.250000e-01 : f32
    %212 = vector.broadcast %cst_75 : f32 to vector<8x1xf32>
    %213 = arith.mulf %211, %212 : vector<8x1xf32>
    %214 = vector.broadcast %199 : vector<8x8x1xf32> to vector<8x8x8xf32>
    %215 = arith.cmpf oeq, %197, %214 : vector<8x8x8xf32>
    %c8_i32_76 = arith.constant 8 : i32
    %216 = vector.broadcast %c8_i32_76 : i32 to vector<8x8x8xi32>
    %217 = arith.select %215, %12, %216 : vector<8x8x8xi1>, vector<8x8x8xi32>
    %cst_77 = arith.constant dense<2147483647> : vector<8x8xi32>
    %218 = vector.multi_reduction <minsi>, %217, %cst_77 [2] : vector<8x8x8xi32> to vector<8x8xi32>
    %219 = vector.shape_cast %218 : vector<8x8xi32> to vector<8x8x1xi32>
    %220 = vector.broadcast %219 : vector<8x8x1xi32> to vector<8x8x8xi32>
    %221 = arith.cmpi eq, %12, %220 : vector<8x8x8xi32>
    %222 = arith.extui %221 : vector<8x8x8xi1> to vector<8x8x8xi32>
    %223 = arith.sitofp %222 : vector<8x8x8xi32> to vector<8x8x8xf32>
    %224 = arith.mulf %3, %223 : vector<8x8x8xf32>
    %cst_78 = arith.constant dense<0.000000e+00> : vector<8x8xf32>
    %225 = vector.multi_reduction <add>, %224, %cst_78 [2] : vector<8x8x8xf32> to vector<8x8xf32>
    %226 = vector.shape_cast %225 : vector<8x8xf32> to vector<8x8x1xf32>
    %cst_79 = arith.constant dense<0.000000e+00> : vector<8x1xf32>
    %227 = vector.multi_reduction <add>, %226, %cst_79 [1] : vector<8x8x1xf32> to vector<8x1xf32>
    %cst_80 = arith.constant 1.250000e-01 : f32
    %228 = vector.broadcast %cst_80 : f32 to vector<8x1xf32>
    %229 = arith.mulf %227, %228 : vector<8x1xf32>
    %cst_81 = arith.constant 0.333333343 : f32
    %230 = vector.broadcast %cst_81 : f32 to vector<8x1xf32>
    %231 = arith.mulf %176, %230 : vector<8x1xf32>
    %cst_82 = arith.constant 0.333333343 : f32
    %232 = vector.broadcast %cst_82 : f32 to vector<8x1xf32>
    %233 = arith.mulf %177, %232 : vector<8x1xf32>
    %234 = tpu.iota {dimensions = array<i32: 1>} : vector<8x128xi32>
    %c0_i32 = arith.constant 0 : i32
    %235 = vector.broadcast %c0_i32 : i32 to vector<8x128xi32>
    %236 = arith.cmpi eq, %234, %235 : vector<8x128xi32>
    %cst_83 = arith.constant 0.000000e+00 : f32
    %237 = vector.broadcast %cst_83 : f32 to vector<8x128xf32>
    %238 = vector.shape_cast %213 : vector<8x1xf32> to vector<8x1xf32>
    %239 = vector.broadcast %238 : vector<8x1xf32> to vector<8x128xf32>
    %240 = arith.select %236, %239, %237 : vector<8x128xi1>, vector<8x128xf32>
    %c1_i32 = arith.constant 1 : i32
    %241 = vector.broadcast %c1_i32 : i32 to vector<8x128xi32>
    %242 = arith.cmpi eq, %234, %241 : vector<8x128xi32>
    %243 = vector.shape_cast %229 : vector<8x1xf32> to vector<8x1xf32>
    %244 = vector.broadcast %243 : vector<8x1xf32> to vector<8x128xf32>
    %245 = arith.select %242, %244, %240 : vector<8x128xi1>, vector<8x128xf32>
    %c2_i32 = arith.constant 2 : i32
    %246 = vector.broadcast %c2_i32 : i32 to vector<8x128xi32>
    %247 = arith.cmpi eq, %234, %246 : vector<8x128xi32>
    %248 = vector.shape_cast %231 : vector<8x1xf32> to vector<8x1xf32>
    %249 = vector.broadcast %248 : vector<8x1xf32> to vector<8x128xf32>
    %250 = arith.select %247, %249, %245 : vector<8x128xi1>, vector<8x128xf32>
    %c3_i32 = arith.constant 3 : i32
    %251 = vector.broadcast %c3_i32 : i32 to vector<8x128xi32>
    %252 = arith.cmpi eq, %234, %251 : vector<8x128xi32>
    %253 = vector.shape_cast %233 : vector<8x1xf32> to vector<8x1xf32>
    %254 = vector.broadcast %253 : vector<8x1xf32> to vector<8x128xf32>
    %255 = arith.select %252, %254, %250 : vector<8x128xi1>, vector<8x128xf32>
    %c0_84 = arith.constant 0 : index
    %c0_85 = arith.constant 0 : index
    %256 = vector.load %arg7[%c0_84, %c0_85] : memref<8x128xf32, #tpu.memory_space<vmem>>, vector<8x128xf32>
    tpu.vector_store %arg7[%c0_84, %c0_85], %255 {strides = array<i32>} : memref<8x128xf32, #tpu.memory_space<vmem>>, vector<8x128xf32>,
    return
  }
  func.func @transform_0(%arg0: i32) -> (i32, i32, i32) {
    %c0_i32 = arith.constant 0 : i32
    %c0_i32_0 = arith.constant 0 : i32
    %c0_i32_1 = arith.constant 0 : i32
    return %arg0, %c0_i32, %c0_i32_0 : i32, i32, i32
  }
  func.func @transform_1(%arg0: i32) -> (i32, i32, i32) {
    %c0_i32 = arith.constant 0 : i32
    %c0_i32_0 = arith.constant 0 : i32
    %c0_i32_1 = arith.constant 0 : i32
    return %arg0, %c0_i32, %c0_i32_0 : i32, i32, i32
  }
  func.func @transform_2(%arg0: i32) -> (i32, i32, i32) {
    %c0_i32 = arith.constant 0 : i32
    %c0_i32_0 = arith.constant 0 : i32
    %c0_i32_1 = arith.constant 0 : i32
    return %arg0, %c0_i32, %c0_i32_0 : i32, i32, i32
  }
  func.func @transform_3(%arg0: i32) -> (i32, i32, i32) {
    %c0_i32 = arith.constant 0 : i32
    %c0_i32_0 = arith.constant 0 : i32
    %c0_i32_1 = arith.constant 0 : i32
    return %arg0, %c0_i32, %c0_i32_0 : i32, i32, i32
  }
  func.func @transform_4(%arg0: i32) -> (i32, i32) {
    %c0_i32 = arith.constant 0 : i32
    %c0_i32_0 = arith.constant 0 : i32
    %c0_i32_1 = arith.constant 0 : i32
    return %c0_i32, %c0_i32_0 : i32, i32
  }
  func.func @transform_5(%arg0: i32) -> (i32, i32, i32) {
    %c0_i32 = arith.constant 0 : i32
    %c0_i32_0 = arith.constant 0 : i32
    %c0_i32_1 = arith.constant 0 : i32
    %c0_i32_2 = arith.constant 0 : i32
    return %c0_i32, %c0_i32_0, %c0_i32_1 : i32, i32, i32
  }
  func.func @transform_6(%arg0: i32) -> (i32, i32) {
    %c0_i32 = arith.constant 0 : i32
    %c0_i32_0 = arith.constant 0 : i32
    return %arg0, %c0_i32 : i32, i32
  }
}

</mosaic_0001>

<bundles_post_ra>
// kernel: meta_forward.1
= control target key start
LH: loop header
LB: loop body
LE: loop exit
PB: predicated region body
PF: predicated region fallthrough
CT: control target
= control target key end

     0   :  { %s9298_s21 = smov 0   ;;  %s12251_s0 = inlined_call_operand.vmem [shape: f32[16,8,32], index: 0, kind: input, shape index: {}]   ;;  %s12252_s1 = inlined_call_operand.vmem [shape: f32[16,8,8], index: 1, kind: input, shape index: {}]   ;;  %s12253_s2 = inlined_call_operand.vmem [shape: f32[16,8,32], index: 2, kind: input, shape index: {}]   ;;  %s12254_s3 = inlined_call_operand.vmem [shape: f32[16,8,8], index: 3, kind: input, shape index: {}]   ;;  %s12255_s4 = inlined_call_operand.vmem [shape: f32[32,8], index: 4, kind: input, shape index: {}]   ;;  %s12256_s5 = inlined_call_operand.vmem [shape: f32[1,1,8], index: 5, kind: input, shape index: {}]   ;;  %s12257_s6 = inlined_call_operand.vmem [shape: f32[16,128], index: 6, kind: output, shape index: {}]  }
   0x1 LB: > { %s9304_s22 = sadd.s32 4294967295, %s9258_s21   ;;  %p7810_p0 = scmp.ge.s32.totalorder %s9258_s21, 1  ;;  %s9258_s21 = sphi %s9298_s21, %s16_s21  }
   0x2   : > { %p246_p1 = scmp.lt.s32.totalorder %s9258_s21, 3 }
   0x4   : > { %p247_p2 = pnand %p7810_p0, %p246_p1 }
   0x6   : > { %250 = sbr.rel (%p247_p2) target bundleno = 3271 (0xcc7), region = 44 }
   0xd   : > { %v9311_v0 = vld [vmem:[%s12255_s4] sm:$0xff]  ;;  %v9316_v1 = vld [vmem:[%s12255_s4 + $0x8] sm:$0xff]  ;;  %v9321_v2 = vld [vmem:[%s12255_s4 + $0x10] sm:$0xff]  ;;  %v12261_v3 = vmov 0.0|0.0   ;;  %s7811_s7 = sshll.u32 %s9304_s22, 3  ;;  %vm9261_vm0 = vmmov 0   ;;  %v12258_v16 = vlaneseq }
   0xe   : > { %8830 = vmatprep.subr.bf16.mxu0 %v12261_v3  ;;  %8836 = vmatprep.subr.bf16.mxu1 %v12261_v3  ;;  %v8831_v4 = vpack.c.bf16 %v9316_v1, %v9311_v0  ;;  %v9330_v5 = vld [vmem:[%s12255_s4 + $0x18] sm:$0xff]  ;;  %v12259_v6 = vmov 0.0   ;;  %p291_p3 = scmp.lt.s32.totalorder %s7811_s7, 15  ;;  %vm619_vm1 = vcmask 261120   ;;  %v9251_v19 = vld [vmem:[%s12256_s5] ss:$0 sm:$0xff] }
   0xf   : > { %8294 = vmatprep.mubr.msk.f32.mxu0 %vm9261_vm0, %v12259_v6  ;;  %8305 = vmatprep.mubr.msk.f32.mxu1 %vm9261_vm0, %v12259_v6  ;;  %v8834_v7 = vpack.c.bf16 %v9330_v5, %v9321_v2  ;;  %v615_v17 = vshrl.u32 %v12258_v16, 7  ;;  %vm1204_vm2 = vcmask 64512   ;;  %p314_p4 = scmp.lt.s32.totalorder %s9304_s22, 1 }
  0x10   : > { %8832 = vmatpush3.bf16.msra.mxu0 %v8831_v4  ;;  %8838 = vmatpush3.bf16.msra.mxu1 %v8831_v4  ;;  %s12915_s7 = smov (!%p291_p3, %s7811_s7), 15 }
  0x11   : > { %8833 = vmatprep.subr.bf16.mxu0 %v12261_v3  ;;  %8839 = vmatprep.subr.bf16.mxu1 %v12261_v3  ;;  %s9341_s8 = sshll.u32 %s12915_s7, 3  ;;  %v9414_v18 = vsub.s32 0, %v615_v17  ;;  %s12917_s22 = smov (!%p314_p4, %s9304_s22), 1 }
  0x12   : > { %s9347_s11 = scalar_lea.vmem %s12251_s0, %s9341_s8  ;;  %s9447_s16 = scalar_lea.vmem %s12252_s1, %s9341_s8 }
  0x13   : > { %v9350_v8 = vld [vmem:[%s9347_s11] sm:$0xff]  ;;  %v9355_v9 = vld [vmem:[%s9347_s11 + $0x8] sm:$0xff]  ;;  %v9368_v10 = vld [vmem:[%s9347_s11 + $0x10] sm:$0xff]  ;;  %12463 = vst [vmem:[#allocation2_spill] sm:$0xff] %v9414_v18  ;;  %s11189_s7 = scalar_lea.vmem %s12253_s2, %s9341_s8 }
  0x14   : > { %8835 = vmatpush3.bf16.msra.mxu0 %v8834_v7  ;;  %8841 = vmatpush3.bf16.msra.mxu1 %v8834_v7  ;;  %v9371_v11 = vld [vmem:[%s9347_s11 + $0x18] sm:$0xff]  ;;  %v9386_v12 = vld [vmem:[%s9347_s11 + $0x20] sm:$0xff]  ;;  %v9389_v13 = vld [vmem:[%s9347_s11 + $0x28] sm:$0xff] }
  0x15   : > { %8842 = vmatprep.subr.bf16.mxu0 %v12261_v3  ;;  %8848 = vmatprep.subr.bf16.mxu1 %v12261_v3  ;;  %v9404_v14 = vld [vmem:[%s9347_s11 + $0x30] sm:$0xff]  ;;  %v9407_v15 = vld [vmem:[%s9347_s11 + $0x38] sm:$0xff]  ;;  %v9450_v46 = vld [vmem:[%s9447_s16] sm:$0xff] }
  0x16   : > { %v9463_v54 = vld [vmem:[%s9447_s16 + $0x8] sm:$0xff]  ;;  %v9469_v57 = vld [vmem:[%s9447_s16 + $0x10] sm:$0xff]  ;;  %v9475_v60 = vld [vmem:[%s9447_s16 + $0x18] sm:$0xff] }
  0x17   : > { %8295 = vmatmul.mubr.msk.f32.vlgmr.msra.gmra.mrb[0].mxu0 %vm619_vm1, %v9350_v8  ;;  %8306 = vmatmul.mubr.msk.f32.vlgmr.msra.gmra.mrb[0].mxu1 %vm619_vm1, %v9355_v9 }
  0x18   : > { %8844 = vmatpush3.bf16.msra.mxu0 %v8831_v4  ;;  %8850 = vmatpush3.bf16.msra.mxu1 %v8831_v4 }
  0x19   : > { %8845 = vmatprep.subr.bf16.mxu0 %v12261_v3  ;;  %8851 = vmatprep.subr.bf16.mxu1 %v12261_v3 }
  0x1a   : > { %8316 = vmatprep.mubr.msk.f32.mxu0 %vm9261_vm0, %v12259_v6  ;;  %8327 = vmatprep.mubr.msk.f32.mxu1 %vm9261_vm0, %v12259_v6 }
  0x1c   : > { %8847 = vmatpush3.bf16.msra.mxu0 %v8834_v7  ;;  %8853 = vmatpush3.bf16.msra.mxu1 %v8834_v7 }
  0x1d   : > { %8854 = vmatprep.subr.bf16.mxu0 %v12261_v3  ;;  %8860 = vmatprep.subr.bf16.mxu1 %v12261_v3 }
  0x1f   : > { %8317 = vmatmul.mubr.msk.f32.vlgmr.msra.gmra.mrb[2].mxu0 %vm619_vm1, %v9368_v10  ;;  %8328 = vmatmul.mubr.msk.f32.vlgmr.msra.gmra.mrb[2].mxu1 %vm619_vm1, %v9371_v11 }
  0x20   : > { %8856 = vmatpush3.bf16.msra.mxu0 %v8831_v4  ;;  %8862 = vmatpush3.bf16.msra.mxu1 %v8831_v4 }
  0x21   : > { %8857 = vmatprep.subr.bf16.mxu0 %v12261_v3  ;;  %8863 = vmatprep.subr.bf16.mxu1 %v12261_v3 }
  0x22   : > { %8338 = vmatprep.mubr.msk.f32.mxu0 %vm9261_vm0, %v12259_v6  ;;  %8349 = vmatprep.mubr.msk.f32.mxu1 %vm9261_vm0, %v12259_v6 }
  0x24   : > { %8859 = vmatpush3.bf16.msra.mxu0 %v8834_v7  ;;  %8865 = vmatpush3.bf16.msra.mxu1 %v8834_v7 }
  0x25   : > { %8866 = vmatprep.subr.bf16.mxu0 %v12261_v3  ;;  %8872 = vmatprep.subr.bf16.mxu1 %v12261_v3 }
  0x27   : > { %8339 = vmatmul.mubr.msk.f32.vlgmr.msra.gmra.mrb[4].mxu0 %vm619_vm1, %v9386_v12  ;;  %8350 = vmatmul.mubr.msk.f32.vlgmr.msra.gmra.mrb[4].mxu1 %vm619_vm1, %v9389_v13 }
  0x28   : > { %8868 = vmatpush3.bf16.msra.mxu0 %v8831_v4  ;;  %8874 = vmatpush3.bf16.msra.mxu1 %v8831_v4 }
  0x29   : > { %8869 = vmatprep.subr.bf16.mxu0 %v12261_v3  ;;  %8875 = vmatprep.subr.bf16.mxu1 %v12261_v3 }
  0x2a   : > { %8360 = vmatprep.mubr.msk.f32.mxu0 %vm9261_vm0, %v12259_v6  ;;  %8371 = vmatprep.mubr.msk.f32.mxu1 %vm9261_vm0, %v12259_v6 }
  0x2c   : > { %8871 = vmatpush3.bf16.msra.mxu0 %v8834_v7  ;;  %8877 = vmatpush3.bf16.msra.mxu1 %v8834_v7 }
  0x2f   : > { %8361 = vmatmul.mubr.msk.f32.vlgmr.msra.gmra.mrb[6].mxu0 %vm619_vm1, %v9404_v14  ;;  %8372 = vmatmul.mubr.msk.f32.vlgmr.msra.gmra.mrb[6].mxu1 %vm619_vm1, %v9407_v15 }
  0xea   : > { %v689_v20 = vpop.f32.mrb[0].mxu0  ;;  %v762_v21 = vpop.f32.mrb[0].mxu1 }
  0xeb   : > { %v9419_v22 = vadd.f32 %v9251_v19, %v689_v20  ;;  %v8296_v23 = vpop.f32.mrb[1].mxu0  ;;  %v9421_v24 = vadd.f32 %v9251_v19, %v762_v21  ;;  %v8307_v25 = vpop.f32.mrb[1].mxu1 }
  0xed   : > { %12464 = vst [vmem:[#allocation3_spill] sm:$0xff] %v9419_v22  ;;  %12465 = vst [vmem:[#allocation4_spill] sm:$0xff] %v9421_v24  ;;  %v1205_v26 = vsel %vm1204_vm2, %v9419_v22, -inf  ;;  %v1208_v27 = vsel %vm1204_vm2, %v9421_v24, -inf  ;;  %v1317_v53 = vmul.f32 %v9419_v22, %v9450_v46  ;;  %v1318_v56 = vmul.f32 %v9421_v24, %v9463_v54 }
  0xee   : > { %1206 = vmax.xlane.f32.xlu0 %v1205_v26 }
  0xef   : > { %v1325_v55 = vsel %vm1204_vm2, %v1317_v53, 0.0  ;;  %v1328_v58 = vsel %vm1204_vm2, %v1318_v56, 0.0 }
  0xf2   : > { %1209 = vmax.xlane.f32.xlu0 %v1208_v27  ;;  %v835_v28 = vpop.f32.mrb[2].mxu0  ;;  %v908_v29 = vpop.f32.mrb[2].mxu1 }
  0xf3   : > { %v9427_v30 = vadd.f32 %v9251_v19, %v835_v28  ;;  %v9429_v31 = vadd.f32 %v9251_v19, %v908_v29  ;;  %v8318_v32 = vpop.f32.mrb[3].mxu0  ;;  %v8329_v33 = vpop.f32.mrb[3].mxu1  ;;  %v9499_v29 = vld [vmem:[%s9447_s16 + $0x20] sm:$0xff] }
  0xf5   : > { %12466 = vst [vmem:[#allocation5_spill] sm:$0xff] %v9427_v30  ;;  %12467 = vst [vmem:[#allocation6_spill] sm:$0xff] %v9429_v31  ;;  %v1211_v34 = vsel %vm1204_vm2, %v9427_v30, -inf  ;;  %v1214_v35 = vsel %vm1204_vm2, %v9429_v31, -inf  ;;  %v1319_v59 = vmul.f32 %v9427_v30, %v9469_v57  ;;  %v1320_v62 = vmul.f32 %v9429_v31, %v9475_v60 }
  0xf6   : > { %1212 = vmax.xlane.f32.xlu1 %v1211_v34 }
  0xf7   : > { %v1331_v61 = vsel %vm1204_vm2, %v1319_v59, 0.0  ;;  %v1334_v63 = vsel %vm1204_vm2, %v1320_v62, 0.0 }
  0xfa   : > { %v1054_v36 = vpop.f32.mrb[4].mxu1  ;;  %1215 = vmax.xlane.f32.xlu1 %v1214_v35  ;;  %v981_v37 = vpop.f32.mrb[4].mxu0 }
  0xfb   : > { %v9435_v38 = vadd.f32 %v9251_v19, %v1054_v36  ;;  %v9437_v39 = vadd.f32 %v9251_v19, %v981_v37  ;;  %v8340_v40 = vpop.f32.mrb[5].mxu0  ;;  %v8351_v41 = vpop.f32.mrb[5].mxu1 }
  0xfc   : > { %v9514_v41 = vld [vmem:[%s9447_s16 + $0x28] sm:$0xff] }
  0xfd   : > { %12468 = vst [vmem:[#allocation7_spill] sm:$0xff] %v9435_v38  ;;  %12469 = vst [vmem:[#allocation8_spill] sm:$0xff] %v9437_v39  ;;  %v1220_v42 = vsel %vm1204_vm2, %v9435_v38, -inf  ;;  %v1217_v43 = vsel %vm1204_vm2, %v9437_v39, -inf  ;;  %v1321_v37 = vmul.f32 %v9437_v39, %v9499_v29 }
  0xfe   : > { %1221 = vmax.xlane.f32.xlu1 %v1220_v42  ;;  %1218 = vmax.xlane.f32.xlu0 %v1217_v43 }
 0x102   : > { %v1127_v44 = vpop.f32.mrb[6].mxu0  ;;  %v1200_v45 = vpop.f32.mrb[6].mxu1 }
 0x103   : > { %v9452_v47 = vadd.f32 %v9251_v19, %v1127_v44  ;;  %v9454_v48 = vadd.f32 %v9251_v19, %v1200_v45  ;;  %v8362_v49 = vpop.f32.mrb[7].mxu0  ;;  %v8373_v50 = vpop.f32.mrb[7].mxu1 }
 0x104   : > { %v1337_v49 = vsel %vm1204_vm2, %v1321_v37, 0.0  ;;  %v1322_v50 = vmul.f32 %v9435_v38, %v9514_v41 }
 0x105   : > { %12470 = vst [vmem:[#allocation9_spill] sm:$0xff] %v9452_v47  ;;  %12471 = vst [vmem:[#allocation10_spill] sm:$0xff] %v9454_v48  ;;  %v1226_v51 = vsel %vm1204_vm2, %v9454_v48, -inf  ;;  %v1223_v52 = vsel %vm1204_vm2, %v9452_v47, -inf }
 0x106   : > { %1227 = vmax.xlane.f32.xlu1 %v1226_v51  ;;  %1224 = vmax.xlane.f32.xlu0 %v1223_v52  ;;  %v9526_v51 = vld [vmem:[%s9447_s16 + $0x38] sm:$0xff]  ;;  %v9529_v52 = vld [vmem:[%s9447_s16 + $0x30] sm:$0xff]  ;;  %v1340_v59 = vsel %vm1204_vm2, %v1322_v50, 0.0 }
 0x107   : > { %v1324_v62 = vmul.f32 %v9454_v48, %v9526_v51 }
 0x10a   : > { %1326 = vadd.xlane.f32.xlu0 %v1325_v55 }
 0x10e   : > { %1329 = vadd.xlane.f32.xlu0 %v1328_v58 }
 0x112   : > { %1332 = vadd.xlane.f32.xlu0 %v1331_v61 }
 0x116   : > { %1335 = vadd.xlane.f32.xlu0 %v1334_v63 }
 0x139   : > { %387 = vxpose.xlu1.b32.start.end [1/1] (short) (narrow) %v9355_v9, 32 }
 0x17b   : > { %v9482_v4 = vpop.xlane.xlu0 %1206 }
 0x17c   : > { %12472 = vst [vmem:[#allocation11_spill] sm:$0xff] %v9482_v4  ;;  %v1229_v7 = vsub.f32 %v9419_v22, %v9482_v4 }
 0x17e   : > { %v1237_v17 = vmul.f32 1.442695, %v1229_v7  ;;  %v1323_v7 = vmul.f32 %v9452_v47, %v9529_v52 }
 0x17f   : > { %v9486_v19 = vpop.xlane.xlu0 %1209 }
 0x180   : > { %12473 = vst [vmem:[#allocation12_spill] sm:$0xff] %v9486_v19  ;;  %9033 = vpow2.f32 %v1237_v17  ;;  %v1230_v20 = vsub.f32 %v9421_v24, %v9486_v19 }
 0x182   : > { %v1239_v21 = vmul.f32 1.442695, %v1230_v20 }
 0x183   : > { %v9490_v23 = vpop.xlane.xlu1 %1212 }
 0x184   : > { %12474 = vst [vmem:[#allocation13_spill] sm:$0xff] %v9490_v23  ;;  %9035 = vpow2.f32 %v1239_v21  ;;  %v1231_v25 = vsub.f32 %v9427_v30, %v9490_v23  ;;  %v1346_v21 = vsel %vm1204_vm2, %v1324_v62, 0.0 }
 0x186   : > { %v1241_v26 = vmul.f32 1.442695, %v1231_v25 }
 0x187   : > { %v9494_v27 = vpop.xlane.xlu1 %1215 }
 0x188   : > { %12475 = vst [vmem:[#allocation14_spill] sm:$0xff] %v9494_v27  ;;  %9037 = vpow2.f32 %v1241_v26  ;;  %v1232_v28 = vsub.f32 %v9429_v31, %v9494_v27  ;;  %v1343_v26 = vsel %vm1204_vm2, %v1323_v7, 0.0 }
 0x18a   : > { %v9501_v32 = vpop.eup %9033  ;;  %v1243_v33 = vmul.f32 1.442695, %v1232_v28 }
 0x18b   : > { %v9503_v34 = vpop.xlane.xlu1 %1221  ;;  %v9505_v35 = vpop.xlane.xlu0 %1218  ;;  %v1253_v36 = vsel %vm1204_vm2, %v9501_v32, 0.0 }
 0x18c   : > { %12476 = vst [vmem:[#allocation15_spill] sm:$0xff] %v9503_v34  ;;  %12477 = vst [vmem:[#allocation16_spill] sm:$0xff] %v9505_v35  ;;  %v1233_v40 = vsub.f32 %v9437_v39, %v9505_v35  ;;  %1254 = vadd.xlane.f32.xlu0 %v1253_v36  ;;  %9039 = vpow2.f32 %v1243_v33  ;;  %v1234_v43 = vsub.f32 %v9435_v38, %v9503_v34 }
 0x18e   : > { %v9516_v42 = vpop.eup %9035  ;;  %v1245_v44 = vmul.f32 1.442695, %v1233_v40  ;;  %v1247_v55 = vmul.f32 1.442695, %v1234_v43 }
 0x18f   : > { %v1256_v45 = vsel %vm1204_vm2, %v9516_v42, 0.0 }
 0x190   : > { %1257 = vadd.xlane.f32.xlu1 %v1256_v45  ;;  %1338 = vadd.xlane.f32.xlu0 %v1337_v49  ;;  %9041 = vpow2.f32 %v1245_v44 }
 0x191   : > { %9043 = vpow2.f32 %v1247_v55 }
 0x192   : > { %v9531_v53 = vpop.eup %9037 }
 0x193   : > { %v9533_v56 = vpop.xlane.xlu1 %1227  ;;  %v9535_v58 = vpop.xlane.xlu0 %1224  ;;  %v1259_v61 = vsel %vm1204_vm2, %v9531_v53, 0.0 }
 0x194   : > { %12478 = vst [vmem:[#allocation17_spill] sm:$0xff] %v9533_v56  ;;  %12479 = vst [vmem:[#allocation18_spill] sm:$0xff] %v9535_v58  ;;  %v1235_v63 = vsub.f32 %v9452_v47, %v9535_v58  ;;  %1341 = vadd.xlane.f32.xlu1 %v1340_v59  ;;  %1260 = vadd.xlane.f32.xlu0 %v1259_v61  ;;  %v1236_v17 = vsub.f32 %v9454_v48, %v9533_v56 }
 0x196   : > { %v1249_v20 = vmul.f32 1.442695, %v1235_v63  ;;  %v9549_v25 = vpop.eup %9039  ;;  %v1251_v28 = vmul.f32 1.442695, %v1236_v17 }
 0x197   : > { %v1262_v33 = vsel %vm1204_vm2, %v9549_v25, 0.0  ;;  %v1327_v59 = vpop.xlane.xlu0 %1326 }
 0x198   : > { %1347 = vadd.xlane.f32.xlu1 %v1346_v21  ;;  %1344 = vadd.xlane.f32.xlu0 %v1343_v26  ;;  %9045 = vpow2.f32 %v1249_v20 }
 0x199   : > { %9047 = vpow2.f32 %v1251_v28 }
 0x19a   : > { %v9554_v36 = vpop.eup %9041 }
 0x19b   : > { %v1265_v37 = vsel %vm1204_vm2, %v9554_v36, 0.0  ;;  %v9558_v40 = vpop.eup %9043  ;;  %v1330_v61 = vpop.xlane.xlu0 %1329 }
 0x19c   : > { %1263 = vadd.xlane.f32.xlu1 %v1262_v33  ;;  %v1268_v43 = vsel %vm1204_vm2, %v9558_v40, 0.0 }
 0x19f   : > { %v1333_v63 = vpop.xlane.xlu0 %1332 }
 0x1a0   : > { %1266 = vadd.xlane.f32.xlu1 %v1265_v37 }
 0x1a2   : > { %v9562_v44 = vpop.eup %9045 }
 0x1a3   : > { %v1271_v45 = vsel %vm1204_vm2, %v9562_v44, 0.0  ;;  %v9566_v49 = vpop.eup %9047  ;;  %v1336_v17 = vpop.xlane.xlu0 %1335 }
 0x1a4   : > { %1269 = vadd.xlane.f32.xlu1 %v1268_v43  ;;  %v1274_v50 = vsel %vm1204_vm2, %v9566_v49, 0.0 }
 0x1a8   : > { %1272 = vadd.xlane.f32.xlu1 %v1271_v45 }
 0x1ac   : > { %1275 = vadd.xlane.f32.xlu1 %v1274_v50 }
 0x1b9   : > { %v9570_v55 = vpop.trf.xlu1 }
 0x1ba   : > { %12480 = vst [vmem:[#allocation19_spill] sm:$0xff] %v9570_v55  ;;  %8384 = vmatprep.mubr.msk.f32.mxu1 %vm1204_vm2, %v9570_v55 }
 0x1bd   : > { %v9581_v62 = vpop.trf.xlu1 }
 0x1c1   : > { %v9583_v7 = vpop.trf.xlu1 }
 0x1c5   : > { %355 = vxpose.xlu0.b32.start.end [1/1] (short) (narrow) %v9350_v8, 32  ;;  %v9585_v20 = vpop.trf.xlu1 }
 0x1d2   : > { %419 = vxpose.xlu0.b32.start.end [1/1] (short) (narrow) %v9368_v10, 32 }
 0x1df   : > { %451 = vxpose.xlu1.b32.start.end [1/1] (short) (narrow) %v9371_v11, 32  ;;  %483 = vxpose.xlu0.b32.start.end [1/1] (short) (narrow) %v9386_v12, 32 }
 0x1ec   : > { %515 = vxpose.xlu1.b32.start.end [1/1] (short) (narrow) %v9389_v13, 32  ;;  %547 = vxpose.xlu0.b32.start.end [1/1] (short) (narrow) %v9404_v14, 32 }
 0x1f9   : > { %579 = vxpose.xlu1.b32.start.end [1/1] (short) (narrow) %v9407_v15, 32 }
 0x219   : > { %v1255_v21 = vpop.xlane.xlu0 %1254 }
 0x21a   : > { %9049 = vlog2.f32 %v1255_v21 }
 0x21d   : > { %v1258_v11 = vpop.xlane.xlu1 %1257  ;;  %v9587_v12 = vpop.xlane.xlu0 %1338 }
 0x21e   : > { %9051 = vlog2.f32 %v1258_v11 }
 0x21f   : > { %9053 = vrcp.f32 %v1255_v21 }
 0x221   : > { %v9589_v13 = vpop.xlane.xlu1 %1341  ;;  %v1261_v14 = vpop.xlane.xlu0 %1260 }
 0x222   : > { %9055 = vlog2.f32 %v1261_v14 }
 0x223   : > { %9057 = vrcp.f32 %v1258_v11 }
 0x224   : > { %v9050_v15 = vpop.eup %9049 }
 0x225   : > { %v9591_v26 = vpop.xlane.xlu1 %1347  ;;  %v1294_v28 = vmul.f32 0.6931472, %v9050_v15 }
 0x227   : > { %v1309_v33 = vadd.f32 %v1294_v28, %v9482_v4  ;;  %v12516_v4 = vmov 0.0  }
 0x228   : > { %v9052_v37 = vpop.eup %9051 }
 0x229   : > { %v1264_v43 = vpop.xlane.xlu1 %1263  ;;  %v1349_v45 = vsub.f32 %v1309_v33, %v1327_v59  ;;  %v1296_v50 = vmul.f32 0.6931472, %v9052_v37  ;;  %v9054_v3 = vpop.eup %9053 }
 0x22a   : > { %9059 = vlog2.f32 %v1264_v43  ;;  %v1285_v59 = vmul.f32 %v9054_v3, %v9501_v32 }
 0x22b   : > { %v1357_v16 = vrot.slane %v1349_v45, 4  ;;  %v1310_v6 = vadd.f32 %v1296_v50, %v9486_v19  ;;  %9061 = vrcp.f32 %v1261_v14 }
 0x22c   : > { %v9056_v47 = vpop.eup %9055 }
 0x22d   : > { %v1267_v48 = vpop.xlane.xlu1 %1266  ;;  %v1350_v21 = vsub.f32 %v1310_v6, %v1330_v61  ;;  %v1358_v38 = vadd.f32 %v1357_v16, %v1349_v45  ;;  %v1298_v39 = vmul.f32 0.6931472, %v9056_v47  ;;  %v9058_v50 = vpop.eup %9057  ;;  %v1661_v16 = vsub.f32 %v1285_v59, %v9450_v46 }
 0x22e   : > { %9063 = vlog2.f32 %v1267_v48 }
 0x22f   : > { %v1363_v15 = vrot.slane %v1350_v21, 4  ;;  %v1359_v31 = vrot.slane %v1358_v38, 2  ;;  %v1311_v28 = vadd.f32 %v1298_v39, %v9490_v23  ;;  %v1286_v39 = vmul.f32 %v9058_v50, %v9516_v42 }
 0x231   : > { %v1270_v30 = vpop.xlane.xlu1 %1269  ;;  %v1360_v11 = vadd.f32 %v1359_v31, %v1358_v38  ;;  %v1364_v33 = vadd.f32 %v1363_v15, %v1350_v21  ;;  %v1351_v37 = vsub.f32 %v1311_v28, %v1333_v63  ;;  %v9602_v28 = vmul.f32 0.125, %v1661_v16 }
 0x232   : > { %9065 = vlog2.f32 %v1270_v30  ;;  %v1662_v42 = vsub.f32 %v1286_v39, %v9463_v54 }
 0x233   : > { %v1361_v24 = vrot.slane %v1360_v11, 1  ;;  %v1365_v19 = vrot.slane %v1364_v33, 2  ;;  %v1369_v6 = vrot.slane %v1351_v37, 4  ;;  %9067 = vrcp.f32 %v1264_v43 }
 0x234   : > { %v9060_v22 = vpop.eup %9059  ;;  %v9624_v16 = vmul.f32 0.125, %v1662_v42 }
 0x235   : > { %v1273_v61 = vpop.xlane.xlu1 %1272  ;;  %v1300_v47 = vmul.f32 0.6931472, %v9060_v22  ;;  %v1362_v14 = vadd.f32 %v1361_v24, %v1360_v11  ;;  %v1366_v45 = vadd.f32 %v1365_v19, %v1364_v33  ;;  %v1370_v3 = vadd.f32 %v1369_v6, %v1351_v37  ;;  %v9062_v31 = vpop.eup %9061 }
 0x236   : > { %9069 = vlog2.f32 %v1273_v61  ;;  %v1287_v37 = vmul.f32 %v9062_v31, %v9531_v53 }
 0x237   : > { %v1312_v38 = vadd.f32 %v1300_v47, %v9494_v27  ;;  %v9600_v32 = vmul.f32 0.125, %v1362_v14  ;;  %v1367_v63 = vrot.slane %v1366_v45, 1  ;;  %v1371_v23 = vrot.slane %v1370_v3, 2 }
 0x238   : > { %v9064_v21 = vpop.eup %9063  ;;  %9071 = vrcp.f32 %v1267_v48  ;;  %v1663_v31 = vsub.f32 %v1287_v37, %v9469_v57 }
 0x239   : > { %12481 = vst [vmem:[#allocation20_spill] sm:$0xff] %v9600_v32  ;;  %v1276_v15 = vpop.xlane.xlu1 %1275  ;;  %v1352_v46 = vsub.f32 %v1312_v38, %v1336_v17  ;;  %v1302_v22 = vmul.f32 0.6931472, %v9064_v21  ;;  %v1693_v24 = vand.u32 2147483647, %v9600_v32  ;;  %v1368_v19 = vadd.f32 %v1367_v63, %v1366_v45 }
 0x23a   : > { %9073 = vlog2.f32 %v1276_v15  ;;  %v1372_v43 = vadd.f32 %v1371_v23, %v1370_v3 }
 0x23b   : > { %v1375_v59 = vrot.slane %v1352_v46, 4  ;;  %v1313_v11 = vadd.f32 %v1302_v22, %v9505_v35  ;;  %vm9607_vm3 = vcmp.lt.f32.partialorder %v1693_v24, inf  ;;  %v9618_v54 = vmul.f32 0.125, %v1368_v19 }
 0x23c   : > { %v9066_v50 = vpop.eup %9065  ;;  %8374 = vmatprep.subr.msk.mxu0 %vm9607_vm3, %v9602_v28  ;;  %v1373_v23 = vrot.slane %v1372_v43, 1  ;;  %9075 = vrcp.f32 %v1270_v30  ;;  %v1345_v30 = vpop.xlane.xlu0 %1344 }
 0x23d   : > { %12484 = vst [vmem:[#allocation21_spill] sm:$0xff] %v9618_v54  ;;  %v1353_v17 = vsub.f32 %v1313_v11, %v9587_v12  ;;  %v1304_v6 = vmul.f32 0.6931472, %v9066_v50  ;;  %8375 = vmatpush3.msk.msra.mxu0 %vm9607_vm3, %v9602_v28  ;;  %v1376_v53 = vadd.f32 %v1375_v59, %v1352_v46  ;;  %v1694_v47 = vand.u32 2147483647, %v9618_v54  ;;  %v9068_v45 = vpop.eup %9067 }
 0x23e   : > { %v1374_v14 = vadd.f32 %v1373_v23, %v1372_v43  ;;  %9077 = vrcp.f32 %v1273_v61  ;;  %v1288_v19 = vmul.f32 %v9068_v45, %v9549_v25  ;;  %v9650_v11 = vmul.f32 0.125, %v1663_v31 }
 0x23f   : > { %v1381_v39 = vrot.slane %v1353_v17, 4  ;;  %v1314_v3 = vadd.f32 %v1304_v6, %v9503_v34  ;;  %v1377_v38 = vrot.slane %v1376_v53, 2  ;;  %vm9629_vm4 = vcmp.lt.f32.partialorder %v1694_v47, inf }
 0x240   : > { %v9070_v12 = vpop.eup %9069  ;;  %v9633_v21 = vmul.f32 0.125, %v1374_v14  ;;  %8382 = vmatprep.subr.msk.mxu1 %vm9629_vm4, %v9624_v16  ;;  %9079 = vrcp.f32 %v1276_v15  ;;  %v1664_v45 = vsub.f32 %v1288_v19, %v9475_v60 }
 0x241   : > { %v1354_v46 = vsub.f32 %v1314_v3, %v9589_v13  ;;  %v1306_v22 = vmul.f32 0.6931472, %v9070_v12  ;;  %v1378_v57 = vadd.f32 %v1377_v38, %v1376_v53  ;;  %8383 = vmatpush3.msk.msra.mxu1 %vm9629_vm4, %v9624_v16  ;;  %v1382_v42 = vadd.f32 %v1381_v39, %v1353_v17 }
 0x242   : > { %12487 = vst [vmem:[#allocation22_spill] sm:$0xff] %v9633_v21  ;;  %v1695_v61 = vand.u32 2147483647, %v9633_v21  ;;  %v9072_v13 = vpop.eup %9071  ;;  %8385 = vmatmul.mubr.msk.f32.vlgmr.msra.gmra.mrb[8].mxu1 %vm1204_vm2, %v9581_v62 }
 0x243   : > { %v1387_v43 = vrot.slane %v1354_v46, 4  ;;  %v1315_v59 = vadd.f32 %v1306_v22, %v9535_v58  ;;  %v1379_v37 = vrot.slane %v1378_v57, 1  ;;  %8387 = vmatprep.mubr.msk.f32.mxu1 %vm1204_vm2, %v9583_v7  ;;  %v1383_v25 = vrot.slane %v1382_v42, 2 }
 0x244   : > { %v9074_v50 = vpop.eup %9073  ;;  %vm9654_vm5 = vcmp.lt.f32.partialorder %v1695_v61, inf  ;;  %v1289_v38 = vmul.f32 %v9072_v13, %v9554_v36 }
 0x245   : > { %v1355_v17 = vsub.f32 %v1315_v59, %v1345_v30  ;;  %v1308_v6 = vmul.f32 0.6931472, %v9074_v50  ;;  %8390 = vmatprep.subr.msk.mxu0 %vm9654_vm5, %v9650_v11  ;;  %v9664_v47 = vpop.trf.xlu0  ;;  %v1380_v14 = vadd.f32 %v1379_v37, %v1378_v57  ;;  %v1384_v39 = vadd.f32 %v1383_v25, %v1382_v42 }
 0x246   : > { %12490 = vst [vmem:[#allocation23_spill] sm:$0xff] %v9664_v47  ;;  %8376 = vmatprep.mubr.msk.f32.mxu0 %vm1204_vm2, %v9664_v47  ;;  %v1388_v3 = vadd.f32 %v1387_v43, %v1354_v46  ;;  %8388 = vmatmul.mubr.msk.f32.gmra.mrb[10].mxu1 %vm1204_vm2, %v9585_v20  ;;  %v9076_v12 = vpop.eup %9075  ;;  %v9680_v46 = vmul.f32 0.125, %v1664_v45 }
 0x247   : > { %v1393_v15 = vrot.slane %v1355_v17, 4  ;;  %v1316_v31 = vadd.f32 %v1308_v6, %v9533_v56  ;;  %v9673_v30 = vmul.f32 0.125, %v1380_v14  ;;  %v1385_v22 = vrot.slane %v1384_v39, 1 }
 0x248   : > { %v1389_v61 = vrot.slane %v1388_v3, 2  ;;  %v9078_v19 = vpop.eup %9077  ;;  %v1290_v37 = vmul.f32 %v9076_v12, %v9558_v40 }
 0x249   : > { %12491 = vst [vmem:[#allocation24_spill] sm:$0xff] %v9673_v30  ;;  %v1356_v59 = vsub.f32 %v1316_v31, %v9591_v26  ;;  %v9676_v57 = vpop.trf.xlu0  ;;  %v1394_v60 = vadd.f32 %v1393_v15, %v1355_v17  ;;  %v1696_v42 = vand.u32 2147483647, %v9673_v30  ;;  %v1386_v43 = vadd.f32 %v1385_v22, %v1384_v39 }
 0x24a   : > { %8377 = vmatmul.mubr.msk.f32.vlgmr.msra.gmra.mrb[8].mxu0 %vm1204_vm2, %v9676_v57  ;;  %v1390_v36 = vadd.f32 %v1389_v61, %v1388_v3  ;;  %v1665_v26 = vsub.f32 %v1289_v38, %v9499_v29  ;;  %v1291_v15 = vmul.f32 %v9078_v19, %v9562_v44  ;;  %v9080_v31 = vpop.eup %9079  ;;  %v1666_v12 = vsub.f32 %v1290_v37, %v9514_v41 }
 0x24b   : > { %v1399_v13 = vrot.slane %v1356_v59, 4  ;;  %8391 = vmatpush3.msk.msra.mxu0 %vm9654_vm5, %v9650_v11  ;;  %v1395_v50 = vrot.slane %v1394_v60, 2  ;;  %vm9688_vm6 = vcmp.lt.f32.partialorder %v1696_v42, inf  ;;  %v9692_v17 = vmul.f32 0.125, %v1386_v43 }
 0x24c   : > { %v1391_v6 = vrot.slane %v1390_v36, 1  ;;  %8398 = vmatprep.subr.msk.mxu1 %vm9688_vm6, %v9680_v46  ;;  %v9709_v38 = vmul.f32 0.125, %v1665_v26  ;;  %v9731_v26 = vmul.f32 0.125, %v1666_v12 }
 0x24d   : > { %12494 = vst [vmem:[#allocation25_spill] sm:$0xff] %v9692_v17  ;;  %v9700_v45 = vpop.trf.xlu0  ;;  %v1396_v29 = vadd.f32 %v1395_v50, %v1394_v60  ;;  %v1400_v40 = vadd.f32 %v1399_v13, %v1356_v59  ;;  %8399 = vmatpush3.msk.msra.mxu1 %vm9688_vm6, %v9680_v46  ;;  %v1697_v39 = vand.u32 2147483647, %v9692_v17  ;;  %v1292_v13 = vmul.f32 %v9080_v31, %v9566_v49 }
 0x24e   : > { %8379 = vmatprep.mubr.msk.f32.mxu0 %vm1204_vm2, %v9700_v45  ;;  %v1392_v3 = vadd.f32 %v1391_v6, %v1390_v36  ;;  %v1667_v36 = vsub.f32 %v1291_v15, %v9529_v52 }
 0x24f   : > { %v1397_v22 = vrot.slane %v1396_v29, 1  ;;  %v1401_v61 = vrot.slane %v1400_v40, 2  ;;  %vm9712_vm7 = vcmp.lt.f32.partialorder %v1697_v39, inf }
 0x250   : > { %v9716_v60 = vmul.f32 0.125, %v1392_v3  ;;  %8406 = vmatprep.subr.msk.mxu0 %vm9712_vm7, %v9709_v38  ;;  %v9750_v39 = vmul.f32 0.125, %v1667_v36  ;;  %v1668_v3 = vsub.f32 %v1292_v13, %v9526_v51 }
 0x251   : > { %v9724_v44 = vpop.trf.xlu0  ;;  %v1398_v19 = vadd.f32 %v1397_v22, %v1396_v29  ;;  %v1402_v41 = vadd.f32 %v1401_v61, %v1400_v40 }
 0x252   : > { %12497 = vst [vmem:[#allocation26_spill] sm:$0xff] %v9716_v60  ;;  %8380 = vmatmul.mubr.msk.f32.gmra.mrb[10].mxu0 %vm1204_vm2, %v9724_v44  ;;  %v1698_v43 = vand.u32 2147483647, %v9716_v60 }
 0x253   : > { %v9733_v37 = vmul.f32 0.125, %v1398_v19  ;;  %v1403_v50 = vrot.slane %v1402_v41, 1  ;;  %v9767_v19 = vmul.f32 0.125, %v1668_v3 }
 0x254   : > { %vm9735_vm8 = vcmp.lt.f32.partialorder %v1698_v43, inf }
 0x255   : > { %12498 = vst [vmem:[#allocation27_spill] sm:$0xff] %v9733_v37  ;;  %8414 = vmatprep.subr.msk.mxu1 %vm9735_vm8, %v9731_v26  ;;  %v9745_v52 = vpop.trf.xlu0  ;;  %v1699_v49 = vand.u32 2147483647, %v9733_v37  ;;  %v1404_v40 = vadd.f32 %v1403_v50, %v1402_v41  ;;  %v12506_v41 = vmov 0.0|0.0  }
 0x256   : > { %8392 = vmatprep.mubr.msk.f32.mxu0 %vm1204_vm2, %v9745_v52 }
 0x257   : > { %vm9753_vm9 = vcmp.lt.f32.partialorder %v1699_v49, inf  ;;  %v9757_v31 = vmul.f32 0.125, %v1404_v40 }
 0x259   : > { %12503 = vst [vmem:[#allocation28_spill] sm:$0xff] %v9757_v31  ;;  %v9762_v22 = vpop.trf.xlu0  ;;  %v1700_v61 = vand.u32 2147483647, %v9757_v31 }
 0x25a   : > { %8393 = vmatmul.mubr.msk.f32.vlgmr.msra.gmra.mrb[12].mxu0 %vm1204_vm2, %v9762_v22 }
 0x25b   : > { %8407 = vmatpush3.msk.msra.mxu0 %vm9712_vm7, %v9709_v38  ;;  %vm9772_vm10 = vcmp.lt.f32.partialorder %v1700_v61, inf }
 0x25c   : > { %8422 = vmatprep.subr.msk.mxu0 %vm9753_vm9, %v9750_v39 }
 0x25d   : > { %v9782_v43 = vpop.trf.xlu0 }
 0x25e   : > { %8395 = vmatprep.mubr.msk.f32.mxu0 %vm1204_vm2, %v9782_v43 }
 0x25f   : > { %v9784_v36 = vpop.trf.xlu1 }
 0x260   : > { %8400 = vmatprep.mubr.msk.f32.mxu1 %vm1204_vm2, %v9784_v36 }
 0x261   : > { %v9790_v13 = vpop.trf.xlu0 }
 0x262   : > { %8396 = vmatmul.mubr.msk.f32.gmra.mrb[14].mxu0 %vm1204_vm2, %v9790_v13 }
 0x263   : > { %v9794_v50 = vpop.trf.xlu1 }
 0x264   : > { %8401 = vmatmul.mubr.msk.f32.vlgmr.msra.gmra.mrb[12].mxu1 %vm1204_vm2, %v9794_v50 }
 0x265   : > { %8415 = vmatpush3.msk.msra.mxu1 %vm9735_vm8, %v9731_v26  ;;  %v9804_v49 = vpop.trf.xlu0 }
 0x266   : > { %8430 = vmatprep.subr.msk.mxu1 %vm9772_vm10, %v9767_v19  ;;  %8408 = vmatprep.mubr.msk.f32.mxu0 %vm1204_vm2, %v9804_v49 }
 0x267   : > { %v9806_v40 = vpop.trf.xlu1 }
 0x268   : > { %8403 = vmatprep.mubr.msk.f32.mxu1 %vm1204_vm2, %v9806_v40 }
 0x269   : > { %v9812_v3 = vpop.trf.xlu0 }
 0x26a   : > { %8409 = vmatmul.mubr.msk.f32.vlgmr.msra.gmra.mrb[16].mxu0 %vm1204_vm2, %v9812_v3 }
 0x26b   : > { %v9816_v61 = vpop.trf.xlu1  ;;  %8423 = vmatpush3.msk.msra.mxu0 %vm9753_vm9, %v9750_v39 }
 0x26c   : > { %8404 = vmatmul.mubr.msk.f32.gmra.mrb[14].mxu1 %vm1204_vm2, %v9816_v61  ;;  %8878 = vmatprep.subr.bf16.mxu0 %v12506_v41 }
 0x26d   : > { %v9824_v12 = vpop.trf.xlu0 }
 0x26e   : > { %8411 = vmatprep.mubr.msk.f32.mxu0 %vm1204_vm2, %v9824_v12 }
 0x26f   : > { %v9826_v29 = vpop.trf.xlu1 }
 0x270   : > { %8416 = vmatprep.mubr.msk.f32.mxu1 %vm1204_vm2, %v9826_v29 }
 0x271   : > { %v9832_v42 = vpop.trf.xlu0 }
 0x272   : > { %8412 = vmatmul.mubr.msk.f32.gmra.mrb[18].mxu0 %vm1204_vm2, %v9832_v42 }
 0x273   : > { %v9836_v14 = vpop.trf.xlu1 }
 0x274   : > { %12507 = vst [vmem:[#allocation29_spill] sm:$0xff] %v9836_v14  ;;  %8417 = vmatmul.mubr.msk.f32.vlgmr.msra.gmra.mrb[16].mxu1 %vm1204_vm2, %v9836_v14 }
 0x275   : > { %8431 = vmatpush3.msk.msra.mxu1 %vm9772_vm10, %v9767_v19  ;;  %v9843_v53 = vpop.trf.xlu0 }
 0x276   : > { %12508 = vst [vmem:[#allocation30_spill] sm:$0xff] %v9843_v53  ;;  %8884 = vmatprep.subr.bf16.mxu1 %v12506_v41  ;;  %8424 = vmatprep.mubr.msk.f32.mxu0 %vm1204_vm2, %v9843_v53 }
 0x277   : > { %v9846_v48 = vpop.trf.xlu1 }
 0x278   : > { %12509 = vst [vmem:[#allocation31_spill] sm:$0xff] %v9846_v48  ;;  %8419 = vmatprep.mubr.msk.f32.mxu1 %vm1204_vm2, %v9846_v48 }
 0x279   : > { %v9852_v24 = vpop.trf.xlu0 }
 0x27a   : > { %12510 = vst [vmem:[#allocation32_spill] sm:$0xff] %v9852_v24  ;;  %8425 = vmatmul.mubr.msk.f32.vlgmr.msra.gmra.mrb[20].mxu0 %vm1204_vm2, %v9852_v24 }
 0x27b   : > { %v9854_v56 = vpop.trf.xlu1 }
 0x27c   : > { %12511 = vst [vmem:[#allocation33_spill] sm:$0xff] %v9854_v56  ;;  %8420 = vmatmul.mubr.msk.f32.gmra.mrb[18].mxu1 %vm1204_vm2, %v9854_v56 }
 0x27d   : > { %v9860_v58 = vpop.trf.xlu0 }
 0x27e   : > { %12512 = vst [vmem:[#allocation34_spill] sm:$0xff] %v9860_v58  ;;  %8427 = vmatprep.mubr.msk.f32.mxu0 %vm1204_vm2, %v9860_v58 }
 0x27f   : > { %v9862_v34 = vpop.trf.xlu1 }
 0x280   : > { %12513 = vst [vmem:[#allocation35_spill] sm:$0xff] %v9862_v34  ;;  %8432 = vmatprep.mubr.msk.f32.mxu1 %vm1204_vm2, %v9862_v34 }
 0x281   : > { %v9868_v35 = vpop.trf.xlu0 }
 0x282   : > { %12514 = vst [vmem:[#allocation36_spill] sm:$0xff] %v9868_v35  ;;  %8428 = vmatmul.mubr.msk.f32.gmra.mrb[22].mxu0 %vm1204_vm2, %v9868_v35 }
 0x283   : > { %v9872_v27 = vpop.trf.xlu1  ;;  %8446 = vmatprep.mubr.msk.f32.mxu0 %vm9261_vm0, %v12516_v4 }
 0x284   : > { %12515 = vst [vmem:[#allocation37_spill] sm:$0xff] %v9872_v27  ;;  %8433 = vmatmul.mubr.msk.f32.vlgmr.msra.gmra.mrb[20].mxu1 %vm1204_vm2, %v9872_v27 }
 0x287   : > { %v9878_v31 = vpop.trf.xlu1 }
 0x288   : > { %12517 = vst [vmem:[#allocation38_spill] sm:$0xff] %v9878_v31  ;;  %8435 = vmatprep.mubr.msk.f32.mxu1 %vm1204_vm2, %v9878_v31 }
 0x28b   : > { %v9882_v37 = vpop.trf.xlu1 }
 0x28c   : > { %12518 = vst [vmem:[#allocation39_spill] sm:$0xff] %v9882_v37  ;;  %8436 = vmatmul.mubr.msk.f32.gmra.mrb[22].mxu1 %vm1204_vm2, %v9882_v37 }
 0x28d   : > { %8457 = vmatprep.mubr.msk.f32.mxu1 %vm9261_vm0, %v12516_v4 }
 0x315   : > { %v8386_v60 = vpop.f32.mrb[8].mxu1 }
 0x316   : > { %v2570_v17 = vmul.f32 0.1, %v8386_v60  ;;  %v1908_v30 = vpop.f32.mrb[9].mxu1 }
 0x317   : > { %v2569_v21 = vmul.f32 0.1, %v1908_v30 }
 0x318   : > { %v9889_v54 = vsub.f32 %v9316_v1, %v2570_v17 }
 0x319   : > { %v9892_v32 = vsub.f32 %v9311_v0, %v2569_v21  ;;  %v8389_v27 = vpop.f32.mrb[10].mxu1 }
 0x31a   : > { %12519 = vst [vmem:[#allocation40_spill] sm:$0xff] %v9889_v54  ;;  %v2572_v31 = vmul.f32 0.1, %v8389_v27  ;;  %v1918_v35 = vpop.f32.mrb[11].mxu1 }
 0x31b   : > { %12520 = vst [vmem:[#allocation41_spill] sm:$0xff] %v9892_v32  ;;  %v8885_v34 = vpack.c.bf16 %v9889_v54, %v9892_v32  ;;  %v2571_v37 = vmul.f32 0.1, %v1918_v35 }
 0x31c   : > { %v9897_v56 = vsub.f32 %v9330_v5, %v2572_v31 }
 0x31d   : > { %v8378_v58 = vpop.f32.mrb[8].mxu0  ;;  %v9900_v60 = vsub.f32 %v9321_v2, %v2571_v37  ;;  %8886 = vmatpush3.bf16.msra.mxu1 %v8885_v34 }
 0x31e   : > { %12521 = vst [vmem:[#allocation42_spill] sm:$0xff] %v9897_v56  ;;  %v2566_v30 = vmul.f32 0.1, %v8378_v58  ;;  %v1811_v17 = vpop.f32.mrb[9].mxu0  ;;  %8887 = vmatprep.subr.bf16.mxu1 %v12506_v41 }
 0x31f   : > { %12522 = vst [vmem:[#allocation43_spill] sm:$0xff] %v9900_v60  ;;  %v2565_v21 = vmul.f32 0.1, %v1811_v17  ;;  %v8888_v27 = vpack.c.bf16 %v9897_v56, %v9900_v60 }
 0x320   : > { %v9906_v24 = vsub.f32 %v9316_v1, %v2566_v30 }
 0x321   : > { %v9909_v35 = vsub.f32 %v9311_v0, %v2565_v21  ;;  %8889 = vmatpush3.bf16.msra.mxu1 %v8888_v27 }
 0x322   : > { %12523 = vst [vmem:[#allocation44_spill] sm:$0xff] %v9906_v24  ;;  %8896 = vmatprep.subr.bf16.mxu1 %v12506_v41 }
 0x323   : > { %12524 = vst [vmem:[#allocation45_spill] sm:$0xff] %v9909_v35  ;;  %v8879_v37 = vpack.c.bf16 %v9906_v24, %v9909_v35 }
 0x324   : > { %8458 = vmatmul.mubr.msk.f32.vlgmr.msra.gmra.mrb[24].mxu1 %vm619_vm1, %v9355_v9 }
 0x325   : > { %v8381_v34 = vpop.f32.mrb[10].mxu0  ;;  %8880 = vmatpush3.bf16.msra.mxu0 %v8879_v37  ;;  %8479 = vmatprep.mubr.msk.f32.mxu1 %vm9261_vm0, %v12516_v4 }
 0x326   : > { %v2568_v58 = vmul.f32 0.1, %v8381_v34  ;;  %v1821_v31 = vpop.f32.mrb[11].mxu0  ;;  %8881 = vmatprep.subr.bf16.mxu0 %v12506_v41  ;;  %v9941_v34 = vld [vmem:[%s12255_s4] sm:$0xff] }
 0x327   : > { %v2567_v0 = vmul.f32 0.1, %v1821_v31 }
 0x328   : > { %v9920_v1 = vsub.f32 %v9330_v5, %v2568_v58  ;;  %v9933_v5 = vld [vmem:[%s12255_s4 + $0x8] sm:$0xff] }
 0x329   : > { %v9923_v30 = vsub.f32 %v9321_v2, %v2567_v0 }
 0x32a   : > { %12525 = vst [vmem:[#allocation46_spill] sm:$0xff] %v9920_v1 }
 0x32b   : > { %12526 = vst [vmem:[#allocation47_spill] sm:$0xff] %v9923_v30  ;;  %v8882_v17 = vpack.c.bf16 %v9920_v1, %v9923_v30 }
 0x32d   : > { %8883 = vmatpush3.bf16.msra.mxu0 %v8882_v17  ;;  %v8394_v9 = vpop.f32.mrb[12].mxu0 }
 0x32e   : > { %v2574_v21 = vmul.f32 0.1, %v8394_v9  ;;  %v2005_v27 = vpop.f32.mrb[13].mxu0  ;;  %8890 = vmatprep.subr.bf16.mxu0 %v12506_v41 }
 0x32f   : > { %v2573_v37 = vmul.f32 0.1, %v2005_v27 }
 0x330   : > { %8447 = vmatmul.mubr.msk.f32.vlgmr.msra.gmra.mrb[24].mxu0 %vm619_vm1, %v9350_v8  ;;  %v9936_v2 = vsub.f32 %v9933_v5, %v2574_v21 }
 0x331   : > { %v9944_v58 = vsub.f32 %v9941_v34, %v2573_v37  ;;  %8468 = vmatprep.mubr.msk.f32.mxu0 %vm9261_vm0, %v12516_v4  ;;  %v9954_v37 = vld [vmem:[%s12255_s4 + $0x18] sm:$0xff] }
 0x332   : > { %12527 = vst [vmem:[#allocation48_spill] sm:$0xff] %v9936_v2 }
 0x333   : > { %12528 = vst [vmem:[#allocation49_spill] sm:$0xff] %v9944_v58  ;;  %v8891_v8 = vpack.c.bf16 %v9936_v2, %v9944_v58 }
 0x335   : > { %v8397_v31 = vpop.f32.mrb[14].mxu0  ;;  %8892 = vmatpush3.bf16.msra.mxu0 %v8891_v8  ;;  %v9962_v8 = vld [vmem:[%s12255_s4 + $0x10] sm:$0xff] }
 0x336   : > { %v2576_v0 = vmul.f32 0.1, %v8397_v31  ;;  %v2015_v17 = vpop.f32.mrb[15].mxu0  ;;  %8893 = vmatprep.subr.bf16.mxu0 %v12506_v41 }
 0x337   : > { %v8402_v9 = vpop.f32.mrb[12].mxu1  ;;  %v2575_v21 = vmul.f32 0.1, %v2015_v17 }
 0x338   : > { %v2578_v27 = vmul.f32 0.1, %v8402_v9  ;;  %v2102_v60 = vpop.f32.mrb[13].mxu1  ;;  %v9957_v56 = vsub.f32 %v9954_v37, %v2576_v0 }
 0x339   : > { %v2577_v32 = vmul.f32 0.1, %v2102_v60  ;;  %v9965_v31 = vsub.f32 %v9962_v8, %v2575_v21 }
 0x33a   : > { %12529 = vst [vmem:[#allocation50_spill] sm:$0xff] %v9957_v56  ;;  %v9968_v17 = vsub.f32 %v9933_v5, %v2578_v27 }
 0x33b   : > { %12530 = vst [vmem:[#allocation51_spill] sm:$0xff] %v9965_v31  ;;  %v9971_v9 = vsub.f32 %v9941_v34, %v2577_v32  ;;  %v8894_v58 = vpack.c.bf16 %v9957_v56, %v9965_v31  ;;  %v9214_v56 = vld [vmem:[%s9347_s11 + $0x20] sm:$0xff] }
 0x33c   : > { %12531 = vst [vmem:[#allocation52_spill] sm:$0xff] %v9968_v17 }
 0x33d   : > { %12532 = vst [vmem:[#allocation53_spill] sm:$0xff] %v9971_v9  ;;  %v8897_v60 = vpack.c.bf16 %v9968_v17, %v9971_v9  ;;  %8895 = vmatpush3.bf16.msra.mxu0 %v8894_v58  ;;  %v8410_v0 = vpop.f32.mrb[16].mxu0 }
 0x33e   : > { %v2582_v30 = vmul.f32 0.1, %v8410_v0  ;;  %v2199_v54 = vpop.f32.mrb[17].mxu0  ;;  %8902 = vmatprep.subr.bf16.mxu0 %v12506_v41 }
 0x33f   : > { %v8405_v2 = vpop.f32.mrb[14].mxu1  ;;  %8898 = vmatpush3.bf16.msra.mxu1 %v8897_v60  ;;  %v2581_v1 = vmul.f32 0.1, %v2199_v54 }
 0x340   : > { %v2580_v21 = vmul.f32 0.1, %v8405_v2  ;;  %v2112_v27 = vpop.f32.mrb[15].mxu1  ;;  %8899 = vmatprep.subr.bf16.mxu1 %v12506_v41  ;;  %8469 = vmatmul.mubr.msk.f32.vlgmr.msra.gmra.mrb[26].mxu0 %vm619_vm1, %v9368_v10  ;;  %v9982_v31 = vsub.f32 %v9933_v5, %v2582_v30 }
 0x341   : > { %v2579_v32 = vmul.f32 0.1, %v2112_v27  ;;  %v9988_v60 = vsub.f32 %v9941_v34, %v2581_v1  ;;  %8490 = vmatprep.mubr.msk.f32.mxu0 %vm9261_vm0, %v12516_v4 }
 0x342   : > { %12533 = vst [vmem:[#allocation54_spill] sm:$0xff] %v9982_v31  ;;  %v9985_v58 = vsub.f32 %v9954_v37, %v2580_v21 }
 0x343   : > { %12535 = vst [vmem:[#allocation56_spill] sm:$0xff] %v9988_v60  ;;  %v9993_v54 = vsub.f32 %v9962_v8, %v2579_v32  ;;  %v8903_v2 = vpack.c.bf16 %v9982_v31, %v9988_v60 }
 0x344   : > { %12534 = vst [vmem:[#allocation55_spill] sm:$0xff] %v9985_v58 }
 0x345   : > { %12536 = vst [vmem:[#allocation57_spill] sm:$0xff] %v9993_v54  ;;  %v8900_v10 = vpack.c.bf16 %v9985_v58, %v9993_v54  ;;  %v8413_v30 = vpop.f32.mrb[18].mxu0  ;;  %8904 = vmatpush3.bf16.msra.mxu0 %v8903_v2 }
 0x346   : > { %v2584_v0 = vmul.f32 0.1, %v8413_v30  ;;  %v2209_v21 = vpop.f32.mrb[19].mxu0  ;;  %8905 = vmatprep.subr.bf16.mxu0 %v12506_v41  ;;  %v9213_v30 = vld [vmem:[%s9347_s11 + $0x18] sm:$0xff] }
 0x347   : > { %v8418_v27 = vpop.f32.mrb[16].mxu1  ;;  %8901 = vmatpush3.bf16.msra.mxu1 %v8900_v10  ;;  %v2583_v1 = vmul.f32 0.1, %v2209_v21 }
 0x348   : > { %v2586_v9 = vmul.f32 0.1, %v8418_v27  ;;  %v2296_v17 = vpop.f32.mrb[17].mxu1  ;;  %8908 = vmatprep.subr.bf16.mxu1 %v12506_v41  ;;  %v10002_v32 = vsub.f32 %v9954_v37, %v2584_v0 }
 0x349   : > { %v2585_v60 = vmul.f32 0.1, %v2296_v17  ;;  %v10005_v31 = vsub.f32 %v9962_v8, %v2583_v1 }
 0x34a   : > { %12537 = vst [vmem:[#allocation58_spill] sm:$0xff] %v10002_v32  ;;  %v10008_v2 = vsub.f32 %v9933_v5, %v2586_v9  ;;  %8480 = vmatmul.mubr.msk.f32.vlgmr.msra.gmra.mrb[26].mxu1 %vm619_vm1, %v9213_v30 }
 0x34b   : > { %12538 = vst [vmem:[#allocation59_spill] sm:$0xff] %v10005_v31  ;;  %v10013_v10 = vsub.f32 %v9941_v34, %v2585_v60  ;;  %8501 = vmatprep.mubr.msk.f32.mxu1 %vm9261_vm0, %v12516_v4  ;;  %v8906_v0 = vpack.c.bf16 %v10002_v32, %v10005_v31 }
 0x34c   : > { %12539 = vst [vmem:[#allocation60_spill] sm:$0xff] %v10008_v2 }
 0x34d   : > { %12540 = vst [vmem:[#allocation61_spill] sm:$0xff] %v10013_v10  ;;  %v8909_v17 = vpack.c.bf16 %v10008_v2, %v10013_v10  ;;  %8907 = vmatpush3.bf16.msra.mxu0 %v8906_v0  ;;  %v8426_v21 = vpop.f32.mrb[20].mxu0 }
 0x34e   : > { %v2590_v27 = vmul.f32 0.1, %v8426_v21  ;;  %v2393_v1 = vpop.f32.mrb[21].mxu0  ;;  %8914 = vmatprep.subr.bf16.mxu0 %v12506_v41 }
 0x34f   : > { %v8421_v9 = vpop.f32.mrb[18].mxu1  ;;  %8910 = vmatpush3.bf16.msra.mxu1 %v8909_v17  ;;  %v2589_v54 = vmul.f32 0.1, %v2393_v1 }
 0x350   : > { %v2588_v60 = vmul.f32 0.1, %v8421_v9  ;;  %v2306_v30 = vpop.f32.mrb[19].mxu1  ;;  %8911 = vmatprep.subr.bf16.mxu1 %v12506_v41  ;;  %8491 = vmatmul.mubr.msk.f32.vlgmr.msra.gmra.mrb[28].mxu0 %vm619_vm1, %v9214_v56  ;;  %v10026_v31 = vsub.f32 %v9933_v5, %v2590_v27 }
 0x351   : > { %v2587_v58 = vmul.f32 0.1, %v2306_v30  ;;  %v10032_v17 = vsub.f32 %v9941_v34, %v2589_v54  ;;  %8512 = vmatprep.mubr.msk.f32.mxu0 %vm9261_vm0, %v12516_v4 }
 0x352   : > { %12541 = vst [vmem:[#allocation62_spill] sm:$0xff] %v10026_v31  ;;  %v10029_v0 = vsub.f32 %v9954_v37, %v2588_v60 }
 0x353   : > { %12543 = vst [vmem:[#allocation64_spill] sm:$0xff] %v10032_v17  ;;  %v10037_v21 = vsub.f32 %v9962_v8, %v2587_v58  ;;  %v8915_v9 = vpack.c.bf16 %v10026_v31, %v10032_v17 }
 0x354   : > { %12542 = vst [vmem:[#allocation63_spill] sm:$0xff] %v10029_v0 }
 0x355   : > { %12544 = vst [vmem:[#allocation65_spill] sm:$0xff] %v10037_v21  ;;  %v8912_v56 = vpack.c.bf16 %v10029_v0, %v10037_v21  ;;  %v8429_v27 = vpop.f32.mrb[22].mxu0  ;;  %8916 = vmatpush3.bf16.msra.mxu0 %v8915_v9 }
 0x356   : > { %v2592_v1 = vmul.f32 0.1, %v8429_v27  ;;  %v2403_v60 = vpop.f32.mrb[23].mxu0  ;;  %8917 = vmatprep.subr.bf16.mxu0 %v12506_v41  ;;  %v9215_v27 = vld [vmem:[%s9347_s11 + $0x28] sm:$0xff] }
 0x357   : > { %v8434_v30 = vpop.f32.mrb[20].mxu1  ;;  %8913 = vmatpush3.bf16.msra.mxu1 %v8912_v56  ;;  %v2591_v54 = vmul.f32 0.1, %v2403_v60 }
 0x358   : > { %v2594_v10 = vmul.f32 0.1, %v8434_v30  ;;  %v2490_v2 = vpop.f32.mrb[21].mxu1  ;;  %8920 = vmatprep.subr.bf16.mxu1 %v12506_v41  ;;  %v10046_v58 = vsub.f32 %v9954_v37, %v2592_v1 }
 0x359   : > { %v2593_v17 = vmul.f32 0.1, %v2490_v2  ;;  %v10049_v21 = vsub.f32 %v9962_v8, %v2591_v54 }
 0x35a   : > { %12545 = vst [vmem:[#allocation66_spill] sm:$0xff] %v10046_v58  ;;  %v10052_v9 = vsub.f32 %v9933_v5, %v2594_v10  ;;  %8502 = vmatmul.mubr.msk.f32.vlgmr.msra.gmra.mrb[28].mxu1 %vm619_vm1, %v9215_v27 }
 0x35b   : > { %12546 = vst [vmem:[#allocation67_spill] sm:$0xff] %v10049_v21  ;;  %v10057_v56 = vsub.f32 %v9941_v34, %v2593_v17  ;;  %8523 = vmatprep.mubr.msk.f32.mxu1 %vm9261_vm0, %v12516_v4  ;;  %v8918_v1 = vpack.c.bf16 %v10046_v58, %v10049_v21  ;;  %v9216_v34 = vld [vmem:[%s9347_s11 + $0x30] sm:$0xff] }
 0x35c   : > { %12547 = vst [vmem:[#allocation68_spill] sm:$0xff] %v10052_v9 }
 0x35d   : > { %12548 = vst [vmem:[#allocation69_spill] sm:$0xff] %v10057_v56  ;;  %v8921_v2 = vpack.c.bf16 %v10052_v9, %v10057_v56  ;;  %8919 = vmatpush3.bf16.msra.mxu0 %v8918_v1  ;;  %v9217_v1 = vld [vmem:[%s9347_s11 + $0x38] sm:$0xff] }
 0x35f   : > { %v8437_v60 = vpop.f32.mrb[22].mxu1  ;;  %8922 = vmatpush3.bf16.msra.mxu1 %v8921_v2 }
 0x360   : > { %v2596_v5 = vmul.f32 0.1, %v8437_v60  ;;  %v2500_v10 = vpop.f32.mrb[23].mxu1  ;;  %8923 = vmatprep.subr.bf16.mxu1 %v12506_v41  ;;  %8513 = vmatmul.mubr.msk.f32.vlgmr.msra.gmra.mrb[30].mxu0 %vm619_vm1, %v9216_v34 }
 0x361   : > { %v2595_v30 = vmul.f32 0.1, %v2500_v10  ;;  %8528 = vmatprep.mubr.msk.f32.mxu0 %vm1204_vm2, %v9664_v47 }
 0x362   : > { %v10069_v17 = vsub.f32 %v9954_v37, %v2596_v5  ;;  %v12551_v37 = vsel %vm9629_vm4, %v9624_v16, 0.0  ;;  %v12553_v16 = vsel %vm9654_vm5, %v9650_v11, 0.0  ;;  %v12555_v11 = vsel %vm9688_vm6, %v9680_v46, 0.0 }
 0x363   : > { %v10074_v54 = vsub.f32 %v9962_v8, %v2595_v30  ;;  %v2516_v2 = vsel %vm1204_vm2, %v12551_v37, 0.0  ;;  %v12552_v8 = vsel %vm9607_vm3, %v9602_v28, 0.0  ;;  %v2523_v37 = vsel %vm1204_vm2, %v12553_v16, 0.0  ;;  %v10100_v28 = vld [vmem:[%s12256_s5] sm:$0x1] }
 0x364   : > { %12549 = vst [vmem:[#allocation70_spill] sm:$0xff] %v10069_v17  ;;  %v2517_v60 = vrot.slane %v2516_v2, 4  ;;  %v2509_v10 = vsel %vm1204_vm2, %v12552_v8, 0.0  ;;  %v2524_v33 = vrot.slane %v2523_v37, 4  ;;  %v2530_v23 = vsel %vm1204_vm2, %v12555_v11, 0.0 }
 0x365   : > { %12550 = vst [vmem:[#allocation71_spill] sm:$0xff] %v10074_v54  ;;  %v8924_v27 = vpack.c.bf16 %v10069_v17, %v10074_v54  ;;  %v2510_v34 = vrot.slane %v2509_v10, 4  ;;  %v12558_v46 = vsel %vm9712_vm7, %v9709_v38, 0.0  ;;  %v12560_v38 = vsel %vm9735_vm8, %v9731_v26, 0.0 }
 0x366   : > { %v2518_v5 = vadd.f32 %v2517_v60, %v2516_v2  ;;  %v2525_v8 = vadd.f32 %v2524_v33, %v2523_v37  ;;  %vm7646_vm7 = vcmask 1041409  }
 0x367   : > { %8925 = vmatpush3.bf16.msra.mxu1 %v8924_v27 }
 0x368   : > { %v2519_v30 = vrot.slane %v2518_v5, 2 }
 0x36a   : > { %8524 = vmatmul.mubr.msk.f32.vlgmr.msra.gmra.mrb[30].mxu1 %vm619_vm1, %v9217_v1  ;;  %v2520_v27 = vadd.f32 %v2519_v30, %v2518_v5  ;;  %v2511_v1 = vadd.f32 %v2510_v34, %v2509_v10  ;;  %v2526_v34 = vrot.slane %v2525_v8, 2 }
 0x36b   : > { %8536 = vmatprep.mubr.msk.f32.mxu1 %vm1204_vm2, %v9570_v55 }
 0x36c   : > { %v2521_v54 = vrot.slane %v2520_v27, 1  ;;  %v2512_v55 = vrot.slane %v2511_v1, 2  ;;  %v2527_v37 = vadd.f32 %v2526_v34, %v2525_v8  ;;  %v2544_v34 = vsel %vm1204_vm2, %v12560_v38, 0.0 }
 0x36e   : > { %v2522_v47 = vadd.f32 %v2521_v54, %v2520_v27  ;;  %v2513_v63 = vadd.f32 %v2512_v55, %v2511_v1  ;;  %v2531_v1 = vrot.slane %v2530_v23, 4 }
 0x370   : > { %v2630_v2 = vmul.f32 0.1, %v2522_v47  ;;  %v2514_v60 = vrot.slane %v2513_v63, 1  ;;  %v2532_v25 = vadd.f32 %v2531_v1, %v2530_v23 }
 0x372   : > { %v10103_v5 = vsub.f32 %v10100_v28, %v2630_v2  ;;  %v2515_v54 = vadd.f32 %v2514_v60, %v2513_v63  ;;  %v2537_v2 = vsel %vm1204_vm2, %v12558_v46, 0.0  ;;  %v2545_v46 = vrot.slane %v2544_v34, 4 }
 0x373   : > { %v2538_v33 = vrot.slane %v2537_v2, 4 }
 0x374   : > { %12554 = vst [vmem:[#allocation72_spill] sm:$0xff] %v10103_v5  ;;  %v2660_v55 = vrot.slane %v10103_v5, %v9414_v18  ;;  %v2629_v27 = vmul.f32 0.1, %v2515_v54  ;;  %v2528_v54 = vrot.slane %v2527_v37, 1 }
 0x376   : > { %v10117_v63 = vsub.f32 %v10100_v28, %v2629_v27  ;;  %v2539_v27 = vadd.f32 %v2538_v33, %v2537_v2  ;;  %v2529_v23 = vadd.f32 %v2528_v54, %v2527_v37  ;;  %v2546_v33 = vadd.f32 %v2545_v46, %v2544_v34 }
 0x377   : > { %v12562_v37 = vsel %vm9753_vm9, %v9750_v39, 0.0  ;;  %vm7648_vm9 = vcmask 1042434  }
 0x378   : > { %12557 = vst [vmem:[#allocation74_spill] sm:$0xff] %v10117_v63  ;;  %v2656_v60 = vrot.slane %v10117_v63, %v9414_v18  ;;  %v2540_v1 = vrot.slane %v2539_v27, 2 }
 0x37a   : > { %v2541_v2 = vadd.f32 %v2540_v1, %v2539_v27 }
 0x3f7   : > { %v2829_v47 = vpop.f32.mrb[24].mxu1 }
 0x3f8   : > { %v10112_v10 = vadd.f32 %v2829_v47, %v2660_v55  ;;  %v8459_v30 = vpop.f32.mrb[25].mxu1  ;;  %v2533_v55 = vrot.slane %v2532_v25, 2 }
 0x3fa   : > { %12556 = vst [vmem:[#allocation73_spill] sm:$0xff] %v10112_v10  ;;  %v3256_v16 = vsel %vm1204_vm2, %v10112_v10, -inf  ;;  %v2534_v59 = vadd.f32 %v2533_v55, %v2532_v25  ;;  %v2551_v25 = vsel %vm1204_vm2, %v12562_v37, 0.0  ;;  %v2542_v55 = vrot.slane %v2541_v2, 1 }
 0x3fb   : > { %3257 = vmax.xlane.f32.xlu1 %v3256_v16  ;;  %v2631_v16 = vmul.f32 0.1, %v2529_v23  ;;  %v2552_v54 = vrot.slane %v2551_v25, 4 }
 0x3fc   : > { %v2535_v5 = vrot.slane %v2534_v59, 1  ;;  %v2543_v34 = vadd.f32 %v2542_v55, %v2541_v2 }
 0x3fd   : > { %v2553_v27 = vadd.f32 %v2552_v54, %v2551_v25 }
 0x3fe   : > { %v2536_v6 = vadd.f32 %v2535_v5, %v2534_v59  ;;  %v12565_v59 = vsel %vm9772_vm10, %v9767_v19, 0.0  ;;  %v2633_v46 = vmul.f32 0.1, %v2543_v34 }
 0x3ff   : > { %v2558_v1 = vsel %vm1204_vm2, %v12565_v59, 0.0 }
 0x400   : > { %v2559_v37 = vrot.slane %v2558_v1, 4  ;;  %v10162_v55 = vsub.f32 %v10100_v28, %v2633_v46 }
 0x402   : > { %12567 = vst [vmem:[#allocation80_spill] sm:$0xff] %v10162_v55  ;;  %v2560_v51 = vadd.f32 %v2559_v37, %v2558_v1 }
 0x403   : > { %v2759_v11 = vpop.f32.mrb[24].mxu0 }
 0x404   : > { %v10126_v47 = vadd.f32 %v2759_v11, %v2656_v60  ;;  %v8448_v30 = vpop.f32.mrb[25].mxu0  ;;  %v10136_v60 = vsub.f32 %v10100_v28, %v2631_v16  ;;  %v2547_v11 = vrot.slane %v2546_v33, 2  ;;  %v2554_v16 = vrot.slane %v2553_v27, 2 }
 0x406   : > { %12559 = vst [vmem:[#allocation75_spill] sm:$0xff] %v10126_v47  ;;  %v3253_v8 = vsel %vm1204_vm2, %v10126_v47, -inf  ;;  %12561 = vst [vmem:[#allocation76_spill] sm:$0xff] %v10136_v60  ;;  %v2664_v26 = vrot.slane %v10136_v60, %v9414_v18  ;;  %v2548_v5 = vadd.f32 %v2547_v11, %v2546_v33  ;;  %v2555_v33 = vadd.f32 %v2554_v16, %v2553_v27 }
 0x407   : > { %3254 = vmax.xlane.f32.xlu0 %v3253_v8  ;;  %v2632_v8 = vmul.f32 0.1, %v2536_v6 }
 0x408   : > { %v2549_v6 = vrot.slane %v2548_v5, 1 }
 0x409   : > { %v10150_v39 = vsub.f32 %v10100_v28, %v2632_v8  ;;  %v2556_v8 = vrot.slane %v2555_v33, 1 }
 0x40a   : > { %v2550_v11 = vadd.f32 %v2549_v6, %v2548_v5 }
 0x40b   : > { %12564 = vst [vmem:[#allocation78_spill] sm:$0xff] %v10150_v39  ;;  %v2668_v25 = vrot.slane %v10150_v39, %v9414_v18  ;;  %v2557_v27 = vadd.f32 %v2556_v8, %v2555_v33 }
 0x40c   : > { %v2634_v34 = vmul.f32 0.1, %v2550_v11 }
 0x40d   : > { %v2635_v16 = vmul.f32 0.1, %v2557_v27 }
 0x40e   : > { %v10173_v1 = vsub.f32 %v10100_v28, %v2634_v34 }
 0x40f   : > { %v10180_v11 = vsub.f32 %v10100_v28, %v2635_v16 }
 0x410   : > { %12569 = vst [vmem:[#allocation82_spill] sm:$0xff] %v10173_v1  ;;  %v2676_v37 = vrot.slane %v10173_v1, %v9414_v18 }
 0x411   : > { %12571 = vst [vmem:[#allocation84_spill] sm:$0xff] %v10180_v11 }
 0x413   : > { %v2899_v30 = vpop.f32.mrb[26].mxu0 }
 0x414   : > { %v10145_v23 = vadd.f32 %v2899_v30, %v2664_v26  ;;  %v8470_v38 = vpop.f32.mrb[27].mxu0  ;;  %v2672_v30 = vrot.slane %v10162_v55, %v9414_v18 }
 0x415   : > { %v2561_v38 = vrot.slane %v2560_v51, 2 }
 0x416   : > { %12563 = vst [vmem:[#allocation77_spill] sm:$0xff] %v10145_v23  ;;  %v3259_v15 = vsel %vm1204_vm2, %v10145_v23, -inf }
 0x417   : > { %3260 = vmax.xlane.f32.xlu0 %v3259_v15  ;;  %v2562_v5 = vadd.f32 %v2561_v38, %v2560_v51  ;;  %v2680_v51 = vrot.slane %v10180_v11, %v9414_v18 }
 0x419   : > { %v2563_v6 = vrot.slane %v2562_v5, 1 }
 0x41d   : > { %v2969_v54 = vpop.f32.mrb[26].mxu1 }
 0x41e   : > { %v10159_v2 = vadd.f32 %v2969_v54, %v2668_v25  ;;  %v8481_v26 = vpop.f32.mrb[27].mxu1 }
 0x420   : > { %12566 = vst [vmem:[#allocation79_spill] sm:$0xff] %v10159_v2  ;;  %v3262_v19 = vsel %vm1204_vm2, %v10159_v2, -inf }
 0x421   : > { %3263 = vmax.xlane.f32.xlu1 %v3262_v19 }
 0x423   : > { %v3039_v15 = vpop.f32.mrb[28].mxu0 }
 0x424   : > { %v10168_v59 = vadd.f32 %v3039_v15, %v2672_v30  ;;  %v8492_v25 = vpop.f32.mrb[29].mxu0  ;;  %v2564_v30 = vadd.f32 %v2563_v6, %v2562_v5 }
 0x426   : > { %12568 = vst [vmem:[#allocation81_spill] sm:$0xff] %v10168_v59  ;;  %v3265_v46 = vsel %vm1204_vm2, %v10168_v59, -inf  ;;  %v2636_v38 = vmul.f32 0.1, %v2564_v30 }
 0x427   : > { %3266 = vmax.xlane.f32.xlu0 %v3265_v46 }
 0x428   : > { %v10191_v46 = vsub.f32 %v10100_v28, %v2636_v38 }
 0x42a   : > { %12573 = vst [vmem:[#allocation86_spill] sm:$0xff] %v10191_v46  ;;  %v2684_v27 = vrot.slane %v10191_v46, %v9414_v18  ;;  %v10230_v46 = vld [vmem:[%s9447_s16] sm:$0xff] }
 0x42d   : > { %v3109_v54 = vpop.f32.mrb[28].mxu1 }
 0x42e   : > { %v10177_v26 = vadd.f32 %v3109_v54, %v2676_v37  ;;  %v8503_v19 = vpop.f32.mrb[29].mxu1 }
 0x430   : > { %12570 = vst [vmem:[#allocation83_spill] sm:$0xff] %v10177_v26  ;;  %v3268_v33 = vsel %vm1204_vm2, %v10177_v26, -inf }
 0x431   : > { %3269 = vmax.xlane.f32.xlu1 %v3268_v33 }
 0x433   : > { %v3179_v8 = vpop.f32.mrb[30].mxu0 }
 0x434   : > { %v10186_v15 = vadd.f32 %v3179_v8, %v2680_v51  ;;  %v8514_v34 = vpop.f32.mrb[31].mxu0 }
 0x436   : > { %12572 = vst [vmem:[#allocation85_spill] sm:$0xff] %v10186_v15  ;;  %v3271_v25 = vsel %vm1204_vm2, %v10186_v15, -inf }
 0x437   : > { %3272 = vmax.xlane.f32.xlu0 %v3271_v25 }
 0x43d   : > { %v3249_v5 = vpop.f32.mrb[30].mxu1 }
 0x43e   : > { %v10195_v16 = vadd.f32 %v3249_v5, %v2684_v27  ;;  %v8525_v37 = vpop.f32.mrb[31].mxu1 }
 0x440   : > { %12574 = vst [vmem:[#allocation87_spill] sm:$0xff] %v10195_v16  ;;  %v3274_v6 = vsel %vm1204_vm2, %v10195_v16, -inf }
 0x441   : > { %3275 = vmax.xlane.f32.xlu1 %v3274_v6 }
 0x488   : > { %v10199_v54 = vpop.xlane.xlu1 %3257 }
 0x489   : > { %12575 = vst [vmem:[#allocation88_spill] sm:$0xff] %v10199_v54  ;;  %v3278_v19 = vsub.f32 %v10112_v10, %v10199_v54 }
 0x48b   : > { %v3287_v33 = vmul.f32 1.442695, %v3278_v19 }
 0x48d   : > { %9081 = vpow2.f32 %v3287_v33 }
 0x494   : > { %v10203_v28 = vpop.xlane.xlu0 %3254 }
 0x495   : > { %12576 = vst [vmem:[#allocation89_spill] sm:$0xff] %v10203_v28  ;;  %v3277_v30 = vsub.f32 %v10126_v47, %v10203_v28 }
 0x497   : > { %v3285_v51 = vmul.f32 1.442695, %v3277_v30  ;;  %v10207_v8 = vpop.eup %9081 }
 0x498   : > { %v3304_v38 = vsel %vm1204_vm2, %v10207_v8, 0.0 }
 0x499   : > { %9083 = vpow2.f32 %v3285_v51  ;;  %3305 = vadd.xlane.f32.xlu1 %v3304_v38 }
 0x4a3   : > { %v10211_v34 = vpop.eup %9083 }
 0x4a4   : > { %v10213_v25 = vpop.xlane.xlu0 %3260  ;;  %v3301_v27 = vsel %vm1204_vm2, %v10211_v34, 0.0 }
 0x4a5   : > { %12577 = vst [vmem:[#allocation90_spill] sm:$0xff] %v10213_v25  ;;  %v3279_v5 = vsub.f32 %v10145_v23, %v10213_v25  ;;  %3302 = vadd.xlane.f32.xlu0 %v3301_v27  ;;  %v3365_v27 = vmul.f32 %v10230_v46, %v10126_v47  ;;  %v10246_v47 = vld [vmem:[%s9447_s16 + $0x10] sm:$0xff] }
 0x4a7   : > { %v3289_v37 = vmul.f32 1.442695, %v3279_v5 }
 0x4a9   : > { %9085 = vpow2.f32 %v3289_v37 }
 0x4ae   : > { %v10219_v6 = vpop.xlane.xlu1 %3263 }
 0x4af   : > { %12578 = vst [vmem:[#allocation91_spill] sm:$0xff] %v10219_v6  ;;  %v3280_v19 = vsub.f32 %v10159_v2, %v10219_v6 }
 0x4b1   : > { %v3291_v33 = vmul.f32 1.442695, %v3280_v19  ;;  %v3373_v19 = vsel %vm1204_vm2, %v3365_v27, 0.0 }
 0x4b3   : > { %9087 = vpow2.f32 %v3291_v33  ;;  %v10223_v30 = vpop.eup %9085  ;;  %v10238_v33 = vld [vmem:[%s9447_s16 + $0x8] sm:$0xff] }
 0x4b4   : > { %v10225_v51 = vpop.xlane.xlu0 %3266  ;;  %v3307_v38 = vsel %vm1204_vm2, %v10223_v30, 0.0  ;;  %v3366_v11 = vmul.f32 %v10238_v33, %v10112_v10 }
 0x4b5   : > { %12579 = vst [vmem:[#allocation92_spill] sm:$0xff] %v10225_v51  ;;  %v3281_v5 = vsub.f32 %v10168_v59, %v10225_v51  ;;  %3308 = vadd.xlane.f32.xlu0 %v3307_v38  ;;  %v3367_v38 = vmul.f32 %v10246_v47, %v10145_v23 }
 0x4b6   : > { %v3376_v55 = vsel %vm1204_vm2, %v3366_v11, 0.0  ;;  %v10258_v11 = vld [vmem:[%s9447_s16 + $0x18] sm:$0xff] }
 0x4b7   : > { %v3293_v37 = vmul.f32 1.442695, %v3281_v5  ;;  %v3379_v10 = vsel %vm1204_vm2, %v3367_v38, 0.0  ;;  %v3368_v23 = vmul.f32 %v10258_v11, %v10159_v2  ;;  %v10278_v2 = vld [vmem:[%s9447_s16 + $0x30] sm:$0xff] }
 0x4b8   : > { %v3371_v63 = vmul.f32 %v10278_v2, %v10186_v15 }
 0x4b9   : > { %9089 = vpow2.f32 %v3293_v37  ;;  %3374 = vadd.xlane.f32.xlu0 %v3373_v19 }
 0x4bd   : > { %v10242_v1 = vpop.eup %9087  ;;  %3377 = vadd.xlane.f32.xlu0 %v3376_v55 }
 0x4be   : > { %v10250_v27 = vpop.xlane.xlu1 %3269  ;;  %v3310_v5 = vsel %vm1204_vm2, %v10242_v1, 0.0 }
 0x4bf   : > { %12580 = vst [vmem:[#allocation93_spill] sm:$0xff] %v10250_v27  ;;  %v3282_v37 = vsub.f32 %v10177_v26, %v10250_v27  ;;  %3311 = vadd.xlane.f32.xlu1 %v3310_v5  ;;  %v3382_v5 = vsel %vm1204_vm2, %v3368_v23, 0.0 }
 0x4c1   : > { %v3295_v19 = vmul.f32 1.442695, %v3282_v37  ;;  %3380 = vadd.xlane.f32.xlu0 %v3379_v10  ;;  %v10270_v37 = vld [vmem:[%s9447_s16 + $0x20] sm:$0xff] }
 0x4c2   : > { %v3369_v38 = vmul.f32 %v10270_v37, %v10168_v59  ;;  %v3391_v59 = vsel %vm1204_vm2, %v3371_v63, 0.0 }
 0x4c3   : > { %9091 = vpow2.f32 %v3295_v19  ;;  %v10262_v55 = vpop.eup %9089 }
 0x4c4   : > { %v10264_v39 = vpop.xlane.xlu0 %3272  ;;  %v3313_v60 = vsel %vm1204_vm2, %v10262_v55, 0.0  ;;  %v3385_v19 = vsel %vm1204_vm2, %v3369_v38, 0.0 }
 0x4c5   : > { %12581 = vst [vmem:[#allocation94_spill] sm:$0xff] %v10264_v39  ;;  %v3283_v18 = vsub.f32 %v10186_v15, %v10264_v39  ;;  %3314 = vadd.xlane.f32.xlu1 %v3313_v60  ;;  %3383 = vadd.xlane.f32.xlu0 %v3382_v5 }
 0x4c7   : > { %v3297_v10 = vmul.f32 1.442695, %v3283_v18 }
 0x4c9   : > { %9093 = vpow2.f32 %v3297_v10  ;;  %3386 = vadd.xlane.f32.xlu0 %v3385_v19  ;;  %v10300_v19 = vld [vmem:[%s9447_s16 + $0x28] sm:$0xff] }
 0x4ca   : > { %v3370_v15 = vmul.f32 %v10300_v19, %v10177_v26 }
 0x4cd   : > { %v10282_v23 = vpop.eup %9091  ;;  %3392 = vadd.xlane.f32.xlu0 %v3391_v59 }
 0x4ce   : > { %v10285_v17 = vpop.xlane.xlu1 %3275  ;;  %v3316_v18 = vsel %vm1204_vm2, %v10282_v23, 0.0 }
 0x4cf   : > { %12582 = vst [vmem:[#allocation95_spill] sm:$0xff] %v10285_v17  ;;  %v3284_v60 = vsub.f32 %v10195_v16, %v10285_v17  ;;  %3317 = vadd.xlane.f32.xlu1 %v3316_v18  ;;  %v3388_v18 = vsel %vm1204_vm2, %v3370_v15, 0.0 }
 0x4d1   : > { %v3299_v5 = vmul.f32 1.442695, %v3284_v60  ;;  %v10306_v60 = vld [vmem:[%s9447_s16 + $0x38] sm:$0xff] }
 0x4d2   : > { %12583 = vst [vmem:[#allocation96_spill] sm:$0xff] %v10306_v60 }
 0x4d3   : > { %9095 = vpow2.f32 %v3299_v5  ;;  %v10291_v38 = vpop.eup %9093  ;;  %v3372_v5 = vmul.f32 %v10306_v60, %v10195_v16 }
 0x4d4   : > { %v3319_v10 = vsel %vm1204_vm2, %v10291_v38, 0.0 }
 0x4d5   : > { %3320 = vadd.xlane.f32.xlu1 %v3319_v10  ;;  %v3394_v10 = vsel %vm1204_vm2, %v3372_v5, 0.0 }
 0x4dd   : > { %v10295_v63 = vpop.eup %9095 }
 0x4de   : > { %v3322_v59 = vsel %vm1204_vm2, %v10295_v63, 0.0 }
 0x4df   : > { %3323 = vadd.xlane.f32.xlu1 %v3322_v59 }
 0x4e3   : > { %3389 = vadd.xlane.f32.xlu1 %v3388_v18 }
 0x4e7   : > { %3395 = vadd.xlane.f32.xlu1 %v3394_v10 }
 0x526   : > { %v3306_v9 = vpop.xlane.xlu1 %3305 }
 0x532   : > { %v3303_v56 = vpop.xlane.xlu0 %3302 }
 0x533   : > { %9097 = vlog2.f32 %v3303_v56 }
 0x534   : > { %9099 = vlog2.f32 %v3306_v9 }
 0x535   : > { %9101 = vrcp.f32 %v3303_v56 }
 0x53d   : > { %v9098_v21 = vpop.eup %9097 }
 0x53e   : > { %v3342_v58 = vmul.f32 0.6931472, %v9098_v21  ;;  %v9100_v0 = vpop.eup %9099 }
 0x53f   : > { %v3344_v59 = vmul.f32 0.6931472, %v9100_v0  ;;  %v9102_v4 = vpop.eup %9101 }
 0x540   : > { %v3357_v15 = vadd.f32 %v3342_v58, %v10203_v28  ;;  %v3333_v0 = vmul.f32 %v9102_v4, %v10211_v34 }
 0x541   : > { %v3358_v5 = vadd.f32 %v3344_v59, %v10199_v54 }
 0x542   : > { %v3309_v26 = vpop.xlane.xlu0 %3308  ;;  %v3709_v28 = vsub.f32 %v3333_v0, %v10230_v46 }
 0x543   : > { %9103 = vlog2.f32 %v3309_v26 }
 0x544   : > { %9105 = vrcp.f32 %v3306_v9 }
 0x546   : > { %v3375_v31 = vpop.xlane.xlu0 %3374 }
 0x547   : > { %v3397_v16 = vsub.f32 %v3357_v15, %v3375_v31 }
 0x549   : > { %v3405_v18 = vrot.slane %v3397_v16, 4 }
 0x54a   : > { %v3378_v10 = vpop.xlane.xlu0 %3377 }
 0x54b   : > { %v3406_v32 = vadd.f32 %v3405_v18, %v3397_v16  ;;  %v3398_v35 = vsub.f32 %v3358_v5, %v3378_v10 }
 0x54c   : > { %v3312_v24 = vpop.xlane.xlu1 %3311 }
 0x54d   : > { %v3407_v60 = vrot.slane %v3406_v32, 2  ;;  %v3411_v21 = vrot.slane %v3398_v35, 4  ;;  %9107 = vlog2.f32 %v3312_v24  ;;  %v9104_v41 = vpop.eup %9103 }
 0x54e   : > { %9109 = vrcp.f32 %v3309_v26  ;;  %v3346_v58 = vmul.f32 0.6931472, %v9104_v41  ;;  %v9106_v9 = vpop.eup %9105  ;;  %v3381_v54 = vpop.xlane.xlu0 %3380 }
 0x54f   : > { %v3408_v56 = vadd.f32 %v3407_v60, %v3406_v32  ;;  %v3412_v48 = vadd.f32 %v3411_v21, %v3398_v35  ;;  %v3334_v26 = vmul.f32 %v9106_v9, %v10207_v8 }
 0x550   : > { %v3359_v59 = vadd.f32 %v3346_v58, %v10213_v25  ;;  %v10320_v25 = vmul.f32 0.125, %v3709_v28 }
 0x551   : > { %v3409_v31 = vrot.slane %v3408_v56, 1  ;;  %v3413_v15 = vrot.slane %v3412_v48, 2 }
 0x552   : > { %v3315_v16 = vpop.xlane.xlu1 %3314  ;;  %v3399_v5 = vsub.f32 %v3359_v59, %v3381_v54  ;;  %v3384_v28 = vpop.xlane.xlu0 %3383 }
 0x553   : > { %v3414_v18 = vadd.f32 %v3413_v15, %v3412_v48  ;;  %v3410_v10 = vadd.f32 %v3409_v31, %v3408_v56  ;;  %9111 = vlog2.f32 %v3315_v16  ;;  %v3710_v48 = vsub.f32 %v3334_v26, %v10238_v33 }
 0x554   : > { %v3417_v35 = vrot.slane %v3399_v5, 4  ;;  %9113 = vrcp.f32 %v3312_v24 }
 0x555   : > { %v3415_v32 = vrot.slane %v3414_v18, 1  ;;  %v10317_v41 = vmul.f32 0.125, %v3410_v10  ;;  %v10342_v59 = vmul.f32 0.125, %v3710_v48 }
 0x556   : > { %v3418_v34 = vadd.f32 %v3417_v35, %v3399_v5 }
 0x557   : > { %v9108_v4 = vpop.eup %9107  ;;  %v3741_v60 = vand.u32 2147483647, %v10317_v41  ;;  %v3416_v21 = vadd.f32 %v3415_v32, %v3414_v18 }
 0x558   : > { %v3348_v58 = vmul.f32 0.6931472, %v9108_v4  ;;  %v9110_v54 = vpop.eup %9109  ;;  %v3419_v56 = vrot.slane %v3418_v34, 2 }
 0x559   : > { %vm10323_vm11 = vcmp.lt.f32.partialorder %v3741_v60, inf  ;;  %v10327_v8 = vmul.f32 0.125, %v3416_v21  ;;  %v3335_v18 = vmul.f32 %v9110_v54, %v10223_v30  ;;  %v3387_v54 = vpop.xlane.xlu0 %3386 }
 0x55a   : > { %v3360_v0 = vadd.f32 %v3348_v58, %v10219_v6  ;;  %8526 = vmatprep.subr.msk.mxu0 %vm10323_vm11, %v10320_v25  ;;  %v3420_v24 = vadd.f32 %v3419_v56, %v3418_v34 }
 0x55b   : > { %8527 = vmatpush3.msk.msra.mxu0 %vm10323_vm11, %v10320_v25  ;;  %v3742_v31 = vand.u32 2147483647, %v10327_v8  ;;  %v3711_v60 = vsub.f32 %v3335_v18, %v10246_v47 }
 0x55c   : > { %v3318_v33 = vpop.xlane.xlu1 %3317  ;;  %v3400_v15 = vsub.f32 %v3360_v0, %v3384_v28  ;;  %8529 = vmatmul.mubr.msk.f32.vlgmr.msra.gmra.mrb[32].mxu0 %vm1204_vm2, %v9676_v57  ;;  %v3421_v5 = vrot.slane %v3420_v24, 1 }
 0x55d   : > { %9115 = vlog2.f32 %v3318_v33  ;;  %8531 = vmatprep.mubr.msk.f32.mxu0 %vm1204_vm2, %v9700_v45  ;;  %vm10347_vm12 = vcmp.lt.f32.partialorder %v3742_v31, inf  ;;  %v9112_v26 = vpop.eup %9111  ;;  %v10375_v47 = vmul.f32 0.125, %v3711_v60 }
 0x55e   : > { %v3423_v32 = vrot.slane %v3400_v15, 4  ;;  %8534 = vmatprep.subr.msk.mxu1 %vm10347_vm12, %v10342_v59  ;;  %9117 = vrcp.f32 %v3315_v16  ;;  %v3350_v30 = vmul.f32 0.6931472, %v9112_v26  ;;  %v3422_v4 = vadd.f32 %v3421_v5, %v3420_v24  ;;  %v9114_v58 = vpop.eup %9113 }
 0x55f   : > { %8535 = vmatpush3.msk.msra.mxu1 %vm10347_vm12, %v10342_v59  ;;  %v3336_v18 = vmul.f32 %v9114_v58, %v10242_v1 }
 0x560   : > { %v3424_v34 = vadd.f32 %v3423_v32, %v3400_v15  ;;  %8532 = vmatmul.mubr.msk.f32.gmra.mrb[34].mxu0 %vm1204_vm2, %v9724_v44  ;;  %8537 = vmatmul.mubr.msk.f32.vlgmr.msra.gmra.mrb[32].mxu1 %vm1204_vm2, %v9581_v62  ;;  %v3361_v21 = vadd.f32 %v3350_v30, %v10225_v51  ;;  %v10370_v16 = vmul.f32 0.125, %v3422_v4  ;;  %v12617_v51 = vld [vmem:[#allocation45_spill] sm:$0xff] }
 0x561   : > { %8539 = vmatprep.mubr.msk.f32.mxu1 %vm1204_vm2, %v9583_v7  ;;  %8544 = vmatprep.mubr.msk.f32.mxu0 %vm1204_vm2, %v9745_v52  ;;  %v3712_v60 = vsub.f32 %v3336_v18, %v10258_v11  ;;  %v12686_v18 = vld [vmem:[#allocation74_spill] sm:$0xff] }
 0x562   : > { %v3425_v48 = vrot.slane %v3424_v34, 2  ;;  %v3321_v56 = vpop.xlane.xlu1 %3320  ;;  %v3401_v0 = vsub.f32 %v3361_v21, %v3387_v54  ;;  %v3743_v24 = vand.u32 2147483647, %v10370_v16 }
 0x563   : > { %9119 = vlog2.f32 %v3321_v56 }
 0x564   : > { %v3426_v28 = vadd.f32 %v3425_v48, %v3424_v34  ;;  %8540 = vmatmul.mubr.msk.f32.gmra.mrb[34].mxu1 %vm1204_vm2, %v9585_v20  ;;  %v3429_v31 = vrot.slane %v3401_v0, 4  ;;  %vm10377_vm13 = vcmp.lt.f32.partialorder %v3743_v24, inf  ;;  %9121 = vrcp.f32 %v3318_v33 }
 0x565   : > { %8552 = vmatprep.mubr.msk.f32.mxu1 %vm1204_vm2, %v9784_v36  ;;  %8542 = vmatprep.subr.msk.mxu0 %vm10377_vm13, %v10375_v47 }
 0x566   : > { %v3427_v5 = vrot.slane %v3426_v28, 1  ;;  %v3430_v30 = vadd.f32 %v3429_v31, %v3401_v0  ;;  %8543 = vmatpush3.msk.msra.mxu0 %vm10377_vm13, %v10375_v47  ;;  %v10406_v31 = vmul.f32 0.125, %v3712_v60  ;;  %v3393_v60 = vpop.xlane.xlu0 %3392 }
 0x567   : > { %v9116_v32 = vpop.eup %9115  ;;  %8545 = vmatmul.mubr.msk.f32.vlgmr.msra.gmra.mrb[36].mxu0 %vm1204_vm2, %v9762_v22 }
 0x568   : > { %v3428_v4 = vadd.f32 %v3427_v5, %v3426_v28  ;;  %v9118_v1 = vpop.eup %9117  ;;  %v3431_v34 = vrot.slane %v3430_v30, 2  ;;  %8547 = vmatprep.mubr.msk.f32.mxu0 %vm1204_vm2, %v9782_v43  ;;  %v3352_v58 = vmul.f32 0.6931472, %v9116_v32 }
 0x569   : > { %v3337_v24 = vmul.f32 %v9118_v1, %v10262_v55 }
 0x56a   : > { %v10398_v21 = vmul.f32 0.125, %v3428_v4  ;;  %v3432_v48 = vadd.f32 %v3431_v34, %v3430_v30  ;;  %v3362_v33 = vadd.f32 %v3352_v58, %v10250_v27 }
 0x56b   : > { %8548 = vmatmul.mubr.msk.f32.gmra.mrb[38].mxu0 %vm1204_vm2, %v9790_v13  ;;  %v3713_v1 = vsub.f32 %v3337_v24, %v10270_v37 }
 0x56c   : > { %v3324_v54 = vpop.xlane.xlu1 %3323  ;;  %v3744_v0 = vand.u32 2147483647, %v10398_v21  ;;  %v3433_v28 = vrot.slane %v3432_v48, 1  ;;  %8560 = vmatprep.mubr.msk.f32.mxu0 %vm1204_vm2, %v9804_v49 }
 0x56d   : > { %9123 = vlog2.f32 %v3324_v54  ;;  %v9120_v11 = vpop.eup %9119 }
 0x56e   : > { %vm10408_vm14 = vcmp.lt.f32.partialorder %v3744_v0, inf  ;;  %9125 = vrcp.f32 %v3321_v56  ;;  %v3354_v5 = vmul.f32 0.6931472, %v9120_v11  ;;  %v3434_v30 = vadd.f32 %v3433_v28, %v3432_v48  ;;  %v9122_v24 = vpop.eup %9121 }
 0x56f   : > { %8550 = vmatprep.subr.msk.mxu1 %vm10408_vm14, %v10406_v31  ;;  %v10431_v11 = vmul.f32 0.125, %v3713_v1  ;;  %9127 = vrcp.f32 %v3324_v54 }
 0x570   : > { %v3390_v32 = vpop.xlane.xlu1 %3389  ;;  %8551 = vmatpush3.msk.msra.mxu1 %vm10408_vm14, %v10406_v31  ;;  %v3363_v56 = vadd.f32 %v3354_v5, %v10264_v39  ;;  %v10426_v34 = vmul.f32 0.125, %v3434_v30  ;;  %v12615_v39 = vld [vmem:[#allocation44_spill] sm:$0xff] }
 0x571   : > { %v3402_v4 = vsub.f32 %v3362_v33, %v3390_v32  ;;  %8553 = vmatmul.mubr.msk.f32.vlgmr.msra.gmra.mrb[36].mxu1 %vm1204_vm2, %v9794_v50 }
 0x572   : > { %8555 = vmatprep.mubr.msk.f32.mxu1 %vm1204_vm2, %v9806_v40  ;;  %v3403_v48 = vsub.f32 %v3363_v56, %v3393_v60  ;;  %v3745_v0 = vand.u32 2147483647, %v10426_v34 }
 0x573   : > { %v3435_v58 = vrot.slane %v3402_v4, 4 }
 0x574   : > { %v3441_v33 = vrot.slane %v3403_v48, 4  ;;  %vm10435_vm15 = vcmp.lt.f32.partialorder %v3745_v0, inf  ;;  %v3396_v26 = vpop.xlane.xlu1 %3395 }
 0x575   : > { %v3436_v28 = vadd.f32 %v3435_v58, %v3402_v4  ;;  %8556 = vmatmul.mubr.msk.f32.gmra.mrb[38].mxu1 %vm1204_vm2, %v9816_v61  ;;  %8558 = vmatprep.subr.msk.mxu0 %vm10435_vm15, %v10431_v11  ;;  %v3338_v58 = vmul.f32 %v9122_v24, %v10282_v23 }
 0x576   : > { %8568 = vmatprep.mubr.msk.f32.mxu1 %vm1204_vm2, %v9826_v29  ;;  %8559 = vmatpush3.msk.msra.mxu0 %vm10435_vm15, %v10431_v11  ;;  %v3442_v4 = vadd.f32 %v3441_v33, %v3403_v48 }
 0x577   : > { %v3437_v5 = vrot.slane %v3436_v28, 2  ;;  %v9124_v30 = vpop.eup %9123  ;;  %8561 = vmatmul.mubr.msk.f32.vlgmr.msra.gmra.mrb[40].mxu0 %vm1204_vm2, %v9812_v3 }
 0x578   : > { %v3356_v56 = vmul.f32 0.6931472, %v9124_v30  ;;  %v9126_v60 = vpop.eup %9125  ;;  %8563 = vmatprep.mubr.msk.f32.mxu0 %vm1204_vm2, %v9824_v12  ;;  %v3443_v0 = vrot.slane %v3442_v4, 2 }
 0x579   : > { %v3438_v1 = vadd.f32 %v3437_v5, %v3436_v28  ;;  %v3339_v48 = vmul.f32 %v9126_v60, %v10291_v38  ;;  %v3714_v28 = vsub.f32 %v3338_v58, %v10300_v19  ;;  %v9128_v38 = vpop.eup %9127 }
 0x57a   : > { %v3364_v55 = vadd.f32 %v3356_v56, %v10285_v17  ;;  %v3444_v35 = vadd.f32 %v3443_v0, %v3442_v4  ;;  %v3340_v58 = vmul.f32 %v9128_v38, %v10295_v63 }
 0x57b   : > { %v3439_v32 = vrot.slane %v3438_v1, 1  ;;  %8564 = vmatmul.mubr.msk.f32.gmra.mrb[42].mxu0 %vm1204_vm2, %v9832_v42 }
 0x57c   : > { %v3404_v9 = vsub.f32 %v3364_v55, %v3396_v26  ;;  %8576 = vmatprep.mubr.msk.f32.mxu0 %vm1204_vm2, %v9843_v53  ;;  %v3445_v33 = vrot.slane %v3444_v35, 1  ;;  %v3715_v26 = vsub.f32 %v3339_v48, %v10278_v2  ;;  %v10466_v55 = vmul.f32 0.125, %v3714_v28  ;;  %v12600_v48 = vld [vmem:[#allocation31_spill] sm:$0xff]  ;;  %v12601_v28 = vld [vmem:[#allocation32_spill] sm:$0xff] }
 0x57d   : > { %v3440_v54 = vadd.f32 %v3439_v32, %v3438_v1 }
 0x57e   : > { %v3447_v23 = vrot.slane %v3404_v9, 4  ;;  %v3446_v5 = vadd.f32 %v3445_v33, %v3444_v35  ;;  %v10484_v35 = vmul.f32 0.125, %v3715_v26  ;;  %v12602_v33 = vmov 0.0|0.0   ;;  %v12606_v26 = vld [vmem:[#allocation35_spill] sm:$0xff] }
 0x57f   : > { %v10462_v24 = vmul.f32 0.125, %v3440_v54 }
 0x580   : > { %v3448_v30 = vadd.f32 %v3447_v23, %v3404_v9  ;;  %v10468_v32 = vmul.f32 0.125, %v3446_v5  ;;  %v12603_v23 = vld [vmem:[#allocation34_spill] sm:$0xff]  ;;  %v12604_v5 = vld [vmem:[#allocation33_spill] sm:$0xff] }
 0x581   : > { %12594 = vst [vmem:[#allocation97_spill] sm:$0xff] %v10462_v24  ;;  %v3746_v4 = vand.u32 2147483647, %v10462_v24 }
 0x582   : > { %12595 = vst [vmem:[#allocation98_spill] sm:$0xff] %v10468_v32  ;;  %v3449_v1 = vrot.slane %v3448_v30, 2  ;;  %v3747_v2 = vand.u32 2147483647, %v10468_v32 }
 0x583   : > { %vm10470_vm3 = vcmp.lt.f32.partialorder %v3746_v4, inf }
 0x584   : > { %8566 = vmatprep.subr.msk.mxu1 %vm10470_vm3, %v10466_v55  ;;  %v3450_v9 = vadd.f32 %v3449_v1, %v3448_v30  ;;  %vm10486_vm4 = vcmp.lt.f32.partialorder %v3747_v2, inf  ;;  %v12605_v30 = vld [vmem:[#allocation96_spill] sm:$0xff] }
 0x585   : > { %8567 = vmatpush3.msk.msra.mxu1 %vm10470_vm3, %v10466_v55  ;;  %8574 = vmatprep.subr.msk.mxu0 %vm10486_vm4, %v10484_v35  ;;  %v3716_v4 = vsub.f32 %v3340_v58, %v12605_v30  ;;  %v12608_v1 = vld [vmem:[#allocation36_spill] sm:$0xff]  ;;  %v12613_v30 = vld [vmem:[#allocation38_spill] sm:$0xff] }
 0x586   : > { %8569 = vmatmul.mubr.msk.f32.vlgmr.msra.gmra.mrb[40].mxu1 %vm1204_vm2, %v9836_v14  ;;  %v3451_v0 = vrot.slane %v3450_v9, 1  ;;  %8575 = vmatpush3.msk.msra.mxu0 %vm10486_vm4, %v10484_v35 }
 0x587   : > { %8571 = vmatprep.mubr.msk.f32.mxu1 %vm1204_vm2, %v12600_v48  ;;  %8577 = vmatmul.mubr.msk.f32.vlgmr.msra.gmra.mrb[44].mxu0 %vm1204_vm2, %v12601_v28 }
 0x588   : > { %v3452_v63 = vadd.f32 %v3451_v0, %v3450_v9  ;;  %8926 = vmatprep.subr.bf16.mxu0 %v12602_v33  ;;  %8579 = vmatprep.mubr.msk.f32.mxu0 %vm1204_vm2, %v12603_v23  ;;  %v10519_v9 = vmul.f32 0.125, %v3716_v4  ;;  %v12609_v0 = vmov 0.0   ;;  %v12614_v4 = vld [vmem:[#allocation39_spill] sm:$0xff] }
 0x58a   : > { %8572 = vmatmul.mubr.msk.f32.gmra.mrb[42].mxu1 %vm1204_vm2, %v12604_v5  ;;  %v10514_v38 = vmul.f32 0.125, %v3452_v63  ;;  %v12612_v63 = vld [vmem:[#allocation37_spill] sm:$0xff] }
 0x58b   : > { %8584 = vmatprep.mubr.msk.f32.mxu1 %vm1204_vm2, %v12606_v26  ;;  %8580 = vmatmul.mubr.msk.f32.gmra.mrb[46].mxu0 %vm1204_vm2, %v12608_v1 }
 0x58c   : > { %12607 = vst [vmem:[#allocation96_spill] sm:$0xff] %v10514_v38  ;;  %v3748_v2 = vand.u32 2147483647, %v10514_v38  ;;  %8598 = vmatprep.mubr.msk.f32.mxu0 %vm9261_vm0, %v12609_v0 }
 0x58e   : > { %vm10523_vm5 = vcmp.lt.f32.partialorder %v3748_v2, inf }
 0x58f   : > { %8582 = vmatprep.subr.msk.mxu1 %vm10523_vm5, %v10519_v9 }
 0x590   : > { %8583 = vmatpush3.msk.msra.mxu1 %vm10523_vm5, %v10519_v9 }
 0x591   : > { %8585 = vmatmul.mubr.msk.f32.vlgmr.msra.gmra.mrb[44].mxu1 %vm1204_vm2, %v12612_v63  ;;  %8932 = vmatprep.subr.bf16.mxu1 %v12602_v33 }
 0x592   : > { %8587 = vmatprep.mubr.msk.f32.mxu1 %vm1204_vm2, %v12613_v30 }
 0x595   : > { %8588 = vmatmul.mubr.msk.f32.gmra.mrb[46].mxu1 %vm1204_vm2, %v12614_v4 }
 0x596   : > { %8609 = vmatprep.mubr.msk.f32.mxu1 %vm9261_vm0, %v12609_v0 }
 0x62f   : > { %v8530_v2 = vpop.f32.mrb[32].mxu0 }
 0x630   : > { %v4518_v58 = vmul.f32 0.1, %v8530_v2  ;;  %v3847_v19 = vpop.f32.mrb[33].mxu0  ;;  %v12619_v2 = vld [vmem:[#allocation46_spill] sm:$0xff] }
 0x631   : > { %v4517_v17 = vmul.f32 0.1, %v3847_v19  ;;  %v12621_v19 = vld [vmem:[#allocation40_spill] sm:$0xff] }
 0x632   : > { %v10546_v27 = vsub.f32 %v12615_v39, %v4518_v58  ;;  %v12623_v58 = vld [vmem:[#allocation47_spill] sm:$0xff] }
 0x633   : > { %v10549_v6 = vsub.f32 %v12617_v51, %v4517_v17  ;;  %v8533_v63 = vpop.f32.mrb[34].mxu0  ;;  %v8538_v1 = vpop.f32.mrb[32].mxu1  ;;  %v12625_v51 = vld [vmem:[#allocation41_spill] sm:$0xff] }
 0x634   : > { %12616 = vst [vmem:[#allocation44_spill] sm:$0xff] %v10546_v27  ;;  %v4520_v26 = vmul.f32 0.1, %v8533_v63  ;;  %v4522_v30 = vmul.f32 0.1, %v8538_v1  ;;  %v3857_v23 = vpop.f32.mrb[35].mxu0 }
 0x635   : > { %12618 = vst [vmem:[#allocation45_spill] sm:$0xff] %v10549_v6  ;;  %v3932_v5 = vpop.f32.mrb[33].mxu1  ;;  %v8927_v4 = vpack.c.bf16 %v10546_v27, %v10549_v6  ;;  %v4519_v38 = vmul.f32 0.1, %v3857_v23 }
 0x636   : > { %v4521_v28 = vmul.f32 0.1, %v3932_v5  ;;  %v10554_v48 = vsub.f32 %v12619_v2, %v4520_v26  ;;  %v10557_v39 = vsub.f32 %v12621_v19, %v4522_v30  ;;  %v12627_v30 = vld [vmem:[#allocation42_spill] sm:$0xff]  ;;  %v12629_v2 = vld [vmem:[#allocation43_spill] sm:$0xff] }
 0x637   : > { %v10560_v17 = vsub.f32 %v12623_v58, %v4519_v38  ;;  %v8541_v1 = vpop.f32.mrb[34].mxu1  ;;  %8928 = vmatpush3.bf16.msra.mxu0 %v8927_v4 }
 0x638   : > { %12620 = vst [vmem:[#allocation46_spill] sm:$0xff] %v10554_v48  ;;  %12622 = vst [vmem:[#allocation40_spill] sm:$0xff] %v10557_v39  ;;  %v10563_v14 = vsub.f32 %v12625_v51, %v4521_v28  ;;  %v4524_v63 = vmul.f32 0.1, %v8541_v1  ;;  %v3942_v32 = vpop.f32.mrb[35].mxu1  ;;  %8929 = vmatprep.subr.bf16.mxu0 %v12602_v33  ;;  %v12631_v1 = vld [vmem:[#allocation48_spill] sm:$0xff] }
 0x639   : > { %12624 = vst [vmem:[#allocation47_spill] sm:$0xff] %v10560_v17  ;;  %v8930_v23 = vpack.c.bf16 %v10554_v48, %v10560_v17  ;;  %v4523_v26 = vmul.f32 0.1, %v3942_v32  ;;  %v12663_v48 = vld [vmem:[#allocation63_spill] sm:$0xff] }
 0x63a   : > { %12626 = vst [vmem:[#allocation41_spill] sm:$0xff] %v10563_v14  ;;  %v8933_v5 = vpack.c.bf16 %v10557_v39, %v10563_v14  ;;  %v10571_v38 = vsub.f32 %v12627_v30, %v4524_v63  ;;  %v8546_v19 = vpop.f32.mrb[36].mxu0  ;;  %v9227_v30 = vld [vmem:[%s9347_s11] sm:$0xff] }
 0x63b   : > { %v10574_v28 = vsub.f32 %v12629_v2, %v4523_v26  ;;  %8931 = vmatpush3.bf16.msra.mxu0 %v8930_v23  ;;  %v4526_v4 = vmul.f32 0.1, %v8546_v19  ;;  %v4017_v58 = vpop.f32.mrb[37].mxu0  ;;  %v12633_v26 = vld [vmem:[#allocation49_spill] sm:$0xff] }
 0x63c   : > { %12628 = vst [vmem:[#allocation42_spill] sm:$0xff] %v10571_v38  ;;  %8934 = vmatpush3.bf16.msra.mxu1 %v8933_v5  ;;  %8938 = vmatprep.subr.bf16.mxu0 %v12602_v33  ;;  %v4525_v32 = vmul.f32 0.1, %v4017_v58 }
 0x63d   : > { %12630 = vst [vmem:[#allocation43_spill] sm:$0xff] %v10574_v28  ;;  %8935 = vmatprep.subr.bf16.mxu1 %v12602_v33  ;;  %v8936_v51 = vpack.c.bf16 %v10571_v38, %v10574_v28  ;;  %v10581_v63 = vsub.f32 %v12631_v1, %v4526_v4  ;;  %v12635_v1 = vld [vmem:[#allocation50_spill] sm:$0xff] }
 0x63e   : > { %8599 = vmatmul.mubr.msk.f32.vlgmr.msra.gmra.mrb[48].mxu0 %vm619_vm1, %v9227_v30  ;;  %v10586_v23 = vsub.f32 %v12633_v26, %v4525_v32  ;;  %v8549_v5 = vpop.f32.mrb[38].mxu0  ;;  %v9228_v30 = vld [vmem:[%s9347_s11 + $0x8] sm:$0xff] }
 0x63f   : > { %12632 = vst [vmem:[#allocation48_spill] sm:$0xff] %v10581_v63  ;;  %8620 = vmatprep.mubr.msk.f32.mxu0 %vm9261_vm0, %v12609_v0  ;;  %v4528_v2 = vmul.f32 0.1, %v8549_v5  ;;  %v4027_v19 = vpop.f32.mrb[39].mxu0  ;;  %v12637_v32 = vld [vmem:[#allocation51_spill] sm:$0xff] }
 0x640   : > { %12634 = vst [vmem:[#allocation49_spill] sm:$0xff] %v10586_v23  ;;  %8937 = vmatpush3.bf16.msra.mxu1 %v8936_v51  ;;  %v8939_v58 = vpack.c.bf16 %v10581_v63, %v10586_v23  ;;  %v4527_v4 = vmul.f32 0.1, %v4027_v19  ;;  %v12639_v23 = vld [vmem:[#allocation52_spill] sm:$0xff] }
 0x641   : > { %8944 = vmatprep.subr.bf16.mxu1 %v12602_v33  ;;  %v10594_v28 = vsub.f32 %v12635_v1, %v4528_v2 }
 0x642   : > { %v10599_v26 = vsub.f32 %v12637_v32, %v4527_v4  ;;  %8940 = vmatpush3.bf16.msra.mxu0 %v8939_v58  ;;  %v12641_v4 = vld [vmem:[#allocation53_spill] sm:$0xff] }
 0x643   : > { %12636 = vst [vmem:[#allocation50_spill] sm:$0xff] %v10594_v28  ;;  %8610 = vmatmul.mubr.msk.f32.vlgmr.msra.gmra.mrb[48].mxu1 %vm619_vm1, %v9228_v30  ;;  %8941 = vmatprep.subr.bf16.mxu0 %v12602_v33 }
 0x644   : > { %12638 = vst [vmem:[#allocation51_spill] sm:$0xff] %v10599_v26  ;;  %8631 = vmatprep.mubr.msk.f32.mxu1 %vm9261_vm0, %v12609_v0  ;;  %v8554_v51 = vpop.f32.mrb[36].mxu1  ;;  %v8942_v5 = vpack.c.bf16 %v10594_v28, %v10599_v26  ;;  %v9229_v26 = vld [vmem:[%s9347_s11 + $0x10] sm:$0xff] }
 0x645   : > { %v4530_v19 = vmul.f32 0.1, %v8554_v51  ;;  %v4102_v2 = vpop.f32.mrb[37].mxu1  ;;  %v12643_v51 = vld [vmem:[#allocation55_spill] sm:$0xff] }
 0x646   : > { %v4529_v1 = vmul.f32 0.1, %v4102_v2  ;;  %8943 = vmatpush3.bf16.msra.mxu0 %v8942_v5  ;;  %v12645_v5 = vld [vmem:[#allocation57_spill] sm:$0xff] }
 0x647   : > { %v10607_v63 = vsub.f32 %v12639_v23, %v4530_v19  ;;  %8950 = vmatprep.subr.bf16.mxu0 %v12602_v33 }
 0x648   : > { %v10610_v30 = vsub.f32 %v12641_v4, %v4529_v1  ;;  %v8557_v58 = vpop.f32.mrb[38].mxu1 }
 0x649   : > { %12640 = vst [vmem:[#allocation52_spill] sm:$0xff] %v10607_v63  ;;  %v4532_v32 = vmul.f32 0.1, %v8557_v58  ;;  %v4112_v38 = vpop.f32.mrb[39].mxu1  ;;  %8621 = vmatmul.mubr.msk.f32.vlgmr.msra.gmra.mrb[50].mxu0 %vm619_vm1, %v9229_v26  ;;  %v12647_v26 = vld [vmem:[#allocation54_spill] sm:$0xff] }
 0x64a   : > { %12642 = vst [vmem:[#allocation53_spill] sm:$0xff] %v10610_v30  ;;  %v8945_v14 = vpack.c.bf16 %v10607_v63, %v10610_v30  ;;  %v4531_v17 = vmul.f32 0.1, %v4112_v38  ;;  %v8562_v23 = vpop.f32.mrb[40].mxu0  ;;  %8642 = vmatprep.mubr.msk.f32.mxu0 %vm9261_vm0, %v12609_v0 }
 0x64b   : > { %v10618_v2 = vsub.f32 %v12643_v51, %v4532_v32  ;;  %v4534_v1 = vmul.f32 0.1, %v8562_v23  ;;  %v4187_v4 = vpop.f32.mrb[41].mxu0  ;;  %v12649_v51 = vld [vmem:[#allocation56_spill] sm:$0xff] }
 0x64c   : > { %v10623_v19 = vsub.f32 %v12645_v5, %v4531_v17  ;;  %8946 = vmatpush3.bf16.msra.mxu1 %v8945_v14  ;;  %v4533_v58 = vmul.f32 0.1, %v4187_v4  ;;  %v12651_v5 = vld [vmem:[#allocation58_spill] sm:$0xff] }
 0x64d   : > { %12644 = vst [vmem:[#allocation55_spill] sm:$0xff] %v10618_v2  ;;  %8947 = vmatprep.subr.bf16.mxu1 %v12602_v33  ;;  %v10629_v32 = vsub.f32 %v12647_v26, %v4534_v1 }
 0x64e   : > { %12646 = vst [vmem:[#allocation57_spill] sm:$0xff] %v10623_v19  ;;  %v8948_v38 = vpack.c.bf16 %v10618_v2, %v10623_v19  ;;  %v10632_v30 = vsub.f32 %v12649_v51, %v4533_v58  ;;  %v8565_v63 = vpop.f32.mrb[42].mxu0  ;;  %v12653_v19 = vld [vmem:[#allocation59_spill] sm:$0xff]  ;;  %v9230_v58 = vld [vmem:[%s9347_s11 + $0x18] sm:$0xff] }
 0x64f   : > { %12648 = vst [vmem:[#allocation54_spill] sm:$0xff] %v10629_v32  ;;  %v4536_v28 = vmul.f32 0.1, %v8565_v63  ;;  %v4197_v17 = vpop.f32.mrb[43].mxu0 }
 0x650   : > { %12650 = vst [vmem:[#allocation56_spill] sm:$0xff] %v10632_v30  ;;  %8949 = vmatpush3.bf16.msra.mxu1 %v8948_v38  ;;  %v8951_v14 = vpack.c.bf16 %v10629_v32, %v10632_v30  ;;  %v4535_v23 = vmul.f32 0.1, %v4197_v17  ;;  %v12655_v17 = vld [vmem:[#allocation60_spill] sm:$0xff] }
 0x651   : > { %8956 = vmatprep.subr.bf16.mxu1 %v12602_v33  ;;  %v10638_v4 = vsub.f32 %v12651_v5, %v4536_v28  ;;  %v12657_v5 = vld [vmem:[#allocation61_spill] sm:$0xff] }
 0x652   : > { %v10641_v1 = vsub.f32 %v12653_v19, %v4535_v23  ;;  %8952 = vmatpush3.bf16.msra.mxu0 %v8951_v14  ;;  %v9231_v19 = vld [vmem:[%s9347_s11 + $0x20] sm:$0xff] }
 0x653   : > { %12652 = vst [vmem:[#allocation58_spill] sm:$0xff] %v10638_v4  ;;  %8632 = vmatmul.mubr.msk.f32.vlgmr.msra.gmra.mrb[50].mxu1 %vm619_vm1, %v9230_v58  ;;  %8953 = vmatprep.subr.bf16.mxu0 %v12602_v33 }
 0x654   : > { %12654 = vst [vmem:[#allocation59_spill] sm:$0xff] %v10641_v1  ;;  %8653 = vmatprep.mubr.msk.f32.mxu1 %vm9261_vm0, %v12609_v0  ;;  %v8954_v63 = vpack.c.bf16 %v10638_v4, %v10641_v1 }
 0x656   : > { %8955 = vmatpush3.bf16.msra.mxu0 %v8954_v63 }
 0x657   : > { %8962 = vmatprep.subr.bf16.mxu0 %v12602_v33 }
 0x659   : > { %v8570_v38 = vpop.f32.mrb[40].mxu1  ;;  %8643 = vmatmul.mubr.msk.f32.vlgmr.msra.gmra.mrb[52].mxu0 %vm619_vm1, %v9231_v19 }
 0x65a   : > { %v4538_v28 = vmul.f32 0.1, %v8570_v38  ;;  %v4272_v26 = vpop.f32.mrb[41].mxu1  ;;  %v8578_v23 = vpop.f32.mrb[44].mxu0  ;;  %8664 = vmatprep.mubr.msk.f32.mxu0 %vm9261_vm0, %v12609_v0 }
 0x65b   : > { %v4537_v51 = vmul.f32 0.1, %v4272_v26  ;;  %v4542_v63 = vmul.f32 0.1, %v8578_v23  ;;  %v4357_v1 = vpop.f32.mrb[45].mxu0  ;;  %v12659_v26 = vld [vmem:[#allocation62_spill] sm:$0xff] }
 0x65c   : > { %v10654_v14 = vsub.f32 %v12655_v17, %v4538_v28  ;;  %v4541_v30 = vmul.f32 0.1, %v4357_v1  ;;  %v12661_v17 = vld [vmem:[#allocation64_spill] sm:$0xff]  ;;  %v12665_v23 = vld [vmem:[#allocation65_spill] sm:$0xff] }
 0x65d   : > { %v10659_v58 = vsub.f32 %v12657_v5, %v4537_v51  ;;  %v8573_v4 = vpop.f32.mrb[42].mxu1  ;;  %v10664_v2 = vsub.f32 %v12659_v26, %v4542_v63  ;;  %v12669_v63 = vld [vmem:[#allocation67_spill] sm:$0xff] }
 0x65e   : > { %12656 = vst [vmem:[#allocation60_spill] sm:$0xff] %v10654_v14  ;;  %v4540_v38 = vmul.f32 0.1, %v8573_v4  ;;  %v4282_v32 = vpop.f32.mrb[43].mxu1  ;;  %v10667_v39 = vsub.f32 %v12661_v17, %v4541_v30  ;;  %v8581_v51 = vpop.f32.mrb[46].mxu0 }
 0x65f   : > { %12658 = vst [vmem:[#allocation61_spill] sm:$0xff] %v10659_v58  ;;  %v8957_v19 = vpack.c.bf16 %v10654_v14, %v10659_v58  ;;  %12660 = vst [vmem:[#allocation62_spill] sm:$0xff] %v10664_v2  ;;  %v4539_v28 = vmul.f32 0.1, %v4282_v32  ;;  %v4544_v1 = vmul.f32 0.1, %v8581_v51 }
 0x660   : > { %12662 = vst [vmem:[#allocation64_spill] sm:$0xff] %v10667_v39  ;;  %v10670_v6 = vsub.f32 %v12663_v48, %v4540_v38  ;;  %v4367_v4 = vpop.f32.mrb[47].mxu0  ;;  %v8963_v58 = vpack.c.bf16 %v10664_v2, %v10667_v39  ;;  %v12667_v32 = vld [vmem:[#allocation66_spill] sm:$0xff] }
 0x661   : > { %v10673_v5 = vsub.f32 %v12665_v23, %v4539_v28  ;;  %8958 = vmatpush3.bf16.msra.mxu1 %v8957_v19  ;;  %v4543_v14 = vmul.f32 0.1, %v4367_v4  ;;  %v10681_v48 = vsub.f32 %v12667_v32, %v4544_v1  ;;  %v12671_v23 = vld [vmem:[#allocation68_spill] sm:$0xff] }
 0x662   : > { %12664 = vst [vmem:[#allocation63_spill] sm:$0xff] %v10670_v6  ;;  %8959 = vmatprep.subr.bf16.mxu1 %v12602_v33  ;;  %8964 = vmatpush3.bf16.msra.mxu0 %v8963_v58  ;;  %v12673_v58 = vld [vmem:[#allocation69_spill] sm:$0xff] }
 0x663   : > { %12666 = vst [vmem:[#allocation65_spill] sm:$0xff] %v10673_v5  ;;  %v8960_v30 = vpack.c.bf16 %v10670_v6, %v10673_v5  ;;  %12668 = vst [vmem:[#allocation66_spill] sm:$0xff] %v10681_v48  ;;  %v10684_v38 = vsub.f32 %v12669_v63, %v4543_v14  ;;  %8965 = vmatprep.subr.bf16.mxu0 %v12602_v33  ;;  %v9232_v14 = vld [vmem:[%s9347_s11 + $0x28] sm:$0xff] }
 0x664   : > { %v8586_v26 = vpop.f32.mrb[44].mxu1 }
 0x665   : > { %12670 = vst [vmem:[#allocation67_spill] sm:$0xff] %v10684_v38  ;;  %8961 = vmatpush3.bf16.msra.mxu1 %v8960_v30  ;;  %v8966_v19 = vpack.c.bf16 %v10681_v48, %v10684_v38  ;;  %v4546_v28 = vmul.f32 0.1, %v8586_v26  ;;  %v4442_v17 = vpop.f32.mrb[45].mxu1 }
 0x666   : > { %8968 = vmatprep.subr.bf16.mxu1 %v12602_v33  ;;  %v4545_v51 = vmul.f32 0.1, %v4442_v17 }
 0x667   : > { %v10691_v1 = vsub.f32 %v12671_v23, %v4546_v28  ;;  %8967 = vmatpush3.bf16.msra.mxu0 %v8966_v19  ;;  %v9233_v28 = vld [vmem:[%s9347_s11 + $0x30] sm:$0xff]  ;;  %v12675_v19 = vld [vmem:[#allocation70_spill] sm:$0xff] }
 0x668   : > { %8654 = vmatmul.mubr.msk.f32.vlgmr.msra.gmra.mrb[52].mxu1 %vm619_vm1, %v9232_v14  ;;  %v10696_v4 = vsub.f32 %v12673_v58, %v4545_v51  ;;  %v8589_v30 = vpop.f32.mrb[46].mxu1  ;;  %v12677_v14 = vld [vmem:[#allocation23_spill] sm:$0xff] }
 0x669   : > { %12672 = vst [vmem:[#allocation68_spill] sm:$0xff] %v10691_v1  ;;  %8675 = vmatprep.mubr.msk.f32.mxu1 %vm9261_vm0, %v12609_v0  ;;  %v4548_v32 = vmul.f32 0.1, %v8589_v30  ;;  %v4452_v63 = vpop.f32.mrb[47].mxu1  ;;  %v12678_v51 = vld [vmem:[#allocation71_spill] sm:$0xff] }
 0x66a   : > { %12674 = vst [vmem:[#allocation69_spill] sm:$0xff] %v10696_v4  ;;  %v8969_v26 = vpack.c.bf16 %v10691_v1, %v10696_v4  ;;  %v4547_v17 = vmul.f32 0.1, %v4452_v63  ;;  %8665 = vmatmul.mubr.msk.f32.vlgmr.msra.gmra.mrb[54].mxu0 %vm619_vm1, %v9233_v28  ;;  %v9234_v63 = vld [vmem:[%s9347_s11 + $0x38] sm:$0xff]  ;;  %v12680_v28 = vld [vmem:[#allocation19_spill] sm:$0xff]  ;;  %s11872_s11 = scalar_lea.vmem %s12254_s3, %s9341_s8  ;;  %s7819_s8 = sshll.u32 %s12917_s22, 3 }
 0x66b   : > { %v10705_v23 = vsub.f32 %v12675_v19, %v4548_v32  ;;  %8680 = vmatprep.mubr.msk.f32.mxu0 %vm1204_vm2, %v12677_v14  ;;  %v12681_v32 = vsel %vm10323_vm11, %v10320_v25, 0.0  ;;  %vm7650_vm11 = vcmask 1043459   ;;  %s317_s14 = scalar_lea.vmem %s12257_s6, %s7819_s8 }
 0x66c   : > { %v10710_v58 = vsub.f32 %v12678_v51, %v4547_v17  ;;  %8970 = vmatpush3.bf16.msra.mxu1 %v8969_v26  ;;  %v4461_v17 = vsel %vm1204_vm2, %v12681_v32, 0.0  ;;  %v12682_v26 = vsel %vm10347_vm12, %v10342_v59, 0.0  ;;  %v12684_v59 = vsel %vm10408_vm14, %v10406_v31, 0.0 }
 0x66d   : > { %12676 = vst [vmem:[#allocation70_spill] sm:$0xff] %v10705_v23  ;;  %8971 = vmatprep.subr.bf16.mxu1 %v12602_v33  ;;  %v4462_v19 = vrot.slane %v4461_v17, 4  ;;  %v4468_v14 = vsel %vm1204_vm2, %v12682_v26, 0.0 }
 0x66e   : > { %12679 = vst [vmem:[#allocation23_spill] sm:$0xff] %v10710_v58  ;;  %v8972_v30 = vpack.c.bf16 %v10705_v23, %v10710_v58 }
 0x66f   : > { %v4463_v51 = vadd.f32 %v4462_v19, %v4461_v17  ;;  %v4482_v17 = vsel %vm1204_vm2, %v12684_v59, 0.0 }
 0x670   : > { %8973 = vmatpush3.bf16.msra.mxu1 %v8972_v30  ;;  %v4469_v30 = vrot.slane %v4468_v14, 4  ;;  %v4483_v15 = vrot.slane %v4482_v17, 4 }
 0x671   : > { %v4464_v58 = vrot.slane %v4463_v51, 2 }
 0x673   : > { %8676 = vmatmul.mubr.msk.f32.vlgmr.msra.gmra.mrb[54].mxu1 %vm619_vm1, %v9234_v63  ;;  %v4470_v63 = vadd.f32 %v4469_v30, %v4468_v14  ;;  %v4465_v32 = vadd.f32 %v4464_v58, %v4463_v51 }
 0x674   : > { %8688 = vmatprep.mubr.msk.f32.mxu1 %vm1204_vm2, %v12680_v28  ;;  %v12683_v28 = vsel %vm10377_vm13, %v10375_v47, 0.0  ;;  %vm7652_vm13 = vcmask 1044484  }
 0x675   : > { %v4475_v46 = vsel %vm1204_vm2, %v12683_v28, 0.0  ;;  %v4471_v25 = vrot.slane %v4470_v63, 2  ;;  %v4466_v1 = vrot.slane %v4465_v32, 1  ;;  %v4484_v28 = vadd.f32 %v4483_v15, %v4482_v17 }
 0x676   : > { %v4476_v23 = vrot.slane %v4475_v46, 4 }
 0x677   : > { %v4472_v10 = vadd.f32 %v4471_v25, %v4470_v63  ;;  %v4467_v26 = vadd.f32 %v4466_v1, %v4465_v32  ;;  %v4485_v25 = vrot.slane %v4484_v28, 2  ;;  %v12688_v32 = vld [vmem:[#allocation2_spill] sm:$0xff] }
 0x678   : > { %v4477_v4 = vadd.f32 %v4476_v23, %v4475_v46  ;;  %v12685_v23 = vsel %vm10435_vm15, %v10431_v11, 0.0  ;;  %vm12433_vm15 = vcmask 1045509  }
 0x679   : > { %v4473_v14 = vrot.slane %v4472_v10, 1  ;;  %v4581_v30 = vmul.f32 0.1, %v4467_v26  ;;  %v4489_v58 = vsel %vm1204_vm2, %v12685_v23, 0.0 }
 0x67a   : > { %v4478_v19 = vrot.slane %v4477_v4, 2  ;;  %v4490_v51 = vrot.slane %v4489_v58, 4 }
 0x67b   : > { %v4474_v47 = vadd.f32 %v4473_v14, %v4472_v10  ;;  %v10745_v63 = vsub.f32 %v12686_v18, %v4581_v30  ;;  %v12689_v10 = vld [vmem:[#allocation72_spill] sm:$0xff] }
 0x67c   : > { %v4479_v38 = vadd.f32 %v4478_v19, %v4477_v4  ;;  %v4491_v1 = vadd.f32 %v4490_v51, %v4489_v58  ;;  %v4486_v19 = vadd.f32 %v4485_v25, %v4484_v28 }
 0x67d   : > { %12687 = vst [vmem:[#allocation71_spill] sm:$0xff] %v10745_v63  ;;  %v4582_v31 = vmul.f32 0.1, %v4474_v47  ;;  %v4608_v59 = vrot.slane %v10745_v63, %v12688_v32  ;;  %v10910_v63 = vld [vmem:[%s9447_s16 + $0x30] sm:$0xff] }
 0x67e   : > { %v4480_v46 = vrot.slane %v4479_v38, 1  ;;  %v4492_v14 = vrot.slane %v4491_v1, 2  ;;  %v4487_v58 = vrot.slane %v4486_v19, 1  ;;  %12717 = vst [vmem:[#allocation108_spill] sm:$0xff] %v10910_v63 }
 0x67f   : > { %v10750_v4 = vsub.f32 %v12689_v10, %v4582_v31 }
 0x680   : > { %v4481_v17 = vadd.f32 %v4480_v46, %v4479_v38  ;;  %v12692_v38 = vsel %vm10470_vm3, %v10466_v55, 0.0  ;;  %v12694_v46 = vld [vmem:[#allocation76_spill] sm:$0xff]  ;;  %v4488_v55 = vadd.f32 %v4487_v58, %v4486_v19  ;;  %v12700_v58 = vsel %vm10523_vm5, %v10519_v9, 0.0 }
 0x681   : > { %12690 = vst [vmem:[#allocation19_spill] sm:$0xff] %v10750_v4  ;;  %v4612_v15 = vrot.slane %v10750_v4, %v12688_v32  ;;  %v4496_v28 = vsel %vm1204_vm2, %v12692_v38, 0.0  ;;  %v10902_v4 = vld [vmem:[%s9447_s16 + $0x20] sm:$0xff] }
 0x682   : > { %v4583_v47 = vmul.f32 0.1, %v4481_v17  ;;  %v4497_v10 = vrot.slane %v4496_v28, 4  ;;  %v12696_v17 = vsel %vm10486_vm4, %v10484_v35, 0.0  ;;  %v4584_v38 = vmul.f32 0.1, %v4488_v55 }
 0x683   : > { %v4503_v56 = vsel %vm1204_vm2, %v12696_v17, 0.0  ;;  %vm12432_vm4 = vcmask 1046534  }
 0x684   : > { %v10768_v25 = vsub.f32 %v12694_v46, %v4583_v47 }
 0x686   : > { %12695 = vst [vmem:[#allocation76_spill] sm:$0xff] %v10768_v25 }
 0x711   : > { %v4711_v37 = vpop.f32.mrb[48].mxu0 }
 0x712   : > { %v10752_v11 = vadd.f32 %v4711_v37, %v4608_v59  ;;  %v8600_v26 = vpop.f32.mrb[49].mxu0  ;;  %v4493_v59 = vadd.f32 %v4492_v14, %v4491_v1  ;;  %v4504_v37 = vrot.slane %v4503_v56, 4 }
 0x713   : > { %v4616_v26 = vrot.slane %v10768_v25, %v12688_v32 }
 0x714   : > { %12691 = vst [vmem:[#allocation74_spill] sm:$0xff] %v10752_v11  ;;  %v5205_v30 = vsel %vm1204_vm2, %v10752_v11, -inf  ;;  %v4505_v14 = vadd.f32 %v4504_v37, %v4503_v56 }
 0x715   : > { %5206 = vmax.xlane.f32.xlu0 %v5205_v30  ;;  %v4498_v30 = vadd.f32 %v4497_v10, %v4496_v28  ;;  %v4510_v28 = vsel %vm1204_vm2, %v12700_v58, 0.0 }
 0x716   : > { %v4781_v23 = vpop.f32.mrb[48].mxu1  ;;  %v4506_v46 = vrot.slane %v4505_v14, 2  ;;  %v4511_v17 = vrot.slane %v4510_v28, 4 }
 0x717   : > { %v10763_v51 = vadd.f32 %v4781_v23, %v4612_v15  ;;  %v8611_v18 = vpop.f32.mrb[49].mxu1  ;;  %v4494_v15 = vrot.slane %v4493_v59, 1 }
 0x718   : > { %v4499_v18 = vrot.slane %v4498_v30, 2  ;;  %v4512_v54 = vadd.f32 %v4511_v17, %v4510_v28 }
 0x719   : > { %12693 = vst [vmem:[#allocation72_spill] sm:$0xff] %v10763_v51  ;;  %v5208_v31 = vsel %vm1204_vm2, %v10763_v51, -inf  ;;  %v4495_v35 = vadd.f32 %v4494_v15, %v4493_v59  ;;  %v12702_v15 = vld [vmem:[#allocation80_spill] sm:$0xff] }
 0x71a   : > { %5209 = vmax.xlane.f32.xlu1 %v5208_v31  ;;  %v12698_v31 = vld [vmem:[#allocation78_spill] sm:$0xff]  ;;  %v4500_v55 = vadd.f32 %v4499_v18, %v4498_v30 }
 0x71b   : > { %v10782_v19 = vsub.f32 %v12698_v31, %v4584_v38  ;;  %v4585_v10 = vmul.f32 0.1, %v4495_v35  ;;  %v4507_v38 = vadd.f32 %v4506_v46, %v4505_v14  ;;  %v4513_v31 = vrot.slane %v4512_v54, 2 }
 0x71c   : > { %v4851_v23 = vpop.f32.mrb[50].mxu0 }
 0x71d   : > { %v10777_v47 = vadd.f32 %v4851_v23, %v4616_v26  ;;  %v8622_v1 = vpop.f32.mrb[51].mxu0  ;;  %12699 = vst [vmem:[#allocation78_spill] sm:$0xff] %v10782_v19  ;;  %v4620_v56 = vrot.slane %v10782_v19, %v12688_v32  ;;  %v10794_v23 = vsub.f32 %v12702_v15, %v4585_v10  ;;  %v4508_v35 = vrot.slane %v4507_v38, 1 }
 0x71e   : > { %v4501_v1 = vrot.slane %v4500_v55, 1  ;;  %v4514_v46 = vadd.f32 %v4513_v31, %v4512_v54 }
 0x71f   : > { %12697 = vst [vmem:[#allocation99_spill] sm:$0xff] %v10777_v47  ;;  %v5211_v60 = vsel %vm1204_vm2, %v10777_v47, -inf  ;;  %12703 = vst [vmem:[#allocation80_spill] sm:$0xff] %v10794_v23  ;;  %v4509_v14 = vadd.f32 %v4508_v35, %v4507_v38 }
 0x720   : > { %5212 = vmax.xlane.f32.xlu0 %v5211_v60  ;;  %v4624_v60 = vrot.slane %v10794_v23, %v12688_v32  ;;  %v4502_v18 = vadd.f32 %v4501_v1, %v4500_v55  ;;  %v4515_v15 = vrot.slane %v4514_v46, 1 }
 0x721   : > { %v4587_v17 = vmul.f32 0.1, %v4509_v14 }
 0x722   : > { %v4586_v28 = vmul.f32 0.1, %v4502_v18  ;;  %v4516_v1 = vadd.f32 %v4515_v15, %v4514_v46 }
 0x724   : > { %v4588_v31 = vmul.f32 0.1, %v4516_v1 }
 0x726   : > { %v4921_v37 = vpop.f32.mrb[50].mxu1 }
 0x727   : > { %v10791_v59 = vadd.f32 %v4921_v37, %v4620_v56  ;;  %v8633_v26 = vpop.f32.mrb[51].mxu1  ;;  %v12705_v37 = vld [vmem:[#allocation82_spill] sm:$0xff] }
 0x728   : > { %v10805_v26 = vsub.f32 %v12705_v37, %v4586_v28  ;;  %v12711_v28 = vld [vmem:[#allocation86_spill] sm:$0xff] }
 0x729   : > { %12701 = vst [vmem:[#allocation100_spill] sm:$0xff] %v10791_v59  ;;  %v5214_v9 = vsel %vm1204_vm2, %v10791_v59, -inf  ;;  %v10823_v46 = vsub.f32 %v12711_v28, %v4588_v31 }
 0x72a   : > { %5215 = vmax.xlane.f32.xlu1 %v5214_v9  ;;  %12706 = vst [vmem:[#allocation82_spill] sm:$0xff] %v10805_v26  ;;  %v12707_v9 = vld [vmem:[#allocation84_spill] sm:$0xff]  ;;  %v4628_v55 = vrot.slane %v10805_v26, %v12688_v32 }
 0x72b   : > { %v10808_v23 = vsub.f32 %v12707_v9, %v4587_v17  ;;  %12712 = vst [vmem:[#allocation86_spill] sm:$0xff] %v10823_v46  ;;  %v4636_v17 = vrot.slane %v10823_v46, %v12688_v32  ;;  %v10870_v46 = vld [vmem:[%s9447_s16 + $0x8] sm:$0xff] }
 0x72c   : > { %v4991_v30 = vpop.f32.mrb[52].mxu0 }
 0x72d   : > { %v10800_v58 = vadd.f32 %v4991_v30, %v4624_v60  ;;  %v8644_v56 = vpop.f32.mrb[53].mxu0  ;;  %12708 = vst [vmem:[#allocation84_spill] sm:$0xff] %v10808_v23  ;;  %v4632_v38 = vrot.slane %v10808_v23, %v12688_v32  ;;  %v5318_v23 = vmul.f32 %v10870_v46, %v10763_v51 }
 0x72f   : > { %12704 = vst [vmem:[#allocation101_spill] sm:$0xff] %v10800_v58  ;;  %v5217_v10 = vsel %vm1204_vm2, %v10800_v58, -inf  ;;  %v5328_v19 = vsel %vm1204_vm2, %v5318_v23, 0.0 }
 0x730   : > { %5218 = vmax.xlane.f32.xlu0 %v5217_v10 }
 0x73b   : > { %v5061_v60 = vpop.f32.mrb[52].mxu1 }
 0x73c   : > { %v10812_v30 = vadd.f32 %v5061_v60, %v4628_v55  ;;  %v8655_v56 = vpop.f32.mrb[53].mxu1 }
 0x73d   : > { %v5131_v54 = vpop.f32.mrb[54].mxu0 }
 0x73e   : > { %12709 = vst [vmem:[#allocation102_spill] sm:$0xff] %v10812_v30  ;;  %v5220_v35 = vsel %vm1204_vm2, %v10812_v30, -inf  ;;  %v10818_v18 = vadd.f32 %v5131_v54, %v4632_v38  ;;  %v8666_v10 = vpop.f32.mrb[55].mxu0 }
 0x73f   : > { %5221 = vmax.xlane.f32.xlu1 %v5220_v35 }
 0x740   : > { %12710 = vst [vmem:[#allocation103_spill] sm:$0xff] %v10818_v18  ;;  %v5223_v14 = vsel %vm1204_vm2, %v10818_v18, -inf  ;;  %v5323_v48 = vmul.f32 %v10910_v63, %v10818_v18 }
 0x741   : > { %5224 = vmax.xlane.f32.xlu0 %v5223_v14 }
 0x746   : > { %v5201_v37 = vpop.f32.mrb[54].mxu1 }
 0x747   : > { %v10827_v15 = vadd.f32 %v5201_v37, %v4636_v17  ;;  %v8677_v9 = vpop.f32.mrb[55].mxu1 }
 0x749   : > { %12713 = vst [vmem:[#allocation104_spill] sm:$0xff] %v10827_v15  ;;  %v5226_v55 = vsel %vm1204_vm2, %v10827_v15, -inf }
 0x74a   : > { %5227 = vmax.xlane.f32.xlu1 %v5226_v55 }
 0x7a2   : > { %v10831_v1 = vpop.xlane.xlu0 %5206 }
 0x7a3   : > { %12714 = vst [vmem:[#allocation105_spill] sm:$0xff] %v10831_v1  ;;  %v5229_v60 = vsub.f32 %v10752_v11, %v10831_v1 }
 0x7a5   : > { %v5237_v56 = vmul.f32 1.442695, %v5229_v60 }
 0x7a7   : > { %v10835_v38 = vpop.xlane.xlu1 %5209  ;;  %9129 = vpow2.f32 %v5237_v56 }
 0x7a8   : > { %12715 = vst [vmem:[#allocation106_spill] sm:$0xff] %v10835_v38  ;;  %v5230_v54 = vsub.f32 %v10763_v51, %v10835_v38  ;;  %v10886_v51 = vld [vmem:[%s9447_s16 + $0x18] sm:$0xff] }
 0x7aa   : > { %v5239_v35 = vmul.f32 1.442695, %v5230_v54 }
 0x7ac   : > { %9131 = vpow2.f32 %v5239_v35 }
 0x7ad   : > { %v10839_v31 = vpop.xlane.xlu0 %5212 }
 0x7ae   : > { %12716 = vst [vmem:[#allocation107_spill] sm:$0xff] %v10839_v31  ;;  %v5231_v10 = vsub.f32 %v10777_v47, %v10839_v31 }
 0x7b0   : > { %v5241_v28 = vmul.f32 1.442695, %v5231_v10 }
 0x7b1   : > { %v10843_v14 = vpop.eup %9129 }
 0x7b2   : > { %v5253_v17 = vsel %vm1204_vm2, %v10843_v14, 0.0  ;;  %9133 = vpow2.f32 %v5241_v28  ;;  %v10862_v28 = vld [vmem:[%s9447_s16] sm:$0xff] }
 0x7b3   : > { %5254 = vadd.xlane.f32.xlu0 %v5253_v17  ;;  %v5317_v17 = vmul.f32 %v10862_v28, %v10752_v11  ;;  %v10878_v11 = vld [vmem:[%s9447_s16 + $0x10] sm:$0xff] }
 0x7b6   : > { %v10847_v37 = vpop.eup %9131 }
 0x7b7   : > { %v5256_v9 = vsel %vm1204_vm2, %v10847_v37, 0.0  ;;  %v10851_v55 = vpop.xlane.xlu1 %5215 }
 0x7b8   : > { %5257 = vadd.xlane.f32.xlu1 %v5256_v9  ;;  %v5232_v60 = vsub.f32 %v10791_v59, %v10851_v55 }
 0x7ba   : > { %v5243_v56 = vmul.f32 1.442695, %v5232_v60 }
 0x7bc   : > { %9135 = vpow2.f32 %v5243_v56  ;;  %v10855_v54 = vpop.eup %9133  ;;  %v5325_v56 = vsel %vm1204_vm2, %v5317_v17, 0.0 }
 0x7bd   : > { %v10857_v35 = vpop.xlane.xlu0 %5218  ;;  %v5259_v10 = vsel %vm1204_vm2, %v10855_v54, 0.0 }
 0x7be   : > { %v5233_v9 = vsub.f32 %v10800_v58, %v10857_v35  ;;  %5260 = vadd.xlane.f32.xlu0 %v5259_v10  ;;  %v5319_v10 = vmul.f32 %v10878_v11, %v10777_v47 }
 0x7c0   : > { %v5245_v60 = vmul.f32 1.442695, %v5233_v9  ;;  %v5331_v9 = vsel %vm1204_vm2, %v5319_v10, 0.0 }
 0x7c2   : > { %9137 = vpow2.f32 %v5245_v60  ;;  %5326 = vadd.xlane.f32.xlu0 %v5325_v56  ;;  %v5320_v60 = vmul.f32 %v10886_v51, %v10791_v59 }
 0x7c6   : > { %v10874_v26 = vpop.eup %9135  ;;  %5329 = vadd.xlane.f32.xlu0 %v5328_v19 }
 0x7c7   : > { %v5262_v17 = vsel %vm1204_vm2, %v10874_v26, 0.0 }
 0x7c8   : > { %5263 = vadd.xlane.f32.xlu1 %v5262_v17  ;;  %v5334_v17 = vsel %vm1204_vm2, %v5320_v60, 0.0  ;;  %v5343_v60 = vsel %vm1204_vm2, %v5323_v48, 0.0 }
 0x7ca   : > { %5332 = vadd.xlane.f32.xlu0 %v5331_v9  ;;  %v5321_v9 = vmul.f32 %v10902_v4, %v10800_v58 }
 0x7cc   : > { %v10890_v23 = vpop.xlane.xlu1 %5221  ;;  %v10894_v47 = vpop.eup %9137 }
 0x7cd   : > { %v5234_v56 = vsub.f32 %v10812_v30, %v10890_v23  ;;  %v5265_v10 = vsel %vm1204_vm2, %v10894_v47, 0.0 }
 0x7ce   : > { %v10896_v25 = vpop.xlane.xlu0 %5224  ;;  %5266 = vadd.xlane.f32.xlu1 %v5265_v10  ;;  %5335 = vadd.xlane.f32.xlu0 %v5334_v17 }
 0x7cf   : > { %v5247_v19 = vmul.f32 1.442695, %v5234_v56  ;;  %v5235_v59 = vsub.f32 %v10818_v18, %v10896_v25  ;;  %v5337_v56 = vsel %vm1204_vm2, %v5321_v9, 0.0 }
 0x7d1   : > { %9139 = vpow2.f32 %v5247_v19  ;;  %v5249_v32 = vmul.f32 1.442695, %v5235_v59 }
 0x7d2   : > { %5338 = vadd.xlane.f32.xlu0 %v5337_v56 }
 0x7d3   : > { %9141 = vpow2.f32 %v5249_v32 }
 0x7d6   : > { %5344 = vadd.xlane.f32.xlu0 %v5343_v60  ;;  %v10932_v60 = vld [vmem:[%s9447_s16 + $0x28] sm:$0xff] }
 0x7d7   : > { %v10915_v58 = vpop.xlane.xlu1 %5227  ;;  %12720 = vst [vmem:[#allocation111_spill] sm:$0xff] %v10932_v60 }
 0x7d8   : > { %v5236_v19 = vsub.f32 %v10827_v15, %v10915_v58 }
 0x7da   : > { %v5251_v10 = vmul.f32 1.442695, %v5236_v19  ;;  %v5322_v19 = vmul.f32 %v10932_v60, %v10812_v30 }
 0x7db   : > { %v10919_v59 = vpop.eup %9139 }
 0x7dc   : > { %v5268_v17 = vsel %vm1204_vm2, %v10919_v59, 0.0  ;;  %9143 = vpow2.f32 %v5251_v10  ;;  %v5340_v10 = vsel %vm1204_vm2, %v5322_v19, 0.0 }
 0x7dd   : > { %5269 = vadd.xlane.f32.xlu1 %v5268_v17  ;;  %v10923_v32 = vpop.eup %9141  ;;  %v10938_v17 = vld [vmem:[%s9447_s16 + $0x38] sm:$0xff] }
 0x7de   : > { %12718 = vst [vmem:[#allocation109_spill] sm:$0xff] %v10923_v32  ;;  %v5271_v48 = vsel %vm1204_vm2, %v10923_v32, 0.0  ;;  %12721 = vst [vmem:[#allocation112_spill] sm:$0xff] %v10938_v17  ;;  %v5324_v18 = vmul.f32 %v10938_v17, %v10827_v15 }
 0x7e1   : > { %5272 = vadd.xlane.f32.xlu1 %v5271_v48  ;;  %v5346_v48 = vsel %vm1204_vm2, %v5324_v18, 0.0 }
 0x7e6   : > { %v10927_v9 = vpop.eup %9143 }
 0x7e7   : > { %12719 = vst [vmem:[#allocation110_spill] sm:$0xff] %v10927_v9  ;;  %v5274_v56 = vsel %vm1204_vm2, %v10927_v9, 0.0 }
 0x7e8   : > { %5275 = vadd.xlane.f32.xlu1 %v5274_v56 }
 0x7ec   : > { %5341 = vadd.xlane.f32.xlu1 %v5340_v10 }
 0x7f0   : > { %5347 = vadd.xlane.f32.xlu1 %v5346_v48 }
 0x840   : > { %v5255_v5 = vpop.xlane.xlu0 %5254 }
 0x841   : > { %9145 = vlog2.f32 %v5255_v5 }
 0x845   : > { %v5258_v39 = vpop.xlane.xlu1 %5257 }
 0x846   : > { %9147 = vlog2.f32 %v5258_v39 }
 0x847   : > { %9149 = vrcp.f32 %v5255_v5 }
 0x84b   : > { %v9146_v6 = vpop.eup %9145  ;;  %v5261_v2 = vpop.xlane.xlu0 %5260 }
 0x84c   : > { %v5294_v30 = vmul.f32 0.6931472, %v9146_v6  ;;  %9151 = vlog2.f32 %v5261_v2 }
 0x84d   : > { %9153 = vrcp.f32 %v5258_v39 }
 0x84e   : > { %v5309_v56 = vadd.f32 %v5294_v30, %v10831_v1 }
 0x84f   : > { %v5327_v27 = vpop.xlane.xlu0 %5326 }
 0x850   : > { %v9148_v19 = vpop.eup %9147  ;;  %v5349_v0 = vsub.f32 %v5309_v56, %v5327_v27 }
 0x851   : > { %v5296_v15 = vmul.f32 0.6931472, %v9148_v19  ;;  %v9150_v63 = vpop.eup %9149 }
 0x852   : > { %v5357_v10 = vrot.slane %v5349_v0, 4  ;;  %v5285_v39 = vmul.f32 %v9150_v63, %v10843_v14 }
 0x853   : > { %v5310_v18 = vadd.f32 %v5296_v15, %v10835_v38  ;;  %v5330_v48 = vpop.xlane.xlu0 %5329 }
 0x854   : > { %v5358_v33 = vadd.f32 %v5357_v10, %v5349_v0  ;;  %v5661_v32 = vsub.f32 %v5285_v39, %v10862_v28  ;;  %v12723_v39 = vld [vmem:[#allocation21_spill] sm:$0xff] }
 0x855   : > { %v5350_v17 = vsub.f32 %v5310_v18, %v5330_v48  ;;  %v5264_v9 = vpop.xlane.xlu1 %5263 }
 0x856   : > { %v5359_v24 = vrot.slane %v5358_v33, 2  ;;  %9155 = vlog2.f32 %v5264_v9  ;;  %v9152_v6 = vpop.eup %9151 }
 0x857   : > { %v5363_v60 = vrot.slane %v5350_v17, 4  ;;  %9157 = vrcp.f32 %v5261_v2  ;;  %v5298_v1 = vmul.f32 0.6931472, %v9152_v6  ;;  %v9154_v27 = vpop.eup %9153  ;;  %v5333_v38 = vpop.xlane.xlu0 %5332 }
 0x858   : > { %v5360_v5 = vadd.f32 %v5359_v24, %v5358_v33  ;;  %v5286_v2 = vmul.f32 %v9154_v27, %v10847_v37  ;;  %v12722_v24 = vld [vmem:[#allocation20_spill] sm:$0xff]  ;;  %v3726_v37 = vadd.f32 %v10327_v8, %v12723_v39 }
 0x859   : > { %v5364_v30 = vadd.f32 %v5363_v60, %v5350_v17  ;;  %v5311_v15 = vadd.f32 %v5298_v1, %v10839_v31  ;;  %v3725_v33 = vadd.f32 %v10317_v41, %v12722_v24 }
 0x85a   : > { %v5361_v56 = vrot.slane %v5360_v5, 1 }
 0x85b   : > { %v5365_v19 = vrot.slane %v5364_v30, 2  ;;  %v5267_v0 = vpop.xlane.xlu1 %5266  ;;  %v5351_v18 = vsub.f32 %v5311_v15, %v5333_v38  ;;  %v10951_v38 = vmul.f32 0.125, %v5661_v32  ;;  %v5336_v32 = vpop.xlane.xlu0 %5335 }
 0x85c   : > { %v5362_v48 = vadd.f32 %v5361_v56, %v5360_v5  ;;  %9159 = vlog2.f32 %v5267_v0  ;;  %v5662_v5 = vsub.f32 %v5286_v2, %v10870_v46 }
 0x85d   : > { %v5366_v10 = vadd.f32 %v5365_v19, %v5364_v30  ;;  %v5369_v63 = vrot.slane %v5351_v18, 4  ;;  %9161 = vrcp.f32 %v5264_v9 }
 0x85e   : > { %v5405_v14 = vmul.f32 0.125, %v5362_v48  ;;  %9163 = vrcp.f32 %v5267_v0  ;;  %v12728_v0 = vld [vmem:[#allocation22_spill] sm:$0xff] }
 0x85f   : > { %v5367_v60 = vrot.slane %v5366_v10, 1  ;;  %v5370_v6 = vadd.f32 %v5369_v63, %v5351_v18 }
 0x860   : > { %v9156_v17 = vpop.eup %9155  ;;  %v5677_v1 = vadd.f32 %v5405_v14, %v3725_v33  ;;  %v5693_v31 = vand.u32 2147483647, %v5405_v14 }
 0x861   : > { %v5368_v53 = vadd.f32 %v5367_v60, %v5366_v10  ;;  %v5300_v30 = vmul.f32 0.6931472, %v9156_v17  ;;  %v9158_v28 = vpop.eup %9157  ;;  %v5371_v27 = vrot.slane %v5370_v6, 2 }
 0x862   : > { %vm10956_vm6 = vcmp.lt.f32.partialorder %v5693_v31, inf  ;;  %v5287_v10 = vmul.f32 %v9158_v28, %v10855_v54  ;;  %v7621_v48 = vmul.f32 0.33333334, %v5677_v1 }
 0x863   : > { %v5406_v9 = vmul.f32 0.125, %v5368_v53  ;;  %v5312_v56 = vadd.f32 %v5300_v30, %v10851_v55  ;;  %v5725_v19 = vsel %vm10956_vm6, %v10951_v38, 0.0  ;;  %8678 = vmatprep.subr.msk.mxu0 %vm10956_vm6, %v10951_v38  ;;  %v5372_v46 = vadd.f32 %v5371_v27, %v5370_v6 }
 0x864   : > { %8679 = vmatpush3.msk.msra.mxu0 %vm10956_vm6, %v10951_v38  ;;  %v10972_v53 = vmul.f32 0.125, %v5662_v5  ;;  %v5663_v1 = vsub.f32 %v5287_v10, %v10878_v11  ;;  %v3727_v30 = vadd.f32 %v10370_v16, %v12728_v0 }
 0x865   : > { %v5678_v8 = vadd.f32 %v5406_v9, %v3726_v37  ;;  %v5694_v31 = vand.u32 2147483647, %v5406_v9  ;;  %v5352_v15 = vsub.f32 %v5312_v56, %v5336_v32  ;;  %8681 = vmatmul.mubr.msk.f32.vlgmr.msra.gmra.mrb[56].mxu0 %vm1204_vm2, %v9676_v57  ;;  %v5373_v18 = vrot.slane %v5372_v46, 1 }
 0x866   : > { %8683 = vmatprep.mubr.msk.f32.mxu0 %vm1204_vm2, %v9700_v45  ;;  %v9160_v33 = vpop.eup %9159  ;;  %v11005_v16 = vmul.f32 0.125, %v5663_v1 }
 0x867   : > { %vm10977_vm8 = vcmp.lt.f32.partialorder %v5694_v31, inf  ;;  %v7622_v24 = vmul.f32 0.33333334, %v5678_v8  ;;  %v5375_v60 = vrot.slane %v5352_v15, 4  ;;  %v5302_v54 = vmul.f32 0.6931472, %v9160_v33  ;;  %v9162_v17 = vpop.eup %9161 }
 0x868   : > { %v5726_v57 = vsel %vm10977_vm8, %v10972_v53, 0.0  ;;  %8686 = vmatprep.subr.msk.mxu1 %vm10977_vm8, %v10972_v53  ;;  %v5374_v14 = vadd.f32 %v5373_v18, %v5372_v46  ;;  %v5288_v56 = vmul.f32 %v9162_v17, %v10874_v26  ;;  %v9164_v31 = vpop.eup %9163  ;;  %v12731_v18 = vld [vmem:[#allocation24_spill] sm:$0xff] }
 0x869   : > { %v7689_v63 = vsel %vm7646_vm7, %v7622_v24, %v7621_v48  ;;  %8687 = vmatpush3.msk.msra.mxu1 %vm10977_vm8, %v10972_v53  ;;  %v5376_v6 = vadd.f32 %v5375_v60, %v5352_v15  ;;  %8684 = vmatmul.mubr.msk.f32.gmra.mrb[58].mxu0 %vm1204_vm2, %v9724_v44  ;;  %v5313_v5 = vadd.f32 %v5302_v54, %v10857_v35  ;;  %v5339_v44 = vpop.xlane.xlu0 %5338 }
 0x86a   : > { %v5270_v45 = vpop.xlane.xlu1 %5269  ;;  %8689 = vmatmul.mubr.msk.f32.vlgmr.msra.gmra.mrb[56].mxu1 %vm1204_vm2, %v9581_v62  ;;  %8696 = vmatprep.mubr.msk.f32.mxu0 %vm1204_vm2, %v9745_v52  ;;  %v5407_v28 = vmul.f32 0.125, %v5374_v14  ;;  %v5664_v10 = vsub.f32 %v5288_v56, %v10886_v51  ;;  %v3728_v48 = vadd.f32 %v10398_v21, %v12731_v18  ;;  %v5289_v14 = vmul.f32 %v9164_v31, %v10894_v47  ;;  %v12800_v51 = vld [vmem:[#allocation71_spill] sm:$0xff] }
 0x86b   : > { %9165 = vlog2.f32 %v5270_v45  ;;  %8691 = vmatprep.mubr.msk.f32.mxu1 %vm1204_vm2, %v9583_v7  ;;  %v5377_v39 = vrot.slane %v5376_v6, 2  ;;  %v5353_v37 = vsub.f32 %v5313_v5, %v5339_v44 }
 0x86c   : > { %v5679_v62 = vadd.f32 %v5407_v28, %v3727_v30  ;;  %v5695_v9 = vand.u32 2147483647, %v5407_v28  ;;  %v5665_v5 = vsub.f32 %v5289_v14, %v10902_v4  ;;  %v12734_v28 = vld [vmem:[#allocation25_spill] sm:$0xff] }
 0x86d   : > { %v5378_v11 = vadd.f32 %v5377_v39, %v5376_v6  ;;  %v5381_v7 = vrot.slane %v5353_v37, 4  ;;  %v3729_v39 = vadd.f32 %v10426_v34, %v12734_v28  ;;  %v12738_v14 = vld [vmem:[#allocation109_spill] sm:$0xff]  ;;  %v12743_v28 = vld [vmem:[#allocation98_spill] sm:$0xff] }
 0x86e   : > { %v5273_v27 = vpop.xlane.xlu1 %5272  ;;  %8692 = vmatmul.mubr.msk.f32.gmra.mrb[58].mxu1 %vm1204_vm2, %v9585_v20  ;;  %vm11008_vm10 = vcmp.lt.f32.partialorder %v5695_v9, inf  ;;  %v7623_v46 = vmul.f32 0.33333334, %v5679_v62 }
 0x86f   : > { %9167 = vlog2.f32 %v5273_v27  ;;  %8704 = vmatprep.mubr.msk.f32.mxu1 %vm1204_vm2, %v9784_v36  ;;  %v5379_v32 = vrot.slane %v5378_v11, 1  ;;  %v5727_v20 = vsel %vm11008_vm10, %v11005_v16, 0.0  ;;  %8694 = vmatprep.subr.msk.mxu0 %vm11008_vm10, %v11005_v16  ;;  %v5382_v26 = vadd.f32 %v5381_v7, %v5353_v37 }
 0x870   : > { %v7690_v8 = vsel %vm7648_vm9, %v7623_v46, %v7689_v63  ;;  %8695 = vmatpush3.msk.msra.mxu0 %vm11008_vm10, %v11005_v16  ;;  %9169 = vrcp.f32 %v5270_v45  ;;  %v11061_v46 = vmul.f32 0.125, %v5665_v5  ;;  %v12742_v5 = vld [vmem:[#allocation27_spill] sm:$0xff]  ;;  %v6427_v41 = vsel %vm1204_vm2, %v5727_v20, 0.0 }
 0x871   : > { %8697 = vmatmul.mubr.msk.f32.vlgmr.msra.gmra.mrb[60].mxu0 %vm1204_vm2, %v9762_v22  ;;  %v5380_v36 = vadd.f32 %v5379_v32, %v5378_v11  ;;  %v5383_v15 = vrot.slane %v5382_v26, 2 }
 0x872   : > { %8699 = vmatprep.mubr.msk.f32.mxu0 %vm1204_vm2, %v9782_v43  ;;  %v11036_v43 = vmul.f32 0.125, %v5664_v10 }
 0x873   : > { %v5408_v24 = vmul.f32 0.125, %v5380_v36  ;;  %v5384_v60 = vadd.f32 %v5383_v15, %v5382_v26 }
 0x875   : > { %v9166_v33 = vpop.eup %9165  ;;  %v5276_v54 = vpop.xlane.xlu1 %5275  ;;  %8700 = vmatmul.mubr.msk.f32.gmra.mrb[62].mxu0 %vm1204_vm2, %v9790_v13  ;;  %v5680_v22 = vadd.f32 %v5408_v24, %v3728_v48  ;;  %v5696_v63 = vand.u32 2147483647, %v5408_v24  ;;  %v5385_v17 = vrot.slane %v5384_v60, 1 }
 0x876   : > { %9171 = vlog2.f32 %v5276_v54  ;;  %8712 = vmatprep.mubr.msk.f32.mxu0 %vm1204_vm2, %v9804_v49  ;;  %v5304_v21 = vmul.f32 0.6931472, %v9166_v33 }
 0x877   : > { %vm11038_vm12 = vcmp.lt.f32.partialorder %v5696_v63, inf  ;;  %v7624_v45 = vmul.f32 0.33333334, %v5680_v22  ;;  %v5386_v1 = vadd.f32 %v5385_v17, %v5384_v60  ;;  %9173 = vrcp.f32 %v5273_v27  ;;  %v5345_v27 = vpop.xlane.xlu0 %5344  ;;  %v12737_v63 = vld [vmem:[#allocation30_spill] sm:$0xff] }
 0x878   : > { %v5728_v13 = vsel %vm11038_vm12, %v11036_v43, 0.0  ;;  %8702 = vmatprep.subr.msk.mxu1 %vm11038_vm12, %v11036_v43  ;;  %v5314_v47 = vadd.f32 %v5304_v21, %v10890_v23  ;;  %9175 = vrcp.f32 %v5276_v54  ;;  %v12739_v21 = vld [vmem:[#allocation111_spill] sm:$0xff] }
 0x879   : > { %v9168_v6 = vpop.eup %9167  ;;  %v5342_v49 = vpop.xlane.xlu1 %5341  ;;  %v7691_v30 = vsel %vm7650_vm11, %v7624_v45, %v7690_v8  ;;  %8703 = vmatpush3.msk.msra.mxu1 %vm11038_vm12, %v11036_v43  ;;  %v5409_v37 = vmul.f32 0.125, %v5386_v1  ;;  %v6434_v53 = vsel %vm1204_vm2, %v5728_v13, 0.0 }
 0x87a   : > { %v5306_v0 = vmul.f32 0.6931472, %v9168_v6  ;;  %v5354_v44 = vsub.f32 %v5314_v47, %v5342_v49  ;;  %8705 = vmatmul.mubr.msk.f32.vlgmr.msra.gmra.mrb[60].mxu1 %vm1204_vm2, %v9794_v50  ;;  %v9170_v32 = vpop.eup %9169  ;;  %v12740_v47 = vld [vmem:[#allocation26_spill] sm:$0xff]  ;;  %v6435_v52 = vrot.slane %v6434_v53, 4 }
 0x87b   : > { %8707 = vmatprep.mubr.msk.f32.mxu1 %vm1204_vm2, %v9806_v40  ;;  %v5681_v11 = vadd.f32 %v5409_v37, %v3729_v39  ;;  %v5697_v56 = vand.u32 2147483647, %v5409_v37  ;;  %v5290_v48 = vmul.f32 %v9170_v32, %v10919_v59  ;;  %v12741_v59 = vld [vmem:[#allocation97_spill] sm:$0xff]  ;;  %v12744_v37 = vld [vmem:[#allocation108_spill] sm:$0xff] }
 0x87c   : > { %v5315_v62 = vadd.f32 %v5306_v0, %v10896_v25  ;;  %v5387_v9 = vrot.slane %v5354_v44, 4  ;;  %v3730_v49 = vadd.f32 %v12741_v59, %v12740_v47  ;;  %v12759_v59 = vld [vmem:[#allocation35_spill] sm:$0xff]  ;;  %v6436_v20 = vadd.f32 %v6435_v52, %v6434_v53 }
 0x87d   : > { %vm11065_vm14 = vcmp.lt.f32.partialorder %v5697_v56, inf  ;;  %v7625_v34 = vmul.f32 0.33333334, %v5681_v11  ;;  %v5348_v60 = vpop.xlane.xlu1 %5347  ;;  %v5666_v45 = vsub.f32 %v5290_v48, %v12739_v21  ;;  %v12804_v48 = vld [vmem:[#allocation78_spill] sm:$0xff] }
 0x87e   : > { %v5355_v7 = vsub.f32 %v5315_v62, %v5345_v27  ;;  %v5388_v4 = vadd.f32 %v5387_v9, %v5354_v44  ;;  %8708 = vmatmul.mubr.msk.f32.gmra.mrb[62].mxu1 %vm1204_vm2, %v9816_v61  ;;  %v5729_v40 = vsel %vm11065_vm14, %v11061_v46, 0.0  ;;  %8710 = vmatprep.subr.msk.mxu0 %vm11065_vm14, %v11061_v46  ;;  %v6437_v13 = vrot.slane %v6436_v20, 2 }
 0x87f   : > { %8720 = vmatprep.mubr.msk.f32.mxu1 %vm1204_vm2, %v9826_v29  ;;  %v7692_v36 = vsel %vm7652_vm13, %v7625_v34, %v7691_v30  ;;  %8711 = vmatpush3.msk.msra.mxu0 %vm11065_vm14, %v11061_v46  ;;  %v11098_v11 = vmul.f32 0.125, %v5666_v45  ;;  %v12757_v45 = vld [vmem:[#allocation33_spill] sm:$0xff] }
 0x880   : > { %v5393_v26 = vrot.slane %v5355_v7, 4  ;;  %v9172_v8 = vpop.eup %9171  ;;  %v5389_v61 = vrot.slane %v5388_v4, 2  ;;  %8713 = vmatmul.mubr.msk.f32.vlgmr.msra.gmra.mrb[64].mxu0 %vm1204_vm2, %v9812_v3 }
 0x881   : > { %v5308_v31 = vmul.f32 0.6931472, %v9172_v8  ;;  %8715 = vmatprep.mubr.msk.f32.mxu0 %vm1204_vm2, %v9824_v12  ;;  %v9174_v18 = vpop.eup %9173 }
 0x882   : > { %v5394_v15 = vadd.f32 %v5393_v26, %v5355_v7  ;;  %v5390_v10 = vadd.f32 %v5389_v61, %v5388_v4  ;;  %v5291_v17 = vmul.f32 %v9174_v18, %v12738_v14  ;;  %v9176_v27 = vpop.eup %9175  ;;  %v12754_v14 = vmov 0.0|0.0  }
 0x883   : > { %v5316_v29 = vadd.f32 %v5308_v31, %v10915_v58 }
 0x884   : > { %v5395_v24 = vrot.slane %v5394_v15, 2  ;;  %v5391_v33 = vrot.slane %v5390_v10, 1  ;;  %8716 = vmatmul.mubr.msk.f32.gmra.mrb[66].mxu0 %vm1204_vm2, %v9832_v42  ;;  %v3731_v42 = vadd.f32 %v12743_v28, %v12742_v5  ;;  %v5667_v62 = vsub.f32 %v5291_v17, %v12744_v37  ;;  %v12755_v17 = vld [vmem:[#allocation28_spill] sm:$0xff]  ;;  %v12765_v37 = vld [vmem:[#allocation37_spill] sm:$0xff] }
 0x885   : > { %v5356_v22 = vsub.f32 %v5316_v29, %v5348_v60  ;;  %8728 = vmatprep.mubr.msk.f32.mxu0 %vm1204_vm2, %v12737_v63  ;;  %v12748_v29 = vld [vmem:[#allocation29_spill] sm:$0xff]  ;;  %v12753_v63 = vld [vmem:[#allocation112_spill] sm:$0xff] }
 0x886   : > { %v5396_v54 = vadd.f32 %v5395_v24, %v5394_v15  ;;  %v5392_v3 = vadd.f32 %v5391_v33, %v5390_v10  ;;  %v11114_v31 = vmul.f32 0.125, %v5667_v62  ;;  %v12747_v15 = vld [vmem:[#allocation110_spill] sm:$0xff]  ;;  %v12751_v33 = vld [vmem:[#allocation31_spill] sm:$0xff] }
 0x887   : > { %v5399_v12 = vrot.slane %v5356_v22, 4  ;;  %v5292_v10 = vmul.f32 %v9176_v27, %v12747_v15  ;;  %v12766_v62 = vld [vmem:[#allocation38_spill] sm:$0xff]  ;;  %v12767_v27 = vld [vmem:[#allocation39_spill] sm:$0xff] }
 0x888   : > { %v5397_v6 = vrot.slane %v5396_v54, 1  ;;  %v5410_v1 = vmul.f32 0.125, %v5392_v3 }
 0x889   : > { %v5400_v0 = vadd.f32 %v5399_v12, %v5356_v22  ;;  %v5668_v3 = vsub.f32 %v5292_v10, %v12753_v63  ;;  %v12756_v12 = vld [vmem:[#allocation96_spill] sm:$0xff] }
 0x88a   : > { %v5398_v30 = vadd.f32 %v5397_v6, %v5396_v54  ;;  %v5682_v39 = vadd.f32 %v5410_v1, %v3730_v49  ;;  %v5698_v44 = vand.u32 2147483647, %v5410_v1  ;;  %v12752_v54 = vld [vmem:[#allocation32_spill] sm:$0xff]  ;;  %v3732_v21 = vadd.f32 %v12756_v12, %v12755_v17  ;;  %v12758_v6 = vld [vmem:[#allocation34_spill] sm:$0xff] }
 0x88b   : > { %v5401_v9 = vrot.slane %v5400_v0, 2  ;;  %v12771_v12 = vld [vmem:[#allocation40_spill] sm:$0xff] }
 0x88c   : > { %v5411_v56 = vmul.f32 0.125, %v5398_v30  ;;  %vm11100_vm3 = vcmp.lt.f32.partialorder %v5698_v44, inf  ;;  %v7626_v4 = vmul.f32 0.33333334, %v5682_v39  ;;  %v11149_v30 = vmul.f32 0.125, %v5668_v3  ;;  %v12770_v3 = vld [vmem:[#allocation46_spill] sm:$0xff] }
 0x88d   : > { %v5402_v34 = vadd.f32 %v5401_v9, %v5400_v0  ;;  %v5730_v32 = vsel %vm11100_vm3, %v11098_v11, 0.0  ;;  %8718 = vmatprep.subr.msk.mxu1 %vm11100_vm3, %v11098_v11  ;;  %v12760_v0 = vld [vmem:[#allocation36_spill] sm:$0xff] }
 0x88e   : > { %v5683_v26 = vadd.f32 %v5411_v56, %v3731_v42  ;;  %v5699_v8 = vand.u32 2147483647, %v5411_v56  ;;  %v7693_v61 = vsel %vm12433_vm15, %v7626_v4, %v7692_v36  ;;  %8719 = vmatpush3.msk.msra.mxu1 %vm11100_vm3, %v11098_v11  ;;  %v12763_v42 = vmov 0.0  }
 0x88f   : > { %v5403_v18 = vrot.slane %v5402_v34, 1  ;;  %8721 = vmatmul.mubr.msk.f32.vlgmr.msra.gmra.mrb[64].mxu1 %vm1204_vm2, %v12748_v29 }
 0x890   : > { %vm11119_vm5 = vcmp.lt.f32.partialorder %v5699_v8, inf  ;;  %v7627_v24 = vmul.f32 0.33333334, %v5683_v26  ;;  %8723 = vmatprep.mubr.msk.f32.mxu1 %vm1204_vm2, %v12751_v33  ;;  %v12768_v26 = vld [vmem:[#allocation44_spill] sm:$0xff] }
 0x891   : > { %v5731_v36 = vsel %vm11119_vm5, %v11114_v31, 0.0  ;;  %8726 = vmatprep.subr.msk.mxu0 %vm11119_vm5, %v11114_v31  ;;  %v5404_v22 = vadd.f32 %v5403_v18, %v5402_v34 }
 0x892   : > { %v7694_v60 = vsel %vm12432_vm4, %v7627_v24, %v7693_v61  ;;  %8727 = vmatpush3.msk.msra.mxu0 %vm11119_vm5, %v11114_v31  ;;  %vm7658_vm4 = vcmask 1047559   ;;  %v12769_v61 = vld [vmem:[#allocation45_spill] sm:$0xff] }
 0x893   : > { %8729 = vmatmul.mubr.msk.f32.vlgmr.msra.gmra.mrb[68].mxu0 %vm1204_vm2, %v12752_v54  ;;  %8974 = vmatprep.subr.bf16.mxu0 %v12754_v14  ;;  %v5412_v47 = vmul.f32 0.125, %v5404_v22 }
 0x894   : > { %8724 = vmatmul.mubr.msk.f32.gmra.mrb[66].mxu1 %vm1204_vm2, %v12757_v45  ;;  %8731 = vmatprep.mubr.msk.f32.mxu0 %vm1204_vm2, %v12758_v6  ;;  %v12772_v45 = vld [vmem:[#allocation47_spill] sm:$0xff] }
 0x895   : > { %8736 = vmatprep.mubr.msk.f32.mxu1 %vm1204_vm2, %v12759_v59  ;;  %v5684_v49 = vadd.f32 %v5412_v47, %v3732_v21  ;;  %v5700_v1 = vand.u32 2147483647, %v5412_v47  ;;  %v12773_v47 = vld [vmem:[#allocation41_spill] sm:$0xff] }
 0x897   : > { %8732 = vmatmul.mubr.msk.f32.gmra.mrb[70].mxu0 %vm1204_vm2, %v12760_v0  ;;  %vm11151_vm15 = vcmp.lt.f32.partialorder %v5700_v1, inf  ;;  %v7628_v28 = vmul.f32 0.33333334, %v5684_v49 }
 0x898   : > { %8750 = vmatprep.mubr.msk.f32.mxu0 %vm9261_vm0, %v12763_v42  ;;  %v5732_v39 = vsel %vm11151_vm15, %v11149_v30, 0.0  ;;  %8734 = vmatprep.subr.msk.mxu1 %vm11151_vm15, %v11149_v30 }
 0x899   : > { %v11164_v44 = vsel %vm7658_vm4, %v7628_v28, %v7694_v60  ;;  %8735 = vmatpush3.msk.msra.mxu1 %vm11151_vm15, %v11149_v30 }
 0x89a   : > { %12764 = vst [vmem:[#allocation20_spill] sm:$0xff] %v11164_v44  ;;  %8737 = vmatmul.mubr.msk.f32.vlgmr.msra.gmra.mrb[68].mxu1 %vm1204_vm2, %v12765_v37  ;;  %8980 = vmatprep.subr.bf16.mxu1 %v12754_v14 }
 0x89b   : > { %8739 = vmatprep.mubr.msk.f32.mxu1 %vm1204_vm2, %v12766_v62 }
 0x89e   : > { %8740 = vmatmul.mubr.msk.f32.gmra.mrb[70].mxu1 %vm1204_vm2, %v12767_v27  ;;  %v12774_v27 = vld [vmem:[#allocation42_spill] sm:$0xff] }
 0x89f   : > { %8761 = vmatprep.mubr.msk.f32.mxu1 %vm9261_vm0, %v12763_v42 }
 0x938   : > { %v8682_v9 = vpop.f32.mrb[56].mxu0 }
 0x939   : > { %v6470_v56 = vmul.f32 0.1, %v8682_v9  ;;  %v5799_v4 = vpop.f32.mrb[57].mxu0 }
 0x93a   : > { %v6469_v34 = vmul.f32 0.1, %v5799_v4 }
 0x93b   : > { %v6502_v8 = vsub.f32 %v12768_v26, %v6470_v56  ;;  %v12775_v56 = vld [vmem:[#allocation43_spill] sm:$0xff]  ;;  %v334_v26 = vld [vmem:[%s11189_s7] sm:$0xff] }
 0x93c   : > { %v6501_v15 = vsub.f32 %v12769_v61, %v6469_v34  ;;  %v8685_v10 = vpop.f32.mrb[58].mxu0 }
 0x93d   : > { %v8690_v18 = vpop.f32.mrb[56].mxu1  ;;  %v6472_v29 = vmul.f32 0.1, %v8685_v10  ;;  %v5809_v33 = vpop.f32.mrb[59].mxu0 }
 0x93e   : > { %v6474_v24 = vmul.f32 0.1, %v8690_v18  ;;  %v5884_v60 = vpop.f32.mrb[57].mxu1  ;;  %v8975_v22 = vpack.c.bf16 %v6502_v8, %v6501_v15  ;;  %v6471_v54 = vmul.f32 0.1, %v5809_v33  ;;  %v12776_v18 = vld [vmem:[#allocation48_spill] sm:$0xff] }
 0x93f   : > { %v6473_v63 = vmul.f32 0.1, %v5884_v60  ;;  %v6504_v17 = vsub.f32 %v12770_v3, %v6472_v29 }
 0x940   : > { %v6506_v21 = vsub.f32 %v12771_v12, %v6474_v24  ;;  %v6503_v6 = vsub.f32 %v12772_v45, %v6471_v54  ;;  %8976 = vmatpush3.bf16.msra.mxu0 %v8975_v22  ;;  %v12777_v24 = vld [vmem:[#allocation49_spill] sm:$0xff]  ;;  %v335_v22 = vld [vmem:[%s11189_s7 + $0x8] sm:$0xff]  ;;  %v12778_v12 = vld [vmem:[#allocation50_spill] sm:$0xff] }
 0x941   : > { %v6505_v59 = vsub.f32 %v12773_v47, %v6473_v63  ;;  %v8693_v49 = vpop.f32.mrb[58].mxu1  ;;  %8977 = vmatprep.subr.bf16.mxu0 %v12754_v14  ;;  %v12779_v45 = vld [vmem:[#allocation51_spill] sm:$0xff] }
 0x942   : > { %v6476_v1 = vmul.f32 0.1, %v8693_v49  ;;  %v5894_v0 = vpop.f32.mrb[59].mxu1  ;;  %v8978_v28 = vpack.c.bf16 %v6504_v17, %v6503_v6 }
 0x943   : > { %v8981_v37 = vpack.c.bf16 %v6506_v21, %v6505_v59  ;;  %v6475_v62 = vmul.f32 0.1, %v5894_v0 }
 0x944   : > { %v6508_v9 = vsub.f32 %v12774_v27, %v6476_v1  ;;  %v8698_v34 = vpop.f32.mrb[60].mxu0  ;;  %8979 = vmatpush3.bf16.msra.mxu0 %v8978_v28  ;;  %v12780_v28 = vld [vmem:[#allocation52_spill] sm:$0xff]  ;;  %v12781_v27 = vld [vmem:[#allocation53_spill] sm:$0xff] }
 0x945   : > { %v6507_v4 = vsub.f32 %v12775_v56, %v6475_v62  ;;  %8982 = vmatpush3.bf16.msra.mxu1 %v8981_v37  ;;  %v6478_v8 = vmul.f32 0.1, %v8698_v34  ;;  %v5969_v61 = vpop.f32.mrb[61].mxu0  ;;  %8986 = vmatprep.subr.bf16.mxu0 %v12754_v14  ;;  %v336_v62 = vld [vmem:[%s11189_s7 + $0x10] sm:$0xff] }
 0x946   : > { %8983 = vmatprep.subr.bf16.mxu1 %v12754_v14  ;;  %v6477_v10 = vmul.f32 0.1, %v5969_v61  ;;  %v12782_v61 = vld [vmem:[#allocation55_spill] sm:$0xff] }
 0x947   : > { %v8984_v15 = vpack.c.bf16 %v6508_v9, %v6507_v4  ;;  %v6510_v29 = vsub.f32 %v12776_v18, %v6478_v8  ;;  %8751 = vmatmul.mubr.msk.f32.vlgmr.msra.gmra.mrb[72].mxu0 %vm619_vm1, %v334_v26  ;;  %v12783_v18 = vld [vmem:[#allocation57_spill] sm:$0xff] }
 0x948   : > { %v6509_v33 = vsub.f32 %v12777_v24, %v6477_v10  ;;  %v8701_v60 = vpop.f32.mrb[62].mxu0  ;;  %8772 = vmatprep.mubr.msk.f32.mxu0 %vm9261_vm0, %v12763_v42 }
 0x949   : > { %8985 = vmatpush3.bf16.msra.mxu1 %v8984_v15  ;;  %v6480_v54 = vmul.f32 0.1, %v8701_v60  ;;  %v5979_v63 = vpop.f32.mrb[63].mxu0 }
 0x94a   : > { %8992 = vmatprep.subr.bf16.mxu1 %v12754_v14  ;;  %v8987_v3 = vpack.c.bf16 %v6510_v29, %v6509_v33  ;;  %v6479_v17 = vmul.f32 0.1, %v5979_v63 }
 0x94b   : > { %v6512_v21 = vsub.f32 %v12778_v12, %v6480_v54  ;;  %v12784_v54 = vld [vmem:[#allocation54_spill] sm:$0xff] }
 0x94c   : > { %8762 = vmatmul.mubr.msk.f32.vlgmr.msra.gmra.mrb[72].mxu1 %vm619_vm1, %v335_v22  ;;  %v6511_v6 = vsub.f32 %v12779_v45, %v6479_v17  ;;  %8988 = vmatpush3.bf16.msra.mxu0 %v8987_v3  ;;  %v12785_v3 = vld [vmem:[#allocation56_spill] sm:$0xff] }
 0x94d   : > { %8783 = vmatprep.mubr.msk.f32.mxu1 %vm9261_vm0, %v12763_v42  ;;  %v8706_v47 = vpop.f32.mrb[60].mxu1  ;;  %8989 = vmatprep.subr.bf16.mxu0 %v12754_v14 }
 0x94e   : > { %v8990_v59 = vpack.c.bf16 %v6512_v21, %v6511_v6  ;;  %v6482_v49 = vmul.f32 0.1, %v8706_v47  ;;  %v6054_v1 = vpop.f32.mrb[61].mxu1  ;;  %v337_v6 = vld [vmem:[%s11189_s7 + $0x18] sm:$0xff] }
 0x94f   : > { %v6481_v0 = vmul.f32 0.1, %v6054_v1 }
 0x950   : > { %v6514_v37 = vsub.f32 %v12780_v28, %v6482_v49  ;;  %8991 = vmatpush3.bf16.msra.mxu0 %v8990_v59  ;;  %v12786_v49 = vld [vmem:[#allocation58_spill] sm:$0xff] }
 0x951   : > { %v6513_v9 = vsub.f32 %v12781_v27, %v6481_v0  ;;  %v8709_v56 = vpop.f32.mrb[62].mxu1  ;;  %8998 = vmatprep.subr.bf16.mxu0 %v12754_v14  ;;  %v12787_v0 = vld [vmem:[#allocation59_spill] sm:$0xff] }
 0x952   : > { %v6484_v4 = vmul.f32 0.1, %v8709_v56  ;;  %v6064_v34 = vpop.f32.mrb[63].mxu1 }
 0x953   : > { %v8993_v26 = vpack.c.bf16 %v6514_v37, %v6513_v9  ;;  %v6483_v8 = vmul.f32 0.1, %v6064_v34  ;;  %8773 = vmatmul.mubr.msk.f32.vlgmr.msra.gmra.mrb[74].mxu0 %vm619_vm1, %v336_v62  ;;  %v8714_v10 = vpop.f32.mrb[64].mxu0  ;;  %v338_v62 = vld [vmem:[%s11189_s7 + $0x20] sm:$0xff]  ;;  %v12788_v34 = vld [vmem:[#allocation60_spill] sm:$0xff] }
 0x954   : > { %v6516_v15 = vsub.f32 %v12782_v61, %v6484_v4  ;;  %8794 = vmatprep.mubr.msk.f32.mxu0 %vm9261_vm0, %v12763_v42  ;;  %v6486_v24 = vmul.f32 0.1, %v8714_v10  ;;  %v6139_v33 = vpop.f32.mrb[65].mxu0  ;;  %v12789_v61 = vld [vmem:[#allocation61_spill] sm:$0xff] }
 0x955   : > { %v6515_v29 = vsub.f32 %v12783_v18, %v6483_v8  ;;  %8994 = vmatpush3.bf16.msra.mxu1 %v8993_v26  ;;  %v6485_v60 = vmul.f32 0.1, %v6139_v33 }
 0x956   : > { %8995 = vmatprep.subr.bf16.mxu1 %v12754_v14  ;;  %v6518_v63 = vsub.f32 %v12784_v54, %v6486_v24  ;;  %v12790_v54 = vld [vmem:[#allocation62_spill] sm:$0xff] }
 0x957   : > { %v8996_v22 = vpack.c.bf16 %v6516_v15, %v6515_v29  ;;  %v6517_v17 = vsub.f32 %v12785_v3, %v6485_v60  ;;  %v8717_v12 = vpop.f32.mrb[66].mxu0 }
 0x958   : > { %v6488_v21 = vmul.f32 0.1, %v8717_v12  ;;  %v6149_v45 = vpop.f32.mrb[67].mxu0 }
 0x959   : > { %8997 = vmatpush3.bf16.msra.mxu1 %v8996_v22  ;;  %v8999_v47 = vpack.c.bf16 %v6518_v63, %v6517_v17  ;;  %v6487_v59 = vmul.f32 0.1, %v6149_v45  ;;  %v12791_v17 = vld [vmem:[#allocation63_spill] sm:$0xff] }
 0x95a   : > { %9004 = vmatprep.subr.bf16.mxu1 %v12754_v14  ;;  %v6520_v1 = vsub.f32 %v12786_v49, %v6488_v21  ;;  %v12792_v21 = vld [vmem:[#allocation64_spill] sm:$0xff] }
 0x95b   : > { %v6519_v28 = vsub.f32 %v12787_v0, %v6487_v59  ;;  %9000 = vmatpush3.bf16.msra.mxu0 %v8999_v47  ;;  %v12793_v47 = vld [vmem:[#allocation65_spill] sm:$0xff] }
 0x95c   : > { %8784 = vmatmul.mubr.msk.f32.vlgmr.msra.gmra.mrb[74].mxu1 %vm619_vm1, %v337_v6  ;;  %9001 = vmatprep.subr.bf16.mxu0 %v12754_v14 }
 0x95d   : > { %8805 = vmatprep.mubr.msk.f32.mxu1 %vm9261_vm0, %v12763_v42  ;;  %v9002_v37 = vpack.c.bf16 %v6520_v1, %v6519_v28 }
 0x95f   : > { %9003 = vmatpush3.bf16.msra.mxu0 %v9002_v37 }
 0x960   : > { %9010 = vmatprep.subr.bf16.mxu0 %v12754_v14 }
 0x962   : > { %v8722_v27 = vpop.f32.mrb[64].mxu1  ;;  %8795 = vmatmul.mubr.msk.f32.vlgmr.msra.gmra.mrb[76].mxu0 %vm619_vm1, %v338_v62  ;;  %v12794_v62 = vld [vmem:[#allocation66_spill] sm:$0xff] }
 0x963   : > { %v6490_v9 = vmul.f32 0.1, %v8722_v27  ;;  %v6224_v56 = vpop.f32.mrb[65].mxu1  ;;  %8816 = vmatprep.mubr.msk.f32.mxu0 %vm9261_vm0, %v12763_v42 }
 0x964   : > { %v6489_v4 = vmul.f32 0.1, %v6224_v56 }
 0x965   : > { %v6522_v26 = vsub.f32 %v12788_v34, %v6490_v9  ;;  %v12795_v9 = vld [vmem:[#allocation67_spill] sm:$0xff] }
 0x966   : > { %v8730_v8 = vpop.f32.mrb[68].mxu0  ;;  %v6521_v15 = vsub.f32 %v12789_v61, %v6489_v4 }
 0x967   : > { %v8725_v10 = vpop.f32.mrb[66].mxu1  ;;  %v6494_v18 = vmul.f32 0.1, %v8730_v8  ;;  %v6309_v29 = vpop.f32.mrb[69].mxu0  ;;  %v339_v8 = vld [vmem:[%s11189_s7 + $0x28] sm:$0xff] }
 0x968   : > { %v6492_v24 = vmul.f32 0.1, %v8725_v10  ;;  %v6234_v33 = vpop.f32.mrb[67].mxu1  ;;  %v6493_v60 = vmul.f32 0.1, %v6309_v29  ;;  %v9005_v22 = vpack.c.bf16 %v6522_v26, %v6521_v15  ;;  %v12796_v10 = vld [vmem:[#allocation68_spill] sm:$0xff] }
 0x969   : > { %v6526_v63 = vsub.f32 %v12790_v54, %v6494_v18  ;;  %v6491_v3 = vmul.f32 0.1, %v6234_v33  ;;  %v12797_v29 = vld [vmem:[#allocation69_spill] sm:$0xff] }
 0x96a   : > { %v6524_v12 = vsub.f32 %v12791_v17, %v6492_v24  ;;  %v6525_v45 = vsub.f32 %v12792_v21, %v6493_v60  ;;  %v8733_v6 = vpop.f32.mrb[70].mxu0  ;;  %9006 = vmatpush3.bf16.msra.mxu1 %v9005_v22  ;;  %v340_v60 = vld [vmem:[%s11189_s7 + $0x30] sm:$0xff]  ;;  %v12798_v17 = vld [vmem:[#allocation70_spill] sm:$0xff]  ;;  %v12799_v21 = vld [vmem:[#allocation23_spill] sm:$0xff] }
 0x96b   : > { %v6523_v59 = vsub.f32 %v12793_v47, %v6491_v3  ;;  %v6496_v49 = vmul.f32 0.1, %v8733_v6  ;;  %v6319_v1 = vpop.f32.mrb[71].mxu0  ;;  %9007 = vmatprep.subr.bf16.mxu1 %v12754_v14  ;;  %v341_v47 = vld [vmem:[%s11189_s7 + $0x38] sm:$0xff] }
 0x96c   : > { %v9011_v0 = vpack.c.bf16 %v6526_v63, %v6525_v45  ;;  %v6495_v28 = vmul.f32 0.1, %v6319_v1  ;;  %v6420_v1 = vsel %vm1204_vm2, %v5726_v57, 0.0 }
 0x96d   : > { %v9008_v37 = vpack.c.bf16 %v6524_v12, %v6523_v59  ;;  %v6528_v27 = vsub.f32 %v12794_v62, %v6496_v49  ;;  %v8738_v4 = vpop.f32.mrb[68].mxu1  ;;  %v6413_v59 = vsel %vm1204_vm2, %v5725_v19, 0.0  ;;  %v6428_v62 = vrot.slane %v6427_v41, 4 }
 0x96e   : > { %v6527_v56 = vsub.f32 %v12795_v9, %v6495_v28  ;;  %9012 = vmatpush3.bf16.msra.mxu0 %v9011_v0  ;;  %v6498_v34 = vmul.f32 0.1, %v8738_v4  ;;  %v6394_v26 = vpop.f32.mrb[69].mxu1  ;;  %v6414_v49 = vrot.slane %v6413_v59, 4 }
 0x96f   : > { %9009 = vmatpush3.bf16.msra.mxu1 %v9008_v37  ;;  %9013 = vmatprep.subr.bf16.mxu0 %v12754_v14  ;;  %v6497_v15 = vmul.f32 0.1, %v6394_v26 }
 0x970   : > { %v9014_v61 = vpack.c.bf16 %v6528_v27, %v6527_v56  ;;  %9016 = vmatprep.subr.bf16.mxu1 %v12754_v14  ;;  %v6530_v18 = vsub.f32 %v12796_v10, %v6498_v34  ;;  %v6415_v0 = vadd.f32 %v6414_v49, %v6413_v59  ;;  %v6429_v27 = vadd.f32 %v6428_v62, %v6427_v41 }
 0x971   : > { %v6529_v24 = vsub.f32 %v12797_v29, %v6497_v15  ;;  %v8741_v33 = vpop.f32.mrb[70].mxu1  ;;  %v12801_v29 = vld [vmem:[#allocation2_spill] sm:$0xff]  ;;  %v6448_v59 = vsel %vm1204_vm2, %v5730_v32, 0.0  ;;  %v6455_v41 = vsel %vm1204_vm2, %v5731_v36, 0.0  ;;  %v6462_v36 = vsel %vm1204_vm2, %v5732_v39, 0.0 }
 0x972   : > { %8806 = vmatmul.mubr.msk.f32.vlgmr.msra.gmra.mrb[76].mxu1 %vm619_vm1, %v339_v8  ;;  %9015 = vmatpush3.bf16.msra.mxu0 %v9014_v61  ;;  %v6500_v22 = vmul.f32 0.1, %v8741_v33  ;;  %v6404_v54 = vpop.f32.mrb[71].mxu1  ;;  %v6416_v28 = vrot.slane %v6415_v0, 2  ;;  %v6430_v57 = vrot.slane %v6429_v27, 2  ;;  %v6441_v8 = vsel %vm1204_vm2, %v5729_v40, 0.0 }
 0x973   : > { %8827 = vmatprep.mubr.msk.f32.mxu1 %vm9261_vm0, %v12763_v42  ;;  %v9017_v63 = vpack.c.bf16 %v6530_v18, %v6529_v24  ;;  %v6499_v3 = vmul.f32 0.1, %v6404_v54  ;;  %v6442_v61 = vrot.slane %v6441_v8, 4  ;;  %v12802_v33 = vld [vmem:[#allocation19_spill] sm:$0xff] }
 0x974   : > { %v6532_v12 = vsub.f32 %v12798_v17, %v6500_v22  ;;  %v6417_v19 = vadd.f32 %v6416_v28, %v6415_v0  ;;  %v6431_v26 = vadd.f32 %v6430_v57, %v6429_v27 }
 0x975   : > { %8817 = vmatmul.mubr.msk.f32.vlgmr.msra.gmra.mrb[78].mxu0 %vm619_vm1, %v340_v60  ;;  %v6531_v45 = vsub.f32 %v12799_v21, %v6499_v3  ;;  %9018 = vmatpush3.bf16.msra.mxu1 %v9017_v63  ;;  %v6443_v18 = vadd.f32 %v6442_v61, %v6441_v8  ;;  %v6438_v63 = vadd.f32 %v6437_v13, %v6436_v20 }
 0x976   : > { %9019 = vmatprep.subr.bf16.mxu1 %v12754_v14  ;;  %v6421_v14 = vrot.slane %v6420_v1, 4  ;;  %v6418_v9 = vrot.slane %v6417_v19, 1  ;;  %v6432_v10 = vrot.slane %v6431_v26, 1 }
 0x977   : > { %v9020_v6 = vpack.c.bf16 %v6532_v12, %v6531_v45  ;;  %v6444_v46 = vrot.slane %v6443_v18, 2  ;;  %v6439_v45 = vrot.slane %v6438_v63, 1 }
 0x978   : > { %v6422_v37 = vadd.f32 %v6421_v14, %v6420_v1  ;;  %v6419_v56 = vadd.f32 %v6418_v9, %v6417_v19  ;;  %v6433_v22 = vadd.f32 %v6432_v10, %v6431_v26  ;;  %v12803_v1 = vld [vmem:[#allocation76_spill] sm:$0xff] }
 0x979   : > { %9021 = vmatpush3.bf16.msra.mxu1 %v9020_v6  ;;  %v6445_v14 = vadd.f32 %v6444_v46, %v6443_v18  ;;  %v6440_v28 = vadd.f32 %v6439_v45, %v6438_v63  ;;  %v12807_v45 = vld [vmem:[#allocation82_spill] sm:$0xff] }
 0x97a   : > { %v6423_v38 = vrot.slane %v6422_v37, 2  ;;  %v6533_v34 = vmul.f32 0.1, %v6419_v56  ;;  %v6535_v12 = vmul.f32 0.1, %v6433_v22 }
 0x97b   : > { %v6446_v11 = vrot.slane %v6445_v14, 1  ;;  %v6536_v62 = vmul.f32 0.1, %v6440_v28 }
 0x97c   : > { %8828 = vmatmul.mubr.msk.f32.vlgmr.msra.gmra.mrb[78].mxu1 %vm619_vm1, %v341_v47  ;;  %v6424_v2 = vadd.f32 %v6423_v38, %v6422_v37  ;;  %v6541_v15 = vsub.f32 %v12800_v51, %v6533_v34  ;;  %v6543_v0 = vsub.f32 %v12803_v1, %v6535_v12  ;;  %v6449_v37 = vrot.slane %v6448_v59, 4  ;;  %v12805_v51 = vld [vmem:[#allocation80_spill] sm:$0xff] }
 0x97d   : > { %v6456_v38 = vrot.slane %v6455_v41, 4  ;;  %v6447_v53 = vadd.f32 %v6446_v11, %v6445_v14  ;;  %v6544_v31 = vsub.f32 %v12804_v48, %v6536_v62  ;;  %v6463_v34 = vrot.slane %v6462_v36, 4  ;;  %v12810_v1 = vld [vmem:[#allocation84_spill] sm:$0xff] }
 0x97e   : > { %v6425_v4 = vrot.slane %v6424_v2, 1  ;;  %v6560_v24 = vrot.slane %v6541_v15, %v12801_v29  ;;  %v6568_v7 = vrot.slane %v6543_v0, %v12801_v29  ;;  %v6450_v19 = vadd.f32 %v6449_v37, %v6448_v59  ;;  %v12808_v59 = vld [vmem:[#allocation11_spill] sm:$0xff]  ;;  %v12813_v48 = vld [vmem:[#allocation12_spill] sm:$0xff] }
 0x97f   : > { %v6457_v57 = vadd.f32 %v6456_v38, %v6455_v41  ;;  %v12806_v12 = vlaneseq  ;;  %v12811_v41 = vld [vmem:[#allocation89_spill] sm:$0xff] }
 0x980   : > { %v6426_v16 = vadd.f32 %v6425_v4, %v6424_v2  ;;  %v6451_v56 = vrot.slane %v6450_v19, 2  ;;  %v6537_v4 = vmul.f32 0.1, %v6447_v53 }
 0x981   : > { %v6458_v52 = vrot.slane %v6457_v57, 2 }
 0x982   : > { %v6534_v43 = vmul.f32 0.1, %v6426_v16  ;;  %v6572_v16 = vrot.slane %v6544_v31, %v12801_v29  ;;  %v6452_v20 = vadd.f32 %v6451_v56, %v6450_v19  ;;  %v6545_v15 = vsub.f32 %v12805_v51, %v6537_v4  ;;  %v12814_v31 = vld [vmem:[#allocation4_spill] sm:$0xff]  ;;  %v12815_v56 = vld [vmem:[#allocation13_spill] sm:$0xff] }
 0x983   : > { %v6459_v10 = vadd.f32 %v6458_v52, %v6457_v57  ;;  %vm1414_vm6 = vcmp.eq.f32.partialorder %v12814_v31, %v12813_v48 }
 0x984   : > { %v6542_v60 = vsub.f32 %v12802_v33, %v6534_v43  ;;  %v6464_v43 = vadd.f32 %v6463_v34, %v6462_v36  ;;  %v6453_v30 = vrot.slane %v6452_v20, 1  ;;  %v6576_v39 = vrot.slane %v6545_v15, %v12801_v29  ;;  %v12816_v36 = vld [vmem:[#allocation5_spill] sm:$0xff] }
 0x985   : > { %vm1415_vm8 = vcmp.eq.f32.partialorder %v12816_v36, %v12815_v56  ;;  %v12831_v56 = vld [vmem:[#allocation106_spill] sm:$0xff]  ;;  %v12832_v36 = vld [vmem:[#allocation72_spill] sm:$0xff] }
 0x986   : > { %v6564_v40 = vrot.slane %v6542_v60, %v12801_v29  ;;  %v6465_v13 = vrot.slane %v6464_v43, 2  ;;  %v6454_v60 = vadd.f32 %v6453_v30, %v6452_v20  ;;  %v12822_v30 = vld [vmem:[#allocation73_spill] sm:$0xff] }
 0x988   : > { %v6538_v46 = vmul.f32 0.1, %v6454_v60 }
 0xa1a   : > { %v6666_v54 = vpop.f32.mrb[72].mxu0 }
 0xa1b   : > { %v11286_v3 = vadd.f32 %v6666_v54, %v6560_v24  ;;  %v8752_v50 = vpop.f32.mrb[73].mxu0  ;;  %v6460_v24 = vrot.slane %v6459_v10, 1 }
 0xa1c   : > { %v6466_v50 = vadd.f32 %v6465_v13, %v6464_v43  ;;  %v12819_v43 = vld [vmem:[#allocation14_spill] sm:$0xff] }
 0xa1d   : > { %v7181_v17 = vsel %vm1204_vm2, %v11286_v3, -inf  ;;  %v6461_v63 = vadd.f32 %v6460_v24, %v6459_v10  ;;  %v12821_v10 = vld [vmem:[#allocation88_spill] sm:$0xff] }
 0xa1e   : > { %7182 = vmax.xlane.f32.xlu0 %v7181_v17  ;;  %v6467_v17 = vrot.slane %v6466_v50, 1  ;;  %vm3462_vm12 = vcmp.eq.f32.partialorder %v12822_v30, %v12821_v10  ;;  %v12835_v30 = vld [vmem:[#allocation92_spill] sm:$0xff] }
 0xa1f   : > { %v6739_v21 = vpop.f32.mrb[72].mxu1 }
 0xa20   : > { %v11291_v6 = vadd.f32 %v6739_v21, %v6564_v40  ;;  %v8763_v47 = vpop.f32.mrb[73].mxu1  ;;  %v6539_v40 = vmul.f32 0.1, %v6461_v63  ;;  %v11329_v21 = vand.u32 127, %v12806_v12  ;;  %v6468_v14 = vadd.f32 %v6467_v17, %v6466_v50  ;;  %v12823_v50 = vld [vmem:[#allocation90_spill] sm:$0xff] }
 0xa21   : > { %v6546_v47 = vsub.f32 %v12807_v45, %v6538_v46  ;;  %v12824_v46 = vld [vmem:[#allocation77_spill] sm:$0xff]  ;;  %v12826_v17 = vld [vmem:[#allocation74_spill] sm:$0xff] }
 0xa22   : > { %v7184_v49 = vsel %vm1204_vm2, %v11291_v6, -inf  ;;  %v6547_v0 = vsub.f32 %v12810_v1, %v6539_v40  ;;  %v6540_v19 = vmul.f32 0.1, %v6468_v14  ;;  %v1422_v51 = vsel %vm1414_vm6, %v11329_v21, 8  ;;  %v12825_v40 = vld [vmem:[#allocation105_spill] sm:$0xff] }
 0xa23   : > { %7185 = vmax.xlane.f32.xlu1 %v7184_v49  ;;  %v12809_v49 = vld [vmem:[#allocation3_spill] sm:$0xff]  ;;  %v6580_v28 = vrot.slane %v6546_v47, %v12801_v29  ;;  %v1423_v15 = vsel %vm1415_vm8, %v11329_v21, 8  ;;  %v11372_v24 = vsel %vm1204_vm2, %v1422_v51, 2147483647  ;;  %vm3463_vm14 = vcmp.eq.f32.partialorder %v12824_v46, %v12823_v50 }
 0xa24   : > { %vm1413_vm0 = vcmp.eq.f32.partialorder %v12809_v49, %v12808_v59  ;;  %v6584_v62 = vrot.slane %v6547_v0, %v12801_v29  ;;  %v11375_v60 = vsel %vm1204_vm2, %v1423_v15, 2147483647  ;;  %vm5413_vm15 = vcmp.eq.f32.partialorder %v12826_v17, %v12825_v40 }
 0xa25   : > { %v1421_v37 = vsel %vm1413_vm0, %v11329_v21, 8  ;;  %v1446_v47 = vshra.s32 %v11372_v24, 16  ;;  %v1461_v59 = vshra.s32 %v11375_v60, 16  ;;  %v3471_v14 = vsel %vm3463_vm14, %v11329_v21, 8 }
 0xa26   : > { %v6812_v32 = vpop.f32.mrb[74].mxu0  ;;  %vm5414_vm0 = vcmp.eq.f32.partialorder %v12832_v36, %v12831_v56  ;;  %v12843_v56 = vld [vmem:[#allocation100_spill] sm:$0xff]  ;;  %v12844_v36 = vld [vmem:[#allocation101_spill] sm:$0xff] }
 0xa27   : > { %v11307_v27 = vadd.f32 %v6812_v32, %v6568_v7  ;;  %v8774_v9 = vpop.f32.mrb[75].mxu0  ;;  %v12812_v7 = vld [vmem:[#allocation75_spill] sm:$0xff]  ;;  %vm5416_vm14 = vcmp.eq.f32.partialorder %v12843_v56, %v10851_v55 }
 0xa28   : > { %vm3461_vm1 = vcmp.eq.f32.partialorder %v12812_v7, %v12811_v41  ;;  %v11343_v9 = vsel %vm1204_vm2, %v1421_v37, 2147483647  ;;  %v12827_v37 = vld [vmem:[#allocation16_spill] sm:$0xff]  ;;  %v12829_v7 = vld [vmem:[#allocation91_spill] sm:$0xff]  ;;  %v5424_v55 = vsel %vm5416_vm14, %v11329_v21, 8 }
 0xa29   : > { %v7187_v2 = vsel %vm1204_vm2, %v11307_v27, -inf  ;;  %v3469_v57 = vsel %vm3461_vm1, %v11329_v21, 8  ;;  %v1431_v34 = vshra.s32 %v11343_v9, 16  ;;  %v12828_v41 = vld [vmem:[#allocation8_spill] sm:$0xff] }
 0xa2a   : > { %7188 = vmax.xlane.f32.xlu0 %v7187_v2  ;;  %vm1417_vm3 = vcmp.eq.f32.partialorder %v12828_v41, %v12827_v37 }
 0xa2b   : > { %v1425_v31 = vsel %vm1417_vm3, %v11329_v21, 8 }
 0xa2f   : > { %v6885_v26 = vpop.f32.mrb[74].mxu1 }
 0xa30   : > { %v11318_v8 = vadd.f32 %v6885_v26, %v6572_v16  ;;  %v8785_v61 = vpop.f32.mrb[75].mxu1  ;;  %v12818_v26 = vld [vmem:[#allocation86_spill] sm:$0xff] }
 0xa31   : > { %v6548_v20 = vsub.f32 %v12818_v26, %v6540_v19  ;;  %v11359_v61 = vsel %vm1204_vm2, %v3469_v57, 2147483647 }
 0xa32   : > { %v7190_v5 = vsel %vm1204_vm2, %v11318_v8, -inf  ;;  %v3479_v13 = vshra.s32 %v11359_v61, 16 }
 0xa33   : > { %7191 = vmax.xlane.f32.xlu1 %v7190_v5  ;;  %v12820_v5 = vld [vmem:[#allocation6_spill] sm:$0xff] }
 0xa34   : > { %vm1416_vm10 = vcmp.eq.f32.partialorder %v12820_v5, %v12819_v43  ;;  %v11386_v45 = vcvt.s32.f32 %v3479_v13  ;;  %v11435_v43 = vsel %vm1204_vm2, %v1425_v31, 2147483647  ;;  %v5422_v5 = vsel %vm5414_vm0, %v11329_v21, 8  ;;  %v12836_v13 = vld [vmem:[#allocation81_spill] sm:$0xff] }
 0xa35   : > { %v6958_v18 = vpop.f32.mrb[76].mxu0  ;;  %v1424_v63 = vsel %vm1416_vm10, %v11329_v21, 8  ;;  %vm3465_vm6 = vcmp.eq.f32.partialorder %v12836_v13, %v12835_v30  ;;  %v1491_v46 = vshra.s32 %v11435_v43, 16  ;;  %v11452_v40 = vsel %vm1204_vm2, %v5422_v5, 2147483647  ;;  %v12845_v30 = vld [vmem:[#allocation17_spill] sm:$0xff] }
 0xa36   : > { %v11324_v33 = vadd.f32 %v6958_v18, %v6576_v39  ;;  %v8796_v22 = vpop.f32.mrb[77].mxu0  ;;  %v11367_v39 = vcvt.s32.f32 %v1431_v34  ;;  %v6588_v18 = vrot.slane %v6548_v20, %v12801_v29  ;;  %v11396_v0 = vsel %vm1204_vm2, %v1424_v63, 2147483647  ;;  %v12834_v34 = vld [vmem:[#allocation99_spill] sm:$0xff]  ;;  %v12846_v13 = vld [vmem:[#allocation10_spill] sm:$0xff] }
 0xa37   : > { %v11467_v41 = vcvt.s32.f32 %v1491_v46  ;;  %vm1420_vm3 = vcmp.eq.f32.partialorder %v12846_v13, %v12845_v30  ;;  %v12855_v30 = vld [vmem:[#allocation103_spill] sm:$0xff] }
 0xa38   : > { %v7193_v54 = vsel %vm1204_vm2, %v11324_v33, -inf }
 0xa39   : > { %7194 = vmax.xlane.f32.xlu0 %v7193_v54  ;;  %v3470_v54 = vsel %vm3462_vm12, %v11329_v21, 8 }
 0xa3a   : > { %v11393_v1 = vsel %vm1204_vm2, %v3470_v54, 2147483647 }
 0xa3b   : > { %v3494_v19 = vshra.s32 %v11393_v1, 16 }
 0xa45   : > { %v7031_v11 = vpop.f32.mrb[76].mxu1 }
 0xa46   : > { %v11339_v38 = vadd.f32 %v7031_v11, %v6580_v28  ;;  %v8807_v32 = vpop.f32.mrb[77].mxu1  ;;  %v5421_v28 = vsel %vm5413_vm15, %v11329_v21, 8  ;;  %v12830_v11 = vld [vmem:[#allocation79_spill] sm:$0xff]  ;;  %vm5417_vm15 = vcmp.eq.f32.partialorder %v12844_v36, %v10857_v35 }
 0xa47   : > { %vm3464_vm5 = vcmp.eq.f32.partialorder %v12830_v11, %v12829_v7  ;;  %v11405_v32 = vcvt.s32.f32 %v1446_v47  ;;  %v11415_v57 = vsel %vm1204_vm2, %v5421_v28, 2147483647  ;;  %v12842_v28 = vld [vmem:[#allocation9_spill] sm:$0xff]  ;;  %v5446_v7 = vshra.s32 %v11452_v40, 16 }
 0xa48   : > { %v7196_v2 = vsel %vm1204_vm2, %v11339_v38, -inf  ;;  %v7104_v53 = vpop.f32.mrb[78].mxu0  ;;  %v3472_v48 = vsel %vm3464_vm5, %v11329_v21, 8  ;;  %v5431_v51 = vshra.s32 %v11415_v57, 16  ;;  %v5425_v35 = vsel %vm5417_vm15, %v11329_v21, 8 }
 0xa49   : > { %7197 = vmax.xlane.f32.xlu1 %v7196_v2  ;;  %v11352_v4 = vadd.f32 %v7104_v53, %v6584_v62  ;;  %v8818_v52 = vpop.f32.mrb[79].mxu0  ;;  %v11407_v62 = vcvt.s32.f32 %v1461_v59  ;;  %v1476_v2 = vshra.s32 %v11396_v0, 16  ;;  %v11412_v53 = vsel %vm1204_vm2, %v3471_v14, 2147483647  ;;  %v12839_v59 = vld [vmem:[#allocation15_spill] sm:$0xff]  ;;  %v12841_v14 = vld [vmem:[#allocation18_spill] sm:$0xff] }
 0xa4a   : > { %v12833_v52 = vld [vmem:[#allocation107_spill] sm:$0xff]  ;;  %v3509_v20 = vshra.s32 %v11412_v53, 16  ;;  %v11432_v15 = vsel %vm1204_vm2, %v3472_v48, 2147483647  ;;  %v11447_v63 = vcvt.s32.f32 %v5431_v51  ;;  %vm1419_vm12 = vcmp.eq.f32.partialorder %v12842_v28, %v12841_v14 }
 0xa4b   : > { %12817 = vst [vmem:[#allocation21_spill] sm:$0xff] %v11352_v4  ;;  %v7199_v16 = vsel %vm1204_vm2, %v11352_v4, -inf  ;;  %vm5415_vm1 = vcmp.eq.f32.partialorder %v12834_v34, %v12833_v52  ;;  %v11427_v26 = vcvt.s32.f32 %v1476_v2  ;;  %v3524_v50 = vshra.s32 %v11432_v15, 16 }
 0xa4c   : > { %7200 = vmax.xlane.f32.xlu0 %v7199_v16  ;;  %v11425_v16 = vcvt.s32.f32 %v3494_v19  ;;  %v5423_v10 = vsel %vm5415_vm1, %v11329_v21, 8  ;;  %v11445_v54 = vcvt.s32.f32 %v3509_v20  ;;  %v1427_v31 = vsel %vm1419_vm12, %v11329_v21, 8 }
 0xa4d   : > { %v11455_v17 = vsel %vm1204_vm2, %v5423_v10, 2147483647  ;;  %v11465_v37 = vcvt.s32.f32 %v3524_v50  ;;  %v11485_v52 = vcvt.s32.f32 %v5446_v7  ;;  %v11495_v10 = vsel %vm1204_vm2, %v1427_v31, 2147483647  ;;  %v12850_v7 = vld [vmem:[#allocation95_spill] sm:$0xff] }
 0xa4e   : > { %v5461_v11 = vshra.s32 %v11455_v17, 16  ;;  %v1428_v28 = vsel %vm1420_vm3, %v11329_v21, 8 }
 0xa4f   : > { %v7177_v22 = vpop.f32.mrb[78].mxu1 }
 0xa50   : > { %1434 = vmin.xlane.f32.xlu0 %v11367_v39  ;;  %v11384_v29 = vadd.f32 %v7177_v22, %v6588_v18  ;;  %v8829_v12 = vpop.f32.mrb[79].mxu1  ;;  %v12837_v18 = vld [vmem:[#allocation93_spill] sm:$0xff]  ;;  %v12838_v22 = vld [vmem:[#allocation83_spill] sm:$0xff]  ;;  %v11487_v34 = vcvt.s32.f32 %v5461_v11 }
 0xa51   : > { %vm3466_vm8 = vcmp.eq.f32.partialorder %v12838_v22, %v12837_v18  ;;  %v3473_v12 = vsel %vm3465_vm6, %v11329_v21, 8  ;;  %v12847_v18 = vld [vmem:[#allocation94_spill] sm:$0xff]  ;;  %v12848_v22 = vld [vmem:[#allocation85_spill] sm:$0xff]  ;;  %v12851_v11 = vld [vmem:[#allocation87_spill] sm:$0xff]  ;;  %vm5419_vm6 = vcmp.eq.f32.partialorder %v12855_v30, %v10896_v25 }
 0xa52   : > { %v7202_v49 = vsel %vm1204_vm2, %v11384_v29, -inf  ;;  %v3474_v47 = vsel %vm3466_vm8, %v11329_v21, 8  ;;  %v11472_v19 = vsel %vm1204_vm2, %v3473_v12, 2147483647  ;;  %vm3467_vm5 = vcmp.eq.f32.partialorder %v12848_v22, %v12847_v18 }
 0xa53   : > { %7203 = vmax.xlane.f32.xlu1 %v7202_v49  ;;  %v12840_v49 = vld [vmem:[#allocation7_spill] sm:$0xff]  ;;  %v11475_v2 = vsel %vm1204_vm2, %v3474_v47, 2147483647  ;;  %v3539_v20 = vshra.s32 %v11472_v19, 16  ;;  %v1521_v47 = vshra.s32 %v11495_v10, 16  ;;  %v3475_v14 = vsel %vm3467_vm5, %v11329_v21, 8 }
 0xa54   : > { %3482 = vmin.xlane.f32.xlu0 %v11386_v45  ;;  %vm1418_vm10 = vcmp.eq.f32.partialorder %v12840_v49, %v12839_v59  ;;  %v3554_v51 = vshra.s32 %v11475_v2, 16  ;;  %v11512_v59 = vsel %vm1204_vm2, %v5424_v55, 2147483647  ;;  %v11515_v49 = vsel %vm1204_vm2, %v5425_v35, 2147483647 }
 0xa55   : > { %v1426_v48 = vsel %vm1418_vm10, %v11329_v21, 8  ;;  %v11505_v50 = vcvt.s32.f32 %v3539_v20  ;;  %12849 = vst [vmem:[#allocation22_spill] sm:$0xff] %v11512_v59  ;;  %vm3468_vm0 = vcmp.eq.f32.partialorder %v12851_v11, %v12850_v7  ;;  %v11527_v56 = vcvt.s32.f32 %v1521_v47 }
 0xa56   : > { %v11492_v5 = vsel %vm1204_vm2, %v1426_v48, 2147483647  ;;  %v11507_v46 = vcvt.s32.f32 %v3554_v51  ;;  %v12852_v48 = vld [vmem:[#allocation102_spill] sm:$0xff]  ;;  %v5476_v36 = vshra.s32 %v11512_v59, 16  ;;  %v5491_v20 = vshra.s32 %v11515_v49, 16 }
 0xa57   : > { %1449 = vmin.xlane.f32.xlu1 %v11405_v32  ;;  %v1506_v12 = vshra.s32 %v11492_v5, 16  ;;  %vm5418_vm1 = vcmp.eq.f32.partialorder %v12852_v48, %v10890_v23  ;;  %v11532_v51 = vsel %vm1204_vm2, %v3475_v14, 2147483647  ;;  %v11535_v55 = vsel %vm1204_vm2, %v1428_v28, 2147483647  ;;  %v12858_v28 = vld [vmem:[#allocation104_spill] sm:$0xff] }
 0xa58   : > { %1464 = vmin.xlane.f32.xlu0 %v11407_v62  ;;  %12854 = vst [vmem:[#allocation25_spill] sm:$0xff] %v11532_v51  ;;  %v3476_v23 = vsel %vm3468_vm0, %v11329_v21, 8  ;;  %v5426_v35 = vsel %vm5418_vm1, %v11329_v21, 8  ;;  %v11543_v13 = vcvt.s32.f32 %v5476_v36  ;;  %v11545_v18 = vcvt.s32.f32 %v5491_v20 }
 0xa59   : > { %v11525_v31 = vcvt.s32.f32 %v1506_v12  ;;  %v3569_v22 = vshra.s32 %v11532_v51, 16  ;;  %v1536_v12 = vshra.s32 %v11535_v55, 16  ;;  %v11550_v47 = vsel %vm1204_vm2, %v3476_v23, 2147483647 }
 0xa5a   : > { %12856 = vst [vmem:[#allocation30_spill] sm:$0xff] %v11543_v13  ;;  %12857 = vst [vmem:[#allocation109_spill] sm:$0xff] %v11550_v47  ;;  %v11553_v14 = vsel %vm1204_vm2, %v5426_v35, 2147483647  ;;  %v5427_v25 = vsel %vm5419_vm6, %v11329_v21, 8  ;;  %vm5420_vm8 = vcmp.eq.f32.partialorder %v12858_v28, %v10915_v58  ;;  %v3584_v48 = vshra.s32 %v11550_v47, 16 }
 0xa5b   : > { %3497 = vmin.xlane.f32.xlu1 %v11425_v16  ;;  %12853 = vst [vmem:[#allocation24_spill] sm:$0xff] %v11525_v31  ;;  %v11560_v7 = vcvt.s32.f32 %v3569_v22  ;;  %v11562_v11 = vcvt.s32.f32 %v1536_v12  ;;  %v5506_v36 = vshra.s32 %v11553_v14, 16  ;;  %v11567_v20 = vsel %vm1204_vm2, %v5427_v25, 2147483647 }
 0xa5c   : > { %1479 = vmin.xlane.f32.xlu0 %v11427_v26  ;;  %v5428_v23 = vsel %vm5420_vm8, %v11329_v21, 8  ;;  %v11572_v35 = vcvt.s32.f32 %v3584_v48  ;;  %v5521_v30 = vshra.s32 %v11567_v20, 16 }
 0xa5d   : > { %12859 = vst [vmem:[#allocation111_spill] sm:$0xff] %v11560_v7  ;;  %v11574_v58 = vcvt.s32.f32 %v5506_v36  ;;  %v11578_v22 = vsel %vm1204_vm2, %v5428_v23, 2147483647 }
 0xa5e   : > { %12860 = vst [vmem:[#allocation26_spill] sm:$0xff] %v11572_v35  ;;  %12861 = vst [vmem:[#allocation97_spill] sm:$0xff] %v11578_v22  ;;  %v11582_v12 = vcvt.s32.f32 %v5521_v30  ;;  %v5536_v25 = vshra.s32 %v11578_v22, 16 }
 0xa5f   : > { %3512 = vmin.xlane.f32.xlu1 %v11445_v54 }
 0xa60   : > { %5434 = vmin.xlane.f32.xlu0 %v11447_v63  ;;  %v11586_v28 = vcvt.s32.f32 %v5536_v25  ;;  %v1430_v25 = vand.u32 65535, %v11343_v9 }
 0xa62   : > { %12862 = vst [vmem:[#allocation27_spill] sm:$0xff] %v11586_v28 }
 0xa63   : > { %3527 = vmin.xlane.f32.xlu1 %v11465_v37 }
 0xa64   : > { %1494 = vmin.xlane.f32.xlu0 %v11467_v41 }
 0xa67   : > { %5449 = vmin.xlane.f32.xlu1 %v11485_v52 }
 0xa68   : > { %5464 = vmin.xlane.f32.xlu0 %v11487_v34 }
 0xa6b   : > { %3542 = vmin.xlane.f32.xlu1 %v11505_v50 }
 0xa6c   : > { %3557 = vmin.xlane.f32.xlu0 %v11507_v46 }
 0xa6f   : > { %1509 = vmin.xlane.f32.xlu1 %v11525_v31 }
 0xa70   : > { %1524 = vmin.xlane.f32.xlu0 %v11527_v56 }
 0xa73   : > { %5479 = vmin.xlane.f32.xlu1 %v11543_v13  ;;  %v1432_v13 = vcvt.s32.f32 %v1430_v25  ;;  %v1445_v25 = vand.u32 65535, %v11372_v24  ;;  %v3478_v24 = vand.u32 65535, %v11359_v61 }
 0xa74   : > { %5494 = vmin.xlane.f32.xlu0 %v11545_v18 }
 0xa77   : > { %3572 = vmin.xlane.f32.xlu1 %v11560_v7 }
 0xa78   : > { %1539 = vmin.xlane.f32.xlu0 %v11562_v11 }
 0xa7b   : > { %3587 = vmin.xlane.f32.xlu1 %v11572_v35 }
 0xa7c   : > { %5509 = vmin.xlane.f32.xlu0 %v11574_v58 }
 0xa80   : > { %5524 = vmin.xlane.f32.xlu0 %v11582_v12 }
 0xa84   : > { %5539 = vmin.xlane.f32.xlu0 %v11586_v28 }
 0xaab   : > { %v11589_v48 = vpop.xlane.xlu0 %7182 }
 0xaac   : > { %vm7373_vm10 = vcmp.eq.f32.partialorder %v11286_v3, %v11589_v48 }
 0xaad   : > { %v7381_v30 = vsel %vm7373_vm10, %v11329_v21, 8 }
 0xaae   : > { %v11608_v47 = vsel %vm1204_vm2, %v7381_v30, 2147483647 }
 0xaaf   : > { %12864 = vst [vmem:[#allocation108_spill] sm:$0xff] %v11608_v47  ;;  %v7391_v9 = vshra.s32 %v11608_v47, 16 }
 0xab0   : > { %v11595_v23 = vpop.xlane.xlu1 %7185 }
 0xab1   : > { %vm7374_vm14 = vcmp.eq.f32.partialorder %v11291_v6, %v11595_v23  ;;  %v11631_v31 = vcvt.s32.f32 %v7391_v9 }
 0xab2   : > { %v7382_v30 = vsel %vm7374_vm14, %v11329_v21, 8 }
 0xab3   : > { %12869 = vst [vmem:[#allocation112_spill] sm:$0xff] %v11631_v31 }
 0xab7   : > { %v11591_v36 = vpop.xlane.xlu0 %7188 }
 0xab8   : > { %vm7375_vm3 = vcmp.eq.f32.partialorder %v11307_v27, %v11591_v36 }
 0xac0   : > { %v11600_v42 = vpop.xlane.xlu1 %7191 }
 0xac1   : > { %vm7376_vm5 = vcmp.eq.f32.partialorder %v11318_v8, %v11600_v42 }
 0xac6   : > { %v11597_v44 = vpop.xlane.xlu0 %7194 }
 0xac7   : > { %vm7377_vm6 = vcmp.eq.f32.partialorder %v11324_v33, %v11597_v44 }
 0xad6   : > { %v11613_v51 = vpop.xlane.xlu1 %7197 }
 0xad7   : > { %12865 = vst [vmem:[#allocation110_spill] sm:$0xff] %v11613_v51  ;;  %vm7378_vm10 = vcmp.eq.f32.partialorder %v11339_v38, %v11613_v51 }
 0xad9   : > { %v11602_v35 = vpop.xlane.xlu0 %7200 }
 0xada   : > { %12863 = vst [vmem:[#allocation98_spill] sm:$0xff] %v11602_v35  ;;  %vm7379_vm12 = vcmp.eq.f32.partialorder %v11352_v4, %v11602_v35 }
 0xadb   : > { %v7387_v7 = vsel %vm7379_vm12, %v11329_v21, 8 }
 0xadc   : > { %v11621_v4 = vsel %vm1204_vm2, %v7387_v7, 2147483647  ;;  %v7383_v7 = vsel %vm7375_vm3, %v11329_v21, 8 }
 0xadd   : > { %v11615_v28 = vpop.xlane.xlu0 %1434  ;;  %12867 = vst [vmem:[#allocation31_spill] sm:$0xff] %v11621_v4 }
 0xade   : > { %12866 = vst [vmem:[#allocation29_spill] sm:$0xff] %v11615_v28  ;;  %vm1436_vm15 = vcmp.eq.f32.partialorder %v11367_v39, %v11615_v28  ;;  %v7481_v39 = vshra.s32 %v11621_v4, 16  ;;  %v1447_v28 = vcvt.s32.f32 %v1445_v25  ;;  %v11652_v4 = vsel %vm1204_vm2, %v7383_v7, 2147483647 }
 0xadf   : > { %v1437_v22 = vsel %vm1436_vm15, %v1432_v13, inf  ;;  %v11635_v13 = vsel %vm1204_vm2, %v7382_v30, 2147483647  ;;  %12871 = vst [vmem:[#allocation96_spill] sm:$0xff] %v11652_v4  ;;  %v7384_v25 = vsel %vm7376_vm5, %v11329_v21, 8  ;;  %v7421_v7 = vshra.s32 %v11652_v4, 16 }
 0xae0   : > { %1438 = vmin.xlane.f32.xlu0 %v1437_v22  ;;  %v11626_v35 = vpop.xlane.xlu1 %7203  ;;  %v11648_v9 = vcvt.s32.f32 %v7481_v39  ;;  %v7406_v30 = vshra.s32 %v11635_v13, 16  ;;  %v1460_v39 = vand.u32 65535, %v11375_v60 }
 0xae1   : > { %12868 = vst [vmem:[#allocation32_spill] sm:$0xff] %v11626_v35  ;;  %v11628_v59 = vpop.xlane.xlu0 %3482  ;;  %vm7380_vm14 = vcmp.eq.f32.partialorder %v11384_v29, %v11626_v35 }
 0xae2   : > { %vm3484_vm1 = vcmp.eq.f32.partialorder %v11386_v45, %v11628_v59  ;;  %v7385_v45 = vsel %vm7377_vm6, %v11329_v21, 8 }
 0xae3   : > { %v11684_v4 = vsel %vm1204_vm2, %v7385_v45, 2147483647 }
 0xae4   : > { %7394 = vmin.xlane.f32.xlu0 %v11631_v31  ;;  %v11641_v22 = vpop.xlane.xlu1 %1449  ;;  %12876 = vst [vmem:[#allocation37_spill] sm:$0xff] %v11684_v4  ;;  %v7451_v45 = vshra.s32 %v11684_v4, 16 }
 0xae5   : > { %12870 = vst [vmem:[#allocation28_spill] sm:$0xff] %v11641_v22  ;;  %v11643_v47 = vpop.xlane.xlu0 %1464  ;;  %vm1451_vm0 = vcmp.eq.f32.partialorder %v11405_v32, %v11641_v22  ;;  %v3480_v32 = vcvt.s32.f32 %v3478_v24  ;;  %v11667_v22 = vsel %vm1204_vm2, %v7384_v25, 2147483647  ;;  %v11680_v25 = vcvt.s32.f32 %v7421_v7 }
 0xae6   : > { %v1452_v31 = vsel %vm1451_vm0, %v1447_v28, inf  ;;  %v11663_v28 = vcvt.s32.f32 %v7406_v30  ;;  %12874 = vst [vmem:[#allocation35_spill] sm:$0xff] %v11667_v22  ;;  %vm1466_vm8 = vcmp.eq.f32.partialorder %v11407_v62, %v11643_v47  ;;  %v1462_v30 = vcvt.s32.f32 %v1460_v39 }
 0xae7   : > { %1453 = vmin.xlane.f32.xlu1 %v1452_v31  ;;  %v3485_v31 = vsel %vm3484_vm1, %v3480_v32, inf  ;;  %v1475_v32 = vand.u32 65535, %v11396_v0  ;;  %12875 = vst [vmem:[#allocation36_spill] sm:$0xff] %v11680_v25  ;;  %v7386_v62 = vsel %vm7378_vm10, %v11329_v21, 8  ;;  %v5430_v7 = vand.u32 65535, %v11415_v57 }
 0xae8   : > { %7484 = vmin.xlane.f32.xlu0 %v11648_v9  ;;  %12873 = vst [vmem:[#allocation34_spill] sm:$0xff] %v11663_v28  ;;  %v11675_v60 = vpop.xlane.xlu1 %3497  ;;  %v11710_v4 = vcvt.s32.f32 %v7451_v45 }
 0xae9   : > { %v11660_v61 = vpop.xlane.xlu0 %1479  ;;  %v1477_v39 = vcvt.s32.f32 %v1475_v32  ;;  %v5432_v57 = vcvt.s32.f32 %v5430_v7  ;;  %vm3499_vm1 = vcmp.eq.f32.partialorder %v11425_v16, %v11675_v60 }
 0xaea   : > { %12872 = vst [vmem:[#allocation33_spill] sm:$0xff] %v11660_v61  ;;  %vm1481_vm12 = vcmp.eq.f32.partialorder %v11427_v26, %v11660_v61  ;;  %v7388_v26 = vsel %vm7380_vm14, %v11329_v21, 8 }
 0xaeb   : > { %7409 = vmin.xlane.f32.xlu1 %v11663_v28  ;;  %v7436_v28 = vshra.s32 %v11667_v22, 16 }
 0xaec   : > { %3486 = vmin.xlane.f32.xlu0 %v3485_v31  ;;  %v1467_v31 = vsel %vm1466_vm8, %v1462_v30, inf  ;;  %v11698_v22 = vpop.xlane.xlu1 %3512 }
 0xaed   : > { %v11677_v24 = vpop.xlane.xlu0 %5434  ;;  %v11695_v30 = vcvt.s32.f32 %v7436_v28  ;;  %v1490_v28 = vand.u32 65535, %v11435_v43  ;;  %v5460_v43 = vand.u32 65535, %v11455_v17  ;;  %vm3514_vm8 = vcmp.eq.f32.partialorder %v11445_v54, %v11698_v22 }
 0xaee   : > { %vm5436_vm15 = vcmp.eq.f32.partialorder %v11447_v63, %v11677_v24 }
 0xaef   : > { %7424 = vmin.xlane.f32.xlu1 %v11680_v25  ;;  %v11701_v25 = vsel %vm1204_vm2, %v7386_v62, 2147483647  ;;  %v5437_v61 = vsel %vm5436_vm15, %v5432_v57, inf  ;;  %v11714_v62 = vsel %vm1204_vm2, %v7388_v26, 2147483647  ;;  %v1492_v7 = vcvt.s32.f32 %v1490_v28 }
 0xaf0   : > { %1468 = vmin.xlane.f32.xlu0 %v1467_v31  ;;  %v1482_v31 = vsel %vm1481_vm12, %v1477_v39, inf  ;;  %12878 = vst [vmem:[#allocation39_spill] sm:$0xff] %v11701_v25  ;;  %v7466_v39 = vshra.s32 %v11701_v25, 16  ;;  %v11719_v63 = vpop.xlane.xlu1 %3527  ;;  %v7496_v57 = vshra.s32 %v11714_v62, 16  ;;  %v3493_v26 = vand.u32 65535, %v11393_v1 }
 0xaf1   : > { %v11692_v0 = vpop.xlane.xlu0 %1494  ;;  %v3553_v28 = vand.u32 65535, %v11475_v2  ;;  %v3508_v2 = vand.u32 65535, %v11412_v53  ;;  %v3523_v53 = vand.u32 65535, %v11432_v15  ;;  %vm3529_vm12 = vcmp.eq.f32.partialorder %v11465_v37, %v11719_v63 }
 0xaf2   : > { %12877 = vst [vmem:[#allocation38_spill] sm:$0xff] %v11692_v0  ;;  %vm1496_vm3 = vcmp.eq.f32.partialorder %v11467_v41, %v11692_v0  ;;  %v11724_v45 = vcvt.s32.f32 %v7466_v39  ;;  %v5462_v41 = vcvt.s32.f32 %v5460_v43  ;;  %v11734_v0 = vcvt.s32.f32 %v7496_v57 }
 0xaf3   : > { %7439 = vmin.xlane.f32.xlu1 %v11695_v30  ;;  %v1497_v25 = vsel %vm1496_vm3, %v1492_v7, inf  ;;  %v3555_v1 = vcvt.s32.f32 %v3553_v28  ;;  %v1520_v7 = vand.u32 65535, %v11495_v10  ;;  %v5490_v10 = vand.u32 65535, %v11515_v49 }
 0xaf4   : > { %1483 = vmin.xlane.f32.xlu0 %v1482_v31  ;;  %v11736_v17 = vpop.xlane.xlu1 %5449  ;;  %v1535_v15 = vand.u32 65535, %v11535_v55  ;;  %v7205_v49 = vsub.f32 %v11286_v3, %v11589_v48  ;;  %v5505_v55 = vand.u32 65535, %v11553_v14 }
 0xaf5   : > { %v11707_v32 = vpop.xlane.xlu0 %5464  ;;  %vm5451_vm15 = vcmp.eq.f32.partialorder %v11485_v52, %v11736_v17  ;;  %v7206_v52 = vsub.f32 %v11291_v6, %v11595_v23 }
 0xaf6   : > { %vm5466_vm5 = vcmp.eq.f32.partialorder %v11487_v34, %v11707_v32 }
 0xaf7   : > { %7454 = vmin.xlane.f32.xlu1 %v11710_v4  ;;  %v5467_v39 = vsel %vm5466_vm5, %v5462_v41, inf  ;;  %v3510_v41 = vcvt.s32.f32 %v3508_v2 }
 0xaf8   : > { %5438 = vmin.xlane.f32.xlu0 %v5437_v61 }
 0xaf9   : > { %v11721_v31 = vpop.xlane.xlu0 %3557  ;;  %v3515_v28 = vsel %vm3514_vm8, %v3510_v41, inf  ;;  %v7207_v41 = vsub.f32 %v11307_v27, %v11591_v36 }
 0xafa   : > { %vm3559_vm0 = vcmp.eq.f32.partialorder %v11507_v46, %v11721_v31  ;;  %v11751_v46 = vpop.xlane.xlu1 %3542 }
 0xafb   : > { %7469 = vmin.xlane.f32.xlu1 %v11724_v45  ;;  %v3560_v57 = vsel %vm3559_vm0, %v3555_v1, inf  ;;  %v5445_v1 = vand.u32 65535, %v11452_v40  ;;  %v3538_v40 = vand.u32 65535, %v11472_v19  ;;  %vm3544_vm5 = vcmp.eq.f32.partialorder %v11505_v50, %v11751_v46  ;;  %v12879_v50 = vld [vmem:[#allocation24_spill] sm:$0xff] }
 0xafc   : > { %1498 = vmin.xlane.f32.xlu0 %v1497_v25  ;;  %v3495_v25 = vcvt.s32.f32 %v3493_v26  ;;  %v1522_v26 = vcvt.s32.f32 %v1520_v7  ;;  %v1505_v19 = vand.u32 65535, %v11492_v5 }
 0xafd   : > { %v11730_v61 = vpop.xlane.xlu0 %1524  ;;  %v5447_v37 = vcvt.s32.f32 %v5445_v1 }
 0xafe   : > { %v3500_v43 = vsel %vm3499_vm1, %v3495_v25, inf  ;;  %vm1526_vm6 = vcmp.eq.f32.partialorder %v11527_v56, %v11730_v61  ;;  %v3525_v56 = vcvt.s32.f32 %v3523_v53  ;;  %v5492_v25 = vcvt.s32.f32 %v5490_v10  ;;  %v11767_v2 = vpop.xlane.xlu1 %1509 }
 0xaff   : > { %7499 = vmin.xlane.f32.xlu1 %v11734_v0  ;;  %v5452_v53 = vsel %vm5451_vm15, %v5447_v37, inf  ;;  %v1507_v5 = vcvt.s32.f32 %v1505_v19  ;;  %vm1511_vm1 = vcmp.eq.f32.partialorder %v12879_v50, %v11767_v2  ;;  %v12881_v37 = vld [vmem:[#allocation97_spill] sm:$0xff] }
 0xb00   : > { %5468 = vmin.xlane.f32.xlu0 %v5467_v39  ;;  %v1527_v39 = vsel %vm1526_vm6, %v1522_v26, inf  ;;  %v3530_v7 = vsel %vm3529_vm12, %v3525_v56, inf  ;;  %v7217_v56 = vmul.f32 1.442695, %v7207_v41 }
 0xb01   : > { %v11743_v34 = vpop.xlane.xlu0 %5494 }
 0xb02   : > { %vm5496_vm10 = vcmp.eq.f32.partialorder %v11545_v18, %v11743_v34  ;;  %v11786_v14 = vpop.xlane.xlu1 %5479 }
 0xb03   : > { %3501 = vmin.xlane.f32.xlu1 %v3500_v43  ;;  %v5497_v18 = vsel %vm5496_vm10, %v5492_v25, inf  ;;  %v1537_v43 = vcvt.s32.f32 %v1535_v15  ;;  %v7215_v15 = vmul.f32 1.442695, %v7206_v52 }
 0xb04   : > { %3561 = vmin.xlane.f32.xlu0 %v3560_v57  ;;  %v7213_v57 = vmul.f32 1.442695, %v7205_v49 }
 0xb05   : > { %v11753_v16 = vpop.xlane.xlu0 %1539 }
 0xb06   : > { %vm1541_vm14 = vcmp.eq.f32.partialorder %v11562_v11, %v11753_v16  ;;  %v3540_v11 = vcvt.s32.f32 %v3538_v40  ;;  %9177 = vpow2.f32 %v7213_v57  ;;  %v7208_v40 = vsub.f32 %v11318_v8, %v11600_v42 }
 0xb07   : > { %3516 = vmin.xlane.f32.xlu1 %v3515_v28  ;;  %v1542_v10 = vsel %vm1541_vm14, %v1537_v43, inf  ;;  %v5507_v28 = vcvt.s32.f32 %v5505_v55  ;;  %v5535_v43 = vand.u32 65535, %v12881_v37  ;;  %9179 = vpow2.f32 %v7217_v56 }
 0xb08   : > { %1528 = vmin.xlane.f32.xlu0 %v1527_v39  ;;  %v5520_v39 = vand.u32 65535, %v11567_v20  ;;  %v3545_v25 = vsel %vm3544_vm5, %v3540_v11, inf  ;;  %v1512_v57 = vsel %vm1511_vm1, %v1507_v5, inf  ;;  %9181 = vpow2.f32 %v7215_v15  ;;  %v12884_v11 = vld [vmem:[#allocation25_spill] sm:$0xff]  ;;  %v12885_v5 = vld [vmem:[#allocation111_spill] sm:$0xff] }
 0xb09   : > { %v11761_v54 = vpop.xlane.xlu0 %5509  ;;  %v5537_v52 = vcvt.s32.f32 %v5535_v43  ;;  %v7210_v56 = vsub.f32 %v11339_v38, %v11613_v51  ;;  %v12900_v51 = vld [vmem:[#allocation37_spill] sm:$0xff] }
 0xb0a   : > { %vm5511_vm3 = vcmp.eq.f32.partialorder %v11574_v58, %v11761_v54  ;;  %v7209_v58 = vsub.f32 %v11324_v33, %v11597_v44  ;;  %v5522_v20 = vcvt.s32.f32 %v5520_v39  ;;  %v7219_v39 = vmul.f32 1.442695, %v7208_v40 }
 0xb0b   : > { %3531 = vmin.xlane.f32.xlu1 %v3530_v7  ;;  %v5512_v1 = vsel %vm5511_vm3, %v5507_v28, inf  ;;  %v12880_v7 = vld [vmem:[#allocation22_spill] sm:$0xff]  ;;  %v3568_v28 = vand.u32 65535, %v12884_v11 }
 0xb0c   : > { %5498 = vmin.xlane.f32.xlu0 %v5497_v18  ;;  %v5475_v18 = vand.u32 65535, %v12880_v7  ;;  %v7221_v55 = vmul.f32 1.442695, %v7209_v58 }
 0xb0d   : > { %v11777_v26 = vpop.xlane.xlu0 %5524  ;;  %v3570_v15 = vcvt.s32.f32 %v3568_v28 }
 0xb0e   : > { %vm5526_vm0 = vcmp.eq.f32.partialorder %v11582_v12, %v11777_v26  ;;  %v11801_v12 = vpop.xlane.xlu1 %3572  ;;  %v5477_v19 = vcvt.s32.f32 %v5475_v18  ;;  %9183 = vpow2.f32 %v7221_v55  ;;  %v7223_v18 = vmul.f32 1.442695, %v7210_v56  ;;  %v12887_v55 = vld [vmem:[#allocation26_spill] sm:$0xff] }
 0xb0f   : > { %5453 = vmin.xlane.f32.xlu1 %v5452_v53  ;;  %v5527_v41 = vsel %vm5526_vm0, %v5522_v20, inf  ;;  %v12882_v53 = vld [vmem:[#allocation30_spill] sm:$0xff]  ;;  %vm3574_vm10 = vcmp.eq.f32.partialorder %v12885_v5, %v11801_v12  ;;  %v12886_v20 = vld [vmem:[#allocation109_spill] sm:$0xff]  ;;  %9185 = vpow2.f32 %v7219_v39 }
 0xb10   : > { %1543 = vmin.xlane.f32.xlu0 %v1542_v10  ;;  %vm5481_vm6 = vcmp.eq.f32.partialorder %v12882_v53, %v11786_v14  ;;  %v12883_v10 = vld [vmem:[#allocation27_spill] sm:$0xff]  ;;  %v3583_v7 = vand.u32 65535, %v12886_v20  ;;  %v3575_v37 = vsel %vm3574_vm10, %v3570_v15, inf  ;;  %9187 = vpow2.f32 %v7223_v18  ;;  %v12890_v20 = vld [vmem:[#allocation29_spill] sm:$0xff] }
 0xb11   : > { %v11795_v49 = vpop.xlane.xlu0 %5539  ;;  %v5482_v58 = vsel %vm5481_vm6, %v5477_v19, inf }
 0xb12   : > { %vm5541_vm8 = vcmp.eq.f32.partialorder %v12883_v10, %v11795_v49  ;;  %v11812_v50 = vpop.xlane.xlu1 %3587 }
 0xb13   : > { %3546 = vmin.xlane.f32.xlu1 %v3545_v25  ;;  %v5542_v25 = vsel %vm5541_vm8, %v5537_v52, inf  ;;  %vm3589_vm12 = vcmp.eq.f32.partialorder %v12887_v55, %v11812_v50 }
 0xb14   : > { %5513 = vmin.xlane.f32.xlu0 %v5512_v1  ;;  %v9178_v1 = vpop.eup %9177 }
 0xb15   : > { %v7229_v43 = vsel %vm1204_vm2, %v9178_v1, 0.0  ;;  %v9180_v40 = vpop.eup %9179  ;;  %v12889_v1 = vld [vmem:[#allocation21_spill] sm:$0xff] }
 0xb16   : > { %v7235_v10 = vsel %vm1204_vm2, %v9180_v40, 0.0 }
 0xb17   : > { %1513 = vmin.xlane.f32.xlu1 %v1512_v57  ;;  %v3585_v57 = vcvt.s32.f32 %v3583_v7  ;;  %v1441_v7 = vcvt.f32.s32 %v12890_v20 }
 0xb18   : > { %5528 = vmin.xlane.f32.xlu0 %v5527_v41  ;;  %v9182_v41 = vpop.eup %9181 }
 0xb19   : > { %v3590_v53 = vsel %vm3589_vm12, %v3585_v57, inf  ;;  %v9184_v19 = vpop.eup %9183  ;;  %v7232_v52 = vsel %vm1204_vm2, %v9182_v41, 0.0  ;;  %v1442_v55 = vshll.u32 %v1441_v7, 16  ;;  %v12894_v7 = vmov 0.0  }
 0xb1a   : > { %v7241_v11 = vsel %vm1204_vm2, %v9184_v19, 0.0  ;;  %v9186_v28 = vpop.eup %9185 }
 0xb1b   : > { %5483 = vmin.xlane.f32.xlu1 %v5482_v58  ;;  %v7238_v39 = vsel %vm1204_vm2, %v9186_v28, 0.0  ;;  %v9188_v56 = vpop.eup %9187 }
 0xb1c   : > { %5543 = vmin.xlane.f32.xlu0 %v5542_v25  ;;  %v7244_v58 = vsel %vm1204_vm2, %v9188_v56, 0.0  ;;  %v12888_v25 = vld [vmem:[#allocation98_spill] sm:$0xff] }
 0xb1d   : > { %v7211_v5 = vsub.f32 %v12889_v1, %v12888_v25 }
 0xb1f   : > { %3576 = vmin.xlane.f32.xlu1 %v3575_v37  ;;  %v7225_v15 = vmul.f32 1.442695, %v7211_v5  ;;  %v12891_v37 = vld [vmem:[#allocation108_spill] sm:$0xff]  ;;  %v3489_v5 = vcvt.f32.s32 %v11628_v59  ;;  %v12896_v59 = vld [vmem:[#allocation34_spill] sm:$0xff] }
 0xb20   : > { %7230 = vadd.xlane.f32.xlu0 %v7229_v43  ;;  %v7390_v43 = vand.u32 65535, %v12891_v37 }
 0xb21   : > { %9189 = vpow2.f32 %v7225_v15 }
 0xb23   : > { %3591 = vmin.xlane.f32.xlu1 %v3590_v53  ;;  %v7392_v53 = vcvt.s32.f32 %v7390_v43 }
 0xb24   : > { %7236 = vadd.xlane.f32.xlu0 %v7235_v10  ;;  %v12892_v10 = vld [vmem:[#allocation31_spill] sm:$0xff] }
 0xb25   : > { %v7480_v19 = vand.u32 65535, %v12892_v10 }
 0xb27   : > { %7233 = vadd.xlane.f32.xlu1 %v7232_v52  ;;  %v12893_v52 = vld [vmem:[#allocation112_spill] sm:$0xff]  ;;  %v7482_v56 = vcvt.s32.f32 %v7480_v19 }
 0xb28   : > { %7242 = vadd.xlane.f32.xlu0 %v7241_v11 }
 0xb2b   : > { %7239 = vadd.xlane.f32.xlu1 %v7238_v39  ;;  %v9190_v20 = vpop.eup %9189 }
 0xb2f   : > { %7245 = vadd.xlane.f32.xlu1 %v7244_v58  ;;  %v7405_v58 = vand.u32 65535, %v11635_v13  ;;  %v1471_v13 = vcvt.f32.s32 %v11643_v47 }
 0xb31   : > { %v1472_v25 = vshll.u32 %v1471_v13, 16 }
 0xb6d   : > { %v1439_v18 = vpop.xlane.xlu0 %1438 }
 0xb6e   : > { %v1440_v40 = vcvt.f32.s32 %v1439_v18 }
 0xb70   : > { %v1443_v57 = vadd.s32 %v1442_v55, %v1440_v40  ;;  %v7407_v40 = vcvt.s32.f32 %v7405_v58  ;;  %v12895_v55 = vld [vmem:[#allocation96_spill] sm:$0xff]  ;;  %v7212_v58 = vsub.f32 %v11384_v29, %v11626_v35 }
 0xb71   : > { %v11827_v41 = vpop.xlane.xlu0 %7394 }
 0xb72   : > { %vm7396_vm14 = vcmp.eq.f32.partialorder %v12893_v52, %v11827_v41  ;;  %vm1549_vm15 = vcmp.eq.s32.totalorder %v11329_v21, %v1443_v57  ;;  %v7420_v57 = vand.u32 65535, %v12895_v55  ;;  %v11850_v52 = vld [vmem:[%s9447_s16] sm:$0xff] }
 0xb73   : > { %v7397_v11 = vsel %vm7396_vm14, %v7392_v53, inf  ;;  %v7828_v18 = vsel %vm1549_vm15, 1.0, %v12894_v7  ;;  %v3490_v53 = vshll.u32 %v3489_v5, 16  ;;  %v12897_v5 = vld [vmem:[#allocation33_spill] sm:$0xff] }
 0xb74   : > { %7398 = vmin.xlane.f32.xlu0 %v7397_v11  ;;  %v11833_v28 = vpop.xlane.xlu1 %1453  ;;  %v1573_v11 = vmul.f32 %v11850_v52, %v7828_v18 }
 0xb75   : > { %v11835_v39 = vpop.xlane.xlu0 %7484 }
 0xb76   : > { %vm7486_vm3 = vcmp.eq.f32.partialorder %v11648_v9, %v11835_v39  ;;  %v7247_v9 = vsel %vm1204_vm2, %v9190_v20, 0.0  ;;  %v12899_v20 = vld [vmem:[#allocation36_spill] sm:$0xff] }
 0xb77   : > { %v7487_v15 = vsel %vm7486_vm3, %v7482_v56, inf }
 0xb78   : > { %7488 = vmin.xlane.f32.xlu0 %v7487_v15  ;;  %v11842_v37 = vpop.xlane.xlu1 %7409  ;;  %v1486_v15 = vcvt.f32.s32 %v12897_v5  ;;  %v7227_v5 = vmul.f32 1.442695, %v7212_v58  ;;  %v12901_v58 = vld [vmem:[#allocation28_spill] sm:$0xff] }
 0xb79   : > { %v3487_v43 = vpop.xlane.xlu0 %3486  ;;  %vm7411_vm5 = vcmp.eq.f32.partialorder %v12896_v59, %v11842_v37  ;;  %v7422_v59 = vcvt.s32.f32 %v7420_v57 }
 0xb7a   : > { %v3488_v10 = vcvt.f32.s32 %v3487_v43  ;;  %v7412_v19 = vsel %vm7411_vm5, %v7407_v40, inf  ;;  %v12898_v43 = vld [vmem:[#allocation35_spill] sm:$0xff]  ;;  %9191 = vpow2.f32 %v7227_v5 }
 0xb7b   : > { %7413 = vmin.xlane.f32.xlu1 %v7412_v19  ;;  %v7435_v40 = vand.u32 65535, %v12898_v43  ;;  %v1487_v43 = vshll.u32 %v1486_v15, 16  ;;  %v1456_v15 = vcvt.f32.s32 %v12901_v58 }
 0xb7c   : > { %v3491_v56 = vadd.s32 %v3490_v53, %v3488_v10  ;;  %7248 = vadd.xlane.f32.xlu0 %v7247_v9  ;;  %v11856_v47 = vpop.xlane.xlu1 %7424  ;;  %v1581_v10 = vsel %vm1204_vm2, %v1573_v11, 0.0 }
 0xb7d   : > { %v1469_v55 = vpop.xlane.xlu0 %1468  ;;  %vm7426_vm1 = vcmp.eq.f32.partialorder %v12899_v20, %v11856_v47  ;;  %v7437_v35 = vcvt.s32.f32 %v7435_v40  ;;  %v7450_v20 = vand.u32 65535, %v12900_v51 }
 0xb7e   : > { %vm3597_vm0 = vcmp.eq.s32.totalorder %v11329_v21, %v3491_v56  ;;  %v1470_v18 = vcvt.f32.s32 %v1469_v55  ;;  %v7427_v53 = vsel %vm7426_vm1, %v7422_v59, inf }
 0xb7f   : > { %v7884_v19 = vsel %vm3597_vm0, 1.0, %v12894_v7  ;;  %7428 = vmin.xlane.f32.xlu1 %v7427_v53  ;;  %v11886_v53 = vld [vmem:[%s11872_s11] sm:$0xff] }
 0xb80   : > { %v1473_v9 = vadd.s32 %v1472_v25, %v1470_v18  ;;  %1582 = vadd.xlane.f32.xlu0 %v1581_v10  ;;  %v3621_v57 = vmul.f32 %v11850_v52, %v7884_v19  ;;  %v11865_v13 = vpop.xlane.xlu1 %7439  ;;  %v5441_v25 = vcvt.f32.s32 %v11677_v24  ;;  %v11882_v18 = vld [vmem:[%s9447_s16 + $0x10] sm:$0xff] }
 0xb81   : > { %v1484_v56 = vpop.xlane.xlu0 %1483  ;;  %vm7441_vm8 = vcmp.eq.f32.partialorder %v11695_v30, %v11865_v13  ;;  %v1455_v30 = vcvt.f32.s32 %v11833_v28  ;;  %v7277_v28 = vmul.f32 %v11286_v3, %v11886_v53 }
 0xb82   : > { %vm1551_vm6 = vcmp.eq.s32.totalorder %v11329_v21, %v1473_v9  ;;  %v1485_v11 = vcvt.f32.s32 %v1484_v56  ;;  %v7442_v55 = vsel %vm7441_vm8, %v7437_v35, inf  ;;  %v3629_v59 = vsel %vm1204_vm2, %v3621_v57, 0.0  ;;  %v12902_v9 = vld [vmem:[#allocation39_spill] sm:$0xff] }
 0xb83   : > { %v7830_v51 = vsel %vm1551_vm6, 1.0, %v12894_v7  ;;  %7443 = vmin.xlane.f32.xlu1 %v7442_v55  ;;  %v7452_v35 = vcvt.s32.f32 %v7450_v20  ;;  %v7465_v57 = vand.u32 65535, %v12902_v9  ;;  %v5442_v56 = vshll.u32 %v5441_v25, 16 }
 0xb84   : > { %v1488_v40 = vadd.s32 %v1487_v43, %v1485_v11  ;;  %3630 = vadd.xlane.f32.xlu0 %v3629_v59  ;;  %v1575_v24 = vmul.f32 %v11882_v18, %v7830_v51  ;;  %v11889_v10 = vpop.xlane.xlu1 %7454  ;;  %v1457_v11 = vshll.u32 %v1456_v15, 16  ;;  %v7285_v3 = vsel %vm1204_vm2, %v7277_v28, 0.0  ;;  %v9192_v9 = vpop.eup %9191 }
 0xb85   : > { %v5439_v19 = vpop.xlane.xlu0 %5438  ;;  %vm7456_vm12 = vcmp.eq.f32.partialorder %v11710_v4, %v11889_v10  ;;  %v7467_v51 = vcvt.s32.f32 %v7465_v57  ;;  %v7495_v4 = vand.u32 65535, %v11714_v62 }
 0xb86   : > { %vm1552_vm10 = vcmp.eq.s32.totalorder %v11329_v21, %v1488_v40  ;;  %v5440_v43 = vcvt.f32.s32 %v5439_v19  ;;  %v7457_v58 = vsel %vm7456_vm12, %v7452_v35, inf  ;;  %v1587_v5 = vsel %vm1204_vm2, %v1575_v24, 0.0  ;;  %v11909_v24 = vld [vmem:[%s9447_s16 + $0x18] sm:$0xff] }
 0xb87   : > { %7458 = vmin.xlane.f32.xlu1 %v7457_v58  ;;  %v7831_v20 = vsel %vm1552_vm10, 1.0, %v12894_v7  ;;  %v1458_v25 = vadd.s32 %v1457_v11, %v1455_v30  ;;  %v7497_v35 = vcvt.s32.f32 %v7495_v4 }
 0xb88   : > { %v5443_v55 = vadd.s32 %v5442_v56, %v5440_v43  ;;  %1588 = vadd.xlane.f32.xlu0 %v1587_v5  ;;  %v11899_v59 = vpop.xlane.xlu1 %7469  ;;  %v1576_v19 = vmul.f32 %v11909_v24, %v7831_v20  ;;  %v11925_v5 = vld [vmem:[%s11872_s11 + $0x10] sm:$0xff]  ;;  %v7250_v20 = vsel %vm1204_vm2, %v9192_v9, 0.0 }
 0xb89   : > { %vm7471_vm15 = vcmp.eq.f32.partialorder %v11724_v45, %v11899_v59  ;;  %v11905_v15 = vpop.xlane.xlu0 %1498  ;;  %vm1550_vm3 = vcmp.eq.s32.totalorder %v11329_v21, %v1458_v25  ;;  %v3504_v45 = vcvt.f32.s32 %v11675_v60  ;;  %v7279_v4 = vmul.f32 %v11307_v27, %v11925_v5 }
 0xb8a   : > { %vm5549_vm14 = vcmp.eq.s32.totalorder %v11329_v21, %v5443_v55  ;;  %v7472_v40 = vsel %vm7471_vm15, %v7467_v51, inf  ;;  %v1590_v56 = vsel %vm1204_vm2, %v1576_v19, 0.0  ;;  %v7829_v58 = vsel %vm1550_vm3, 1.0, %v12894_v7  ;;  %v11931_v51 = vld [vmem:[%s9447_s16 + $0x8] sm:$0xff] }
 0xb8b   : > { %7473 = vmin.xlane.f32.xlu1 %v7472_v40  ;;  %v7940_v30 = vsel %vm5549_vm14, 1.0, %v12894_v7  ;;  %v3505_v60 = vshll.u32 %v3504_v45, 16  ;;  %v3519_v55 = vcvt.f32.s32 %v11698_v22  ;;  %v7291_v9 = vsel %vm1204_vm2, %v7279_v4, 0.0 }
 0xb8c   : > { %7286 = vadd.xlane.f32.xlu0 %v7285_v3  ;;  %v11914_v62 = vpop.xlane.xlu1 %7499  ;;  %v5573_v43 = vmul.f32 %v11850_v52, %v7940_v30  ;;  %v1574_v52 = vmul.f32 %v11931_v51, %v7829_v58  ;;  %v3534_v30 = vcvt.f32.s32 %v11719_v63  ;;  %v5456_v63 = vcvt.f32.s32 %v11736_v17 }
 0xb8d   : > { %vm7501_vm5 = vcmp.eq.f32.partialorder %v11734_v0, %v11914_v62  ;;  %v11921_v11 = vpop.xlane.xlu0 %5468  ;;  %v3520_v19 = vshll.u32 %v3519_v55, 16  ;;  %v12903_v55 = vld [vmem:[#allocation38_spill] sm:$0xff] }
 0xb8e   : > { %v7502_v57 = vsel %vm7501_vm5, %v7497_v35, inf  ;;  %v5581_v25 = vsel %vm1204_vm2, %v5573_v43, 0.0  ;;  %v1584_v45 = vsel %vm1204_vm2, %v1574_v52, 0.0  ;;  %v3535_v58 = vshll.u32 %v3534_v30, 16 }
 0xb8f   : > { %7503 = vmin.xlane.f32.xlu1 %v7502_v57  ;;  %v5457_v30 = vshll.u32 %v5456_v63, 16 }
 0xb90   : > { %1591 = vadd.xlane.f32.xlu0 %v1590_v56  ;;  %v3502_v28 = vpop.xlane.xlu1 %3501 }
 0xb91   : > { %v3503_v0 = vcvt.f32.s32 %v3502_v28  ;;  %v3562_v22 = vpop.xlane.xlu0 %3561 }
 0xb92   : > { %v3563_v63 = vcvt.f32.s32 %v3562_v22 }
 0xb93   : > { %v3506_v40 = vadd.s32 %v3505_v60, %v3503_v0  ;;  %7251 = vadd.xlane.f32.xlu1 %v7250_v20  ;;  %v11945_v60 = vld [vmem:[%s11872_s11 + $0x8] sm:$0xff]  ;;  %v1501_v0 = vcvt.f32.s32 %v12903_v55  ;;  %v1516_v55 = vcvt.f32.s32 %v11767_v2 }
 0xb94   : > { %5582 = vadd.xlane.f32.xlu0 %v5581_v25  ;;  %v3517_v3 = vpop.xlane.xlu1 %3516 }
 0xb95   : > { %vm3598_vm0 = vcmp.eq.s32.totalorder %v11329_v21, %v3506_v40  ;;  %v3518_v35 = vcvt.f32.s32 %v3517_v3  ;;  %v11950_v52 = vpop.xlane.xlu0 %1528  ;;  %v1500_v3 = vcvt.f32.s32 %v11905_v15 }
 0xb96   : > { %v7885_v57 = vsel %vm3598_vm0, 1.0, %v12894_v7 }
 0xb97   : > { %v3521_v56 = vadd.s32 %v3520_v19, %v3518_v35  ;;  %1585 = vadd.xlane.f32.xlu1 %v1584_v45  ;;  %v3622_v27 = vmul.f32 %v11931_v51, %v7885_v57  ;;  %v7278_v19 = vmul.f32 %v11291_v6, %v11945_v60  ;;  %v3549_v35 = vcvt.f32.s32 %v11751_v46 }
 0xb98   : > { %7292 = vadd.xlane.f32.xlu0 %v7291_v9  ;;  %v3532_v43 = vpop.xlane.xlu1 %3531  ;;  %v1502_v9 = vshll.u32 %v1501_v0, 16  ;;  %v5471_v57 = vcvt.f32.s32 %v11707_v32  ;;  %v5470_v6 = vcvt.f32.s32 %v11921_v11 }
 0xb99   : > { %vm3599_vm1 = vcmp.eq.s32.totalorder %v11329_v21, %v3521_v56  ;;  %v3533_v28 = vcvt.f32.s32 %v3532_v43  ;;  %v3632_v20 = vsel %vm1204_vm2, %v3622_v27, 0.0  ;;  %v3564_v56 = vcvt.f32.s32 %v11721_v31 }
 0xb9a   : > { %v7886_v25 = vsel %vm3599_vm1, 1.0, %v12894_v7  ;;  %v3550_v46 = vshll.u32 %v3549_v35, 16  ;;  %v5472_v31 = vshll.u32 %v5471_v57, 16  ;;  %v5486_v35 = vcvt.f32.s32 %v11786_v14  ;;  %v11977_v57 = vld [vmem:[%s11872_s11 + $0x18] sm:$0xff] }
 0xb9b   : > { %v3536_v4 = vadd.s32 %v3535_v58, %v3533_v28  ;;  %3633 = vadd.xlane.f32.xlu1 %v3632_v20  ;;  %v3623_v40 = vmul.f32 %v11882_v18, %v7886_v25  ;;  %v1503_v58 = vadd.s32 %v1502_v9, %v1500_v3  ;;  %v11964_v20 = vpop.xlane.xlu0 %5498  ;;  %v3565_v0 = vshll.u32 %v3564_v56, 16 }
 0xb9c   : > { %v5454_v17 = vpop.xlane.xlu1 %5453  ;;  %v7288_v25 = vsel %vm1204_vm2, %v7278_v19, 0.0  ;;  %v5473_v2 = vadd.s32 %v5472_v31, %v5470_v6  ;;  %v1531_v14 = vcvt.f32.s32 %v11730_v61  ;;  %v1530_v31 = vcvt.f32.s32 %v11950_v52  ;;  %v12004_v52 = vld [vmem:[%s11872_s11 + $0x20] sm:$0xff] }
 0xb9d   : > { %vm3600_vm6 = vcmp.eq.s32.totalorder %v11329_v21, %v3536_v4  ;;  %v5455_v45 = vcvt.f32.s32 %v5454_v17  ;;  %v3635_v27 = vsel %vm1204_vm2, %v3623_v40, 0.0  ;;  %vm1553_vm10 = vcmp.eq.s32.totalorder %v11329_v21, %v1503_v58 }
 0xb9e   : > { %v7887_v15 = vsel %vm3600_vm6, 1.0, %v12894_v7  ;;  %v3566_v22 = vadd.s32 %v3565_v0, %v3563_v63  ;;  %v1517_v17 = vshll.u32 %v1516_v55, 16  ;;  %vm5551_vm14 = vcmp.eq.s32.totalorder %v11329_v21, %v5473_v2 }
 0xb9f   : > { %v5458_v43 = vadd.s32 %v5457_v30, %v5455_v45  ;;  %3636 = vadd.xlane.f32.xlu1 %v3635_v27  ;;  %v3624_v4 = vmul.f32 %v11909_v24, %v7887_v15  ;;  %v11979_v56 = vpop.xlane.xlu0 %1543  ;;  %v11982_v27 = vld [vmem:[%s9447_s16 + $0x20] sm:$0xff]  ;;  %v7832_v15 = vsel %vm1553_vm10, 1.0, %v12894_v7  ;;  %v3579_v63 = vcvt.f32.s32 %v11801_v12 }
 0xba0   : > { %v3547_v28 = vpop.xlane.xlu1 %3546  ;;  %vm3602_vm15 = vcmp.eq.s32.totalorder %v11329_v21, %v3566_v22  ;;  %v5487_v55 = vshll.u32 %v5486_v35, 16  ;;  %v1577_v61 = vmul.f32 %v11982_v27, %v7832_v15  ;;  %v7942_v12 = vsel %vm5551_vm14, 1.0, %v12894_v7  ;;  %v12009_v35 = vld [vmem:[%s9447_s16 + $0x28] sm:$0xff] }
 0xba1   : > { %vm5550_vm8 = vcmp.eq.s32.totalorder %v11329_v21, %v5458_v43  ;;  %v3548_v32 = vcvt.f32.s32 %v3547_v28  ;;  %v3638_v19 = vsel %vm1204_vm2, %v3624_v4, 0.0  ;;  %v7889_v0 = vsel %vm3602_vm15, 1.0, %v12894_v7 }
 0xba2   : > { %v7941_v11 = vsel %vm5550_vm8, 1.0, %v12894_v7  ;;  %v1546_v2 = vcvt.f32.s32 %v11753_v16  ;;  %v5500_v16 = vcvt.f32.s32 %v11964_v20  ;;  %v1545_v15 = vcvt.f32.s32 %v11979_v56 }
 0xba3   : > { %v3551_v40 = vadd.s32 %v3550_v46, %v3548_v32  ;;  %7289 = vadd.xlane.f32.xlu1 %v7288_v25  ;;  %v5574_v9 = vmul.f32 %v11931_v51, %v7941_v11  ;;  %v7280_v46 = vmul.f32 %v11318_v8, %v11977_v57  ;;  %v1532_v25 = vshll.u32 %v1531_v14, 16  ;;  %v5514_v22 = vpop.xlane.xlu0 %5513 }
 0xba4   : > { %v1514_v3 = vpop.xlane.xlu1 %1513  ;;  %v3580_v11 = vshll.u32 %v3579_v63, 16  ;;  %v7281_v14 = vmul.f32 %v11324_v33, %v12004_v52  ;;  %v1547_v63 = vshll.u32 %v1546_v2, 16  ;;  %v12037_v2 = vld [vmem:[%s11872_s11 + $0x28] sm:$0xff] }
 0xba5   : > { %vm3601_vm12 = vcmp.eq.s32.totalorder %v11329_v21, %v3551_v40  ;;  %v1515_v30 = vcvt.f32.s32 %v1514_v3  ;;  %v5584_v58 = vsel %vm1204_vm2, %v5574_v9, 0.0  ;;  %v5501_v40 = vcvt.f32.s32 %v11743_v34 }
 0xba6   : > { %v7888_v45 = vsel %vm3601_vm12, 1.0, %v12894_v7  ;;  %v1533_v9 = vadd.s32 %v1532_v25, %v1530_v31 }
 0xba7   : > { %3639 = vadd.xlane.f32.xlu1 %v3638_v19  ;;  %v3625_v43 = vmul.f32 %v11982_v27, %v7888_v45  ;;  %v1518_v51 = vadd.s32 %v1517_v17, %v1515_v30  ;;  %v7294_v17 = vsel %vm1204_vm2, %v7280_v46, 0.0  ;;  %v1593_v30 = vsel %vm1204_vm2, %v1577_v61, 0.0 }
 0xba8   : > { %v5484_v6 = vpop.xlane.xlu1 %5483  ;;  %v3626_v19 = vmul.f32 %v12009_v35, %v7889_v0  ;;  %v5575_v45 = vmul.f32 %v11882_v18, %v7942_v12  ;;  %v3594_v18 = vcvt.f32.s32 %v11812_v50  ;;  %v5516_v46 = vcvt.f32.s32 %v11761_v54 }
 0xba9   : > { %v5485_v28 = vcvt.f32.s32 %v5484_v6  ;;  %v3641_v32 = vsel %vm1204_vm2, %v3625_v43, 0.0  ;;  %vm1554_vm3 = vcmp.eq.s32.totalorder %v11329_v21, %v1518_v51  ;;  %v5502_v6 = vshll.u32 %v5501_v40, 16 }
 0xbaa   : > { %3642 = vadd.xlane.f32.xlu0 %v3641_v32  ;;  %v7833_v34 = vsel %vm1554_vm3, 1.0, %v12894_v7  ;;  %v3644_v51 = vsel %vm1204_vm2, %v3626_v19, 0.0  ;;  %v5587_v20 = vsel %vm1204_vm2, %v5575_v45, 0.0  ;;  %vm1555_vm1 = vcmp.eq.s32.totalorder %v11329_v21, %v1533_v9 }
 0xbab   : > { %5585 = vadd.xlane.f32.xlu1 %v5584_v58  ;;  %v5488_v8 = vadd.s32 %v5487_v55, %v5485_v28  ;;  %v1578_v56 = vmul.f32 %v12009_v35, %v7833_v34  ;;  %v5529_v55 = vpop.xlane.xlu0 %5528  ;;  %v5503_v54 = vadd.s32 %v5502_v6, %v5500_v16  ;;  %v1548_v32 = vadd.s32 %v1547_v63, %v1545_v15  ;;  %v9250_v63 = vld [vmem:[%s9447_s16 + $0x38] sm:$0xff] }
 0xbac   : > { %v3577_v4 = vpop.xlane.xlu1 %3576  ;;  %v5515_v58 = vcvt.f32.s32 %v5514_v22  ;;  %v3595_v31 = vshll.u32 %v3594_v18, 16  ;;  %v7297_v0 = vsel %vm1204_vm2, %v7281_v14, 0.0  ;;  %v5517_v12 = vshll.u32 %v5516_v46, 16 }
 0xbad   : > { %v3578_v3 = vcvt.f32.s32 %v3577_v4  ;;  %vm5552_vm5 = vcmp.eq.s32.totalorder %v11329_v21, %v5488_v8  ;;  %v1596_v25 = vsel %vm1204_vm2, %v1578_v56, 0.0  ;;  %v9249_v4 = vld [vmem:[%s9447_s16 + $0x30] sm:$0xff]  ;;  %v7834_v8 = vsel %vm1555_vm1, 1.0, %v12894_v7 }
 0xbae   : > { %7295 = vadd.xlane.f32.xlu0 %v7294_v17  ;;  %v7943_v50 = vsel %vm5552_vm5, 1.0, %v12894_v7  ;;  %vm5553_vm6 = vcmp.eq.s32.totalorder %v11329_v21, %v5503_v54  ;;  %vm1556_vm8 = vcmp.eq.s32.totalorder %v11329_v21, %v1548_v32  ;;  %v5518_v22 = vadd.s32 %v5517_v12, %v5515_v58  ;;  %v12064_v32 = vld [vmem:[%s11872_s11 + $0x38] sm:$0xff] }
 0xbaf   : > { %v3581_v43 = vadd.s32 %v3580_v11, %v3578_v3  ;;  %1594 = vadd.xlane.f32.xlu1 %v1593_v30  ;;  %v5576_v11 = vmul.f32 %v11909_v24, %v7943_v50  ;;  %v5531_v17 = vcvt.f32.s32 %v11777_v26  ;;  %v5544_v30 = vpop.xlane.xlu0 %5543  ;;  %v7282_v24 = vmul.f32 %v11339_v38, %v12037_v2 }
 0xbb0   : > { %v3592_v28 = vpop.xlane.xlu1 %3591  ;;  %v5546_v19 = vcvt.f32.s32 %v11795_v49  ;;  %v7835_v34 = vsel %vm1556_vm8, 1.0, %v12894_v7  ;;  %v7944_v16 = vsel %vm5553_vm6, 1.0, %v12894_v7  ;;  %vm5554_vm10 = vcmp.eq.s32.totalorder %v11329_v21, %v5518_v22 }
 0xbb1   : > { %vm3603_vm0 = vcmp.eq.s32.totalorder %v11329_v21, %v3581_v43  ;;  %v3593_v61 = vcvt.f32.s32 %v3592_v28  ;;  %v5590_v9 = vsel %vm1204_vm2, %v5576_v11, 0.0  ;;  %v1579_v43 = vmul.f32 %v9249_v4, %v7834_v8 }
 0xbb2   : > { %3645 = vadd.xlane.f32.xlu0 %v3644_v51  ;;  %v7890_v33 = vsel %vm3603_vm0, 1.0, %v12894_v7  ;;  %v5530_v26 = vcvt.f32.s32 %v5529_v55  ;;  %v5545_v15 = vcvt.f32.s32 %v5544_v30  ;;  %v5532_v38 = vshll.u32 %v5531_v17, 16 }
 0xbb3   : > { %5588 = vadd.xlane.f32.xlu1 %v5587_v20  ;;  %v3627_v40 = vmul.f32 %v9249_v4, %v7890_v33  ;;  %v3596_v3 = vadd.s32 %v3595_v31, %v3593_v61  ;;  %v7300_v49 = vsel %vm1204_vm2, %v7282_v24, 0.0  ;;  %v5547_v14 = vshll.u32 %v5546_v19, 16 }
 0xbb4   : > { %v1599_v6 = vsel %vm1204_vm2, %v1579_v43, 0.0  ;;  %v1580_v18 = vmul.f32 %v9250_v63, %v7835_v34  ;;  %v5577_v28 = vmul.f32 %v11982_v27, %v7944_v16  ;;  %v7945_v46 = vsel %vm5554_vm10, 1.0, %v12894_v7  ;;  %v12067_v27 = vld [vmem:[%s11872_s11 + $0x30] sm:$0xff]  ;;  %v12083_v17 = vpop.xlane.xlu1 %7233 }
 0xbb5   : > { %v3647_v45 = vsel %vm1204_vm2, %v3627_v40, 0.0  ;;  %vm3604_vm12 = vcmp.eq.s32.totalorder %v11329_v21, %v3596_v3  ;;  %v5533_v20 = vadd.s32 %v5532_v38, %v5530_v26  ;;  %v5548_v56 = vadd.s32 %v5547_v14, %v5545_v15 }
 0xbb6   : > { %7298 = vadd.xlane.f32.xlu0 %v7297_v0  ;;  %v7891_v51 = vsel %vm3604_vm12, 1.0, %v12894_v7  ;;  %v1602_v55 = vsel %vm1204_vm2, %v1580_v18, 0.0  ;;  %v5593_v33 = vsel %vm1204_vm2, %v5577_v28, 0.0  ;;  %v5578_v50 = vmul.f32 %v12009_v35, %v7945_v46 }
 0xbb7   : > { %1597 = vadd.xlane.f32.xlu1 %v1596_v25  ;;  %v3628_v54 = vmul.f32 %v9250_v63, %v7891_v51  ;;  %vm5555_vm14 = vcmp.eq.s32.totalorder %v11329_v21, %v5533_v20  ;;  %vm5556_vm15 = vcmp.eq.s32.totalorder %v11329_v21, %v5548_v56  ;;  %v7284_v31 = vmul.f32 %v11384_v29, %v12064_v32 }
 0xbb8   : > { %v5596_v58 = vsel %vm1204_vm2, %v5578_v50, 0.0  ;;  %v7283_v35 = vmul.f32 %v12889_v1, %v12067_v27  ;;  %v7947_v0 = vsel %vm5556_vm15, 1.0, %v12894_v7  ;;  %v7946_v12 = vsel %vm5555_vm14, 1.0, %v12894_v7  ;;  %v7231_v1 = vpop.xlane.xlu0 %7230  ;;  %v12088_v19 = vpop.xlane.xlu1 %7239 }
 0xbb9   : > { %v3650_v61 = vsel %vm1204_vm2, %v3628_v54, 0.0  ;;  %v7306_v25 = vsel %vm1204_vm2, %v7284_v31, 0.0  ;;  %v5580_v11 = vmul.f32 %v9250_v63, %v7947_v0  ;;  %v5579_v8 = vmul.f32 %v9249_v4, %v7946_v12 }
 0xbba   : > { %3648 = vadd.xlane.f32.xlu0 %v3647_v45  ;;  %v7303_v40 = vsel %vm1204_vm2, %v7283_v35, 0.0  ;;  %v7401_v24 = vcvt.f32.s32 %v11827_v41  ;;  %v7416_v26 = vcvt.f32.s32 %v11842_v37  ;;  %v7491_v28 = vcvt.f32.s32 %v11835_v39 }
 0xbbb   : > { %5591 = vadd.xlane.f32.xlu1 %v5590_v9  ;;  %v5602_v22 = vsel %vm1204_vm2, %v5580_v11, 0.0  ;;  %v5599_v29 = vsel %vm1204_vm2, %v5579_v8, 0.0  ;;  %v7446_v37 = vcvt.f32.s32 %v11865_v13  ;;  %v7461_v31 = vcvt.f32.s32 %v11889_v10 }
 0xbbc   : > { %v7237_v3 = vpop.xlane.xlu0 %7236  ;;  %v7402_v4 = vshll.u32 %v7401_v24, 16  ;;  %v12090_v34 = vpop.xlane.xlu1 %7245  ;;  %v7417_v41 = vshll.u32 %v7416_v26, 16  ;;  %v7492_v50 = vshll.u32 %v7491_v28, 16  ;;  %9193 = vlog2.f32 %v7231_v1 }
 0xbbd   : > { %v7447_v39 = vshll.u32 %v7446_v37, 16  ;;  %9195 = vlog2.f32 %v7237_v3  ;;  %v7462_v1 = vshll.u32 %v7461_v31, 16  ;;  %v7476_v24 = vcvt.f32.s32 %v11899_v59 }
 0xbbe   : > { %7301 = vadd.xlane.f32.xlu0 %v7300_v49  ;;  %9197 = vlog2.f32 %v12083_v17  ;;  %vm12908_vm14 = vcmask 1046534   ;;  %vm7637_vm15 = vcmp.eq.s32.totalorder %v11329_v21, 0 }
 0xbbf   : > { %1600 = vadd.xlane.f32.xlu1 %v1599_v6  ;;  %v7431_v6 = vcvt.f32.s32 %v11856_v47  ;;  %9199 = vlog2.f32 %v12088_v19 }
 0xbc0   : > { %v12085_v30 = vpop.xlane.xlu0 %7242 }
 0xbc1   : > { %9201 = vlog2.f32 %v12085_v30 }
 0xbc2   : > { %1603 = vadd.xlane.f32.xlu0 %v1602_v55  ;;  %v7432_v55 = vshll.u32 %v7431_v6, 16  ;;  %9203 = vlog2.f32 %v12090_v34 }
 0xbc3   : > { %5594 = vadd.xlane.f32.xlu1 %v5593_v33 }
 0xbc6   : > { %5597 = vadd.xlane.f32.xlu0 %v5596_v58  ;;  %v9194_v37 = vpop.eup %9193 }
 0xbc7   : > { %3651 = vadd.xlane.f32.xlu1 %v3650_v61 }
 0xbca   : > { %7307 = vadd.xlane.f32.xlu0 %v7306_v25 }
 0xbcb   : > { %7304 = vadd.xlane.f32.xlu1 %v7303_v40 }
 0xbce   : > { %5603 = vadd.xlane.f32.xlu0 %v5602_v22 }
 0xbcf   : > { %5600 = vadd.xlane.f32.xlu1 %v5599_v29 }
 0xc01   : > { %v7399_v45 = vpop.xlane.xlu0 %7398 }
 0xc02   : > { %v7400_v9 = vcvt.f32.s32 %v7399_v45 }
 0xc04   : > { %v7403_v43 = vadd.s32 %v7402_v4, %v7400_v9 }
 0xc05   : > { %v7489_v16 = vpop.xlane.xlu0 %7488 }
 0xc06   : > { %vm7509_vm3 = vcmp.eq.s32.totalorder %v11329_v21, %v7403_v43  ;;  %v7490_v51 = vcvt.f32.s32 %v7489_v16 }
 0xc07   : > { %v7996_v15 = vsel %vm7509_vm3, 1.0, %v12894_v7 }
 0xc08   : > { %v7533_v38 = vmul.f32 %v7996_v15, %v11886_v53  ;;  %v7414_v49 = vpop.xlane.xlu1 %7413  ;;  %v7493_v13 = vadd.s32 %v7492_v50, %v7490_v51 }
 0xc09   : > { %v12096_v14 = vpop.xlane.xlu0 %7248  ;;  %v7415_v63 = vcvt.f32.s32 %v7414_v49  ;;  %v7477_v49 = vshll.u32 %v7476_v24, 16 }
 0xc0a   : > { %v7541_v18 = vsel %vm1204_vm2, %v7533_v38, 0.0  ;;  %vm7515_vm1 = vcmp.eq.s32.totalorder %v11329_v21, %v7493_v13  ;;  %9205 = vlog2.f32 %v12096_v14 }
 0xc0b   : > { %7542 = vadd.xlane.f32.xlu1 %v7541_v18  ;;  %v7418_v46 = vadd.s32 %v7417_v41, %v7415_v63  ;;  %v8002_v59 = vsel %vm7515_vm1, 1.0, %v12894_v7  ;;  %v7506_v41 = vcvt.f32.s32 %v11914_v62  ;;  %v9196_v62 = vpop.eup %9195 }
 0xc0c   : > { %v7429_v20 = vpop.xlane.xlu1 %7428 }
 0xc0d   : > { %v1583_v56 = vpop.xlane.xlu0 %1582  ;;  %vm7510_vm5 = vcmp.eq.s32.totalorder %v11329_v21, %v7418_v46  ;;  %v7430_v53 = vcvt.f32.s32 %v7429_v20 }
 0xc0e   : > { %v1605_v33 = vrot.slane %v1583_v56, 4  ;;  %v7997_v47 = vsel %vm7510_vm5, 1.0, %v12894_v7  ;;  %vm12911_vm5 = vmmov %vm12908_vm14 }
 0xc0f   : > { %v7433_v54 = vadd.s32 %v7432_v55, %v7430_v53  ;;  %v7534_v61 = vmul.f32 %v7997_v47, %v11945_v60 }
 0xc10   : > { %v1606_v58 = vadd.f32 %v1605_v33, %v1583_v56  ;;  %v7444_v35 = vpop.xlane.xlu1 %7443  ;;  %v7539_v56 = vmul.f32 %v8002_v59, %v12067_v27  ;;  %v7507_v33 = vshll.u32 %v7506_v41, 16 }
 0xc11   : > { %v3631_v0 = vpop.xlane.xlu0 %3630  ;;  %vm7511_vm0 = vcmp.eq.s32.totalorder %v11329_v21, %v7433_v54  ;;  %v7445_v25 = vcvt.f32.s32 %v7444_v35  ;;  %v7544_v11 = vsel %vm1204_vm2, %v7534_v61, 0.0  ;;  %v7258_v35 = vmul.f32 0.6931472, %v9196_v62 }
 0xc12   : > { %v1607_v12 = vrot.slane %v1606_v58, 2  ;;  %v3653_v40 = vrot.slane %v3631_v0, 4  ;;  %v7998_v8 = vsel %vm7511_vm0, 1.0, %v12894_v7  ;;  %7545 = vadd.xlane.f32.xlu0 %v7544_v11  ;;  %v7559_v27 = vsel %vm1204_vm2, %v7539_v56, 0.0  ;;  %vm12912_vm0 = vmmov %vm12911_vm5 }
 0xc13   : > { %v7448_v29 = vadd.s32 %v7447_v39, %v7445_v25  ;;  %v7535_v10 = vmul.f32 %v7998_v8, %v11925_v5  ;;  %v7254_v39 = vmul.f32 0.6931472, %v9194_v37  ;;  %v7271_v17 = vadd.f32 %v7258_v35, %v11591_v36 }
 0xc14   : > { %v1608_v22 = vadd.f32 %v1607_v12, %v1606_v58  ;;  %v3654_v60 = vadd.f32 %v3653_v40, %v3631_v0  ;;  %v7459_v45 = vpop.xlane.xlu1 %7458 }
 0xc15   : > { %v12112_v4 = vpop.xlane.xlu0 %1588  ;;  %vm7512_vm6 = vcmp.eq.s32.totalorder %v11329_v21, %v7448_v29  ;;  %v7460_v43 = vcvt.f32.s32 %v7459_v45  ;;  %v7547_v16 = vsel %vm1204_vm2, %v7535_v10, 0.0  ;;  %v7269_v11 = vadd.f32 %v7254_v39, %v11589_v48 }
 0xc16   : > { %v1609_v9 = vrot.slane %v1608_v22, 1  ;;  %v3655_v3 = vrot.slane %v3654_v60, 2  ;;  %v7999_v26 = vsel %vm7512_vm6, 1.0, %v12894_v7  ;;  %7548 = vadd.xlane.f32.xlu1 %v7547_v16 }
 0xc17   : > { %v7463_v38 = vadd.s32 %v7462_v1, %v7460_v43  ;;  %v7536_v5 = vmul.f32 %v7999_v26, %v11977_v57  ;;  %v9198_v43 = vpop.eup %9197 }
 0xc18   : > { %v3656_v15 = vadd.f32 %v3655_v3, %v3654_v60  ;;  %v7474_v6 = vpop.xlane.xlu1 %7473  ;;  %v1610_v18 = vadd.f32 %v1609_v9, %v1608_v22 }
 0xc19   : > { %v7287_v63 = vpop.xlane.xlu0 %7286  ;;  %vm7513_vm8 = vcmp.eq.s32.totalorder %v11329_v21, %v7463_v38  ;;  %v7475_v46 = vcvt.f32.s32 %v7474_v6  ;;  %v7550_v51 = vsel %vm1204_vm2, %v7536_v5, 0.0 }
 0xc1a   : > { %v3657_v28 = vrot.slane %v3656_v15, 1  ;;  %v8000_v20 = vsel %vm7513_vm8, 1.0, %v12894_v7  ;;  %7551 = vadd.xlane.f32.xlu0 %v7550_v51  ;;  %v1653_v54 = vmul.f32 0.125, %v1610_v18  ;;  %v7309_v60 = vsub.f32 %v7269_v11, %v7287_v63 }
 0xc1b   : > { %v7478_v55 = vadd.s32 %v7477_v49, %v7475_v46  ;;  %v7537_v53 = vmul.f32 %v8000_v20, %v12004_v52 }
 0xc1c   : > { %v3658_v57 = vadd.f32 %v3657_v28, %v3656_v15  ;;  %v7504_v50 = vpop.xlane.xlu1 %7503  ;;  %v7317_v3 = vrot.slane %v7309_v60, 4 }
 0xc1d   : > { %v12125_v47 = vpop.xlane.xlu0 %1591  ;;  %vm7514_vm10 = vcmp.eq.s32.totalorder %v11329_v21, %v7478_v55  ;;  %v7505_v61 = vcvt.f32.s32 %v7504_v50  ;;  %v7553_v31 = vsel %vm1204_vm2, %v7537_v53, 0.0  ;;  %v9200_v55 = vpop.eup %9199 }
 0xc1e   : > { %v3701_v58 = vmul.f32 0.125, %v3658_v57  ;;  %v8001_v13 = vsel %vm7514_vm10, 1.0, %v12894_v7  ;;  %7554 = vadd.xlane.f32.xlu1 %v7553_v31  ;;  %7560 = vadd.xlane.f32.xlu0 %v7559_v27  ;;  %v7318_v38 = vadd.f32 %v7317_v3, %v7309_v60  ;;  %v7260_v27 = vmul.f32 0.6931472, %v9200_v55 }
 0xc1f   : > { %v7508_v0 = vadd.s32 %v7507_v33, %v7505_v61  ;;  %v7538_v40 = vmul.f32 %v8001_v13, %v12037_v2 }
 0xc20   : > { %v12132_v52 = vadd.f32 %v3701_v58, %v1653_v54  ;;  %v12134_v12 = vpop.xlane.xlu1 %7251  ;;  %v7319_v18 = vrot.slane %v7318_v38, 2 }
 0xc21   : > { %v5583_v25 = vpop.xlane.xlu0 %5582  ;;  %vm7516_vm12 = vcmp.eq.s32.totalorder %v11329_v21, %v7508_v0  ;;  %v7556_v8 = vsel %vm1204_vm2, %v7538_v40, 0.0  ;;  %9207 = vlog2.f32 %v12134_v12 }
 0xc22   : > { %v8003_v22 = vsel %vm7516_vm12, 1.0, %v12894_v7  ;;  %7557 = vadd.xlane.f32.xlu1 %v7556_v8  ;;  %v5605_v16 = vrot.slane %v5583_v25, 4  ;;  %v7320_v53 = vadd.f32 %v7319_v18, %v7318_v38 }
 0xc23   : > { %v7540_v29 = vmul.f32 %v8003_v22, %v12064_v32  ;;  %v7256_v32 = vmul.f32 0.6931472, %v9198_v43 }
 0xc24   : > { %v1586_v10 = vpop.xlane.xlu1 %1585  ;;  %v5606_v49 = vadd.f32 %v5605_v16, %v5583_v25  ;;  %v7321_v13 = vrot.slane %v7320_v53, 1 }
 0xc25   : > { %v7293_v1 = vpop.xlane.xlu0 %7292  ;;  %v1611_v24 = vrot.slane %v1586_v10, 4  ;;  %v7562_v2 = vsel %vm1204_vm2, %v7540_v29, 0.0  ;;  %v7270_v46 = vadd.f32 %v7256_v32, %v11595_v23  ;;  %v7272_v29 = vadd.f32 %v7260_v27, %v11600_v42 }
 0xc26   : > { %v7311_v45 = vsub.f32 %v7271_v17, %v7293_v1  ;;  %7563 = vadd.xlane.f32.xlu1 %v7562_v2  ;;  %v5607_v51 = vrot.slane %v5606_v49, 2  ;;  %v7322_v60 = vadd.f32 %v7321_v13, %v7320_v53  ;;  %vm12907_vm2 = vcmask 1045509  }
 0xc27   : > { %v1612_v9 = vadd.f32 %v1611_v24, %v1586_v10  ;;  %vm12910_vm3 = vmmov %vm12907_vm2 }
 0xc28   : > { %v3634_v48 = vpop.xlane.xlu1 %3633  ;;  %v7329_v7 = vrot.slane %v7311_v45, 4  ;;  %v5608_v54 = vadd.f32 %v5607_v51, %v5606_v49  ;;  %v7365_v16 = vmul.f32 0.125, %v7322_v60 }
 0xc29   : > { %v1613_v26 = vrot.slane %v1612_v9, 2  ;;  %v3659_v36 = vrot.slane %v3634_v48, 4 }
 0xc2a   : > { %v7330_v41 = vadd.f32 %v7329_v7, %v7311_v45  ;;  %v5609_v40 = vrot.slane %v5608_v54, 1 }
 0xc2b   : > { %v1614_v15 = vadd.f32 %v1613_v26, %v1612_v9  ;;  %v3660_v5 = vadd.f32 %v3659_v36, %v3634_v48 }
 0xc2c   : > { %v12145_v59 = vpop.xlane.xlu1 %3636  ;;  %v7331_v20 = vrot.slane %v7330_v41, 2  ;;  %v5610_v24 = vadd.f32 %v5609_v40, %v5608_v54  ;;  %v1617_v54 = vrot.slane %v12112_v4, 4 }
 0xc2d   : > { %v1615_v6 = vrot.slane %v1614_v15, 1  ;;  %v3661_v63 = vrot.slane %v3660_v5, 2 }
 0xc2e   : > { %v7332_v58 = vadd.f32 %v7331_v20, %v7330_v41  ;;  %v5653_v7 = vmul.f32 0.125, %v5610_v24  ;;  %v1618_v27 = vadd.f32 %v1617_v54, %v12112_v4 }
 0xc2f   : > { %v3662_v28 = vadd.f32 %v3661_v63, %v3660_v5  ;;  %v1616_v56 = vadd.f32 %v1615_v6, %v1614_v15 }
 0xc30   : > { %v7290_v37 = vpop.xlane.xlu1 %7289  ;;  %v7333_v11 = vrot.slane %v7332_v58, 1  ;;  %v5685_v41 = vadd.f32 %v5653_v7, %v12132_v52 }
 0xc31   : > { %v3663_v19 = vrot.slane %v3662_v28, 1  ;;  %v7310_v57 = vsub.f32 %v7270_v46, %v7290_v37  ;;  %v1654_v61 = vmul.f32 0.125, %v1616_v56 }
 0xc32   : > { %v7334_v45 = vadd.f32 %v7333_v11, %v7332_v58  ;;  %v7629_v46 = vmul.f32 0.33333334, %v5685_v41 }
 0xc33   : > { %v3664_v62 = vadd.f32 %v3663_v19, %v3662_v28  ;;  %v7323_v33 = vrot.slane %v7310_v57, 4 }
 0xc34   : > { %v12148_v50 = vpop.xlane.xlu1 %3639  ;;  %v7367_v36 = vmul.f32 0.125, %v7334_v45 }
 0xc35   : > { %v3702_v39 = vmul.f32 0.125, %v3664_v62  ;;  %v7324_v31 = vadd.f32 %v7323_v33, %v7310_v57  ;;  %v9202_v33 = vpop.eup %9201  ;;  %v3671_v34 = vrot.slane %v12148_v50, 4 }
 0xc37   : > { %v3734_v23 = vadd.f32 %v3702_v39, %v1654_v61  ;;  %v7325_v35 = vrot.slane %v7324_v31, 2  ;;  %v12150_v0 = vpop.xlane.xlu0 %3642  ;;  %v3665_v61 = vrot.slane %v12145_v59, 4  ;;  %v7262_v39 = vmul.f32 0.6931472, %v9202_v33 }
 0xc38   : > { %v5586_v25 = vpop.xlane.xlu1 %5585  ;;  %v3677_v4 = vrot.slane %v12150_v0, 4 }
 0xc39   : > { %v5611_v8 = vrot.slane %v5586_v25, 4  ;;  %v7326_v22 = vadd.f32 %v7325_v35, %v7324_v31  ;;  %v1623_v31 = vrot.slane %v12125_v47, 4  ;;  %v3666_v30 = vadd.f32 %v3665_v61, %v12145_v59  ;;  %v9204_v35 = vpop.eup %9203 }
 0xc3a   : > { %v7273_v11 = vadd.f32 %v7262_v39, %v11597_v44  ;;  %v3672_v59 = vadd.f32 %v3671_v34, %v12148_v50  ;;  %v3678_v44 = vadd.f32 %v3677_v4, %v12150_v0  ;;  %v9206_v50 = vpop.eup %9205 }
 0xc3b   : > { %v5612_v17 = vadd.f32 %v5611_v8, %v5586_v25  ;;  %v7327_v10 = vrot.slane %v7326_v22, 1  ;;  %v7296_v1 = vpop.xlane.xlu0 %7295  ;;  %v1624_v25 = vadd.f32 %v1623_v31, %v12125_v47  ;;  %v3667_v14 = vrot.slane %v3666_v30, 2 }
 0xc3c   : > { %v7312_v9 = vsub.f32 %v7272_v29, %v7296_v1  ;;  %v1595_v57 = vpop.xlane.xlu1 %1594 }
 0xc3d   : > { %v5613_v2 = vrot.slane %v5612_v17, 2  ;;  %v7328_v3 = vadd.f32 %v7327_v10, %v7326_v22  ;;  %v1629_v40 = vrot.slane %v1595_v57, 4  ;;  %v1619_v22 = vrot.slane %v1618_v27, 2 }
 0xc3e   : > { %v7335_v43 = vrot.slane %v7312_v9, 4  ;;  %v7264_v10 = vmul.f32 0.6931472, %v9204_v35  ;;  %v1625_v24 = vrot.slane %v1624_v25, 2  ;;  %v12905_v35 = vld [vmem:[#allocation98_spill] sm:$0xff] }
 0xc3f   : > { %v5614_v48 = vadd.f32 %v5613_v2, %v5612_v17  ;;  %v7366_v26 = vmul.f32 0.125, %v7328_v3  ;;  %v3646_v53 = vpop.xlane.xlu0 %3645  ;;  %v1630_v45 = vadd.f32 %v1629_v40, %v1595_v57  ;;  %v1620_v47 = vadd.f32 %v1619_v22, %v1618_v27  ;;  %v9208_v27 = vpop.eup %9207 }
 0xc40   : > { %v7336_v32 = vadd.f32 %v7335_v43, %v7312_v9  ;;  %v5589_v55 = vpop.xlane.xlu1 %5588  ;;  %v3683_v2 = vrot.slane %v3646_v53, 4 }
 0xc41   : > { %v5615_v15 = vrot.slane %v5614_v48, 1  ;;  %v7647_v38 = vsel %vm7646_vm7, %v7366_v26, %v7365_v16  ;;  %v5617_v13 = vrot.slane %v5589_v55, 4  ;;  %v3668_v16 = vadd.f32 %v3667_v14, %v3666_v30 }
 0xc42   : > { %v7649_v42 = vsel %vm7648_vm9, %v7367_v36, %v7647_v38  ;;  %v7337_v49 = vrot.slane %v7336_v32, 2  ;;  %v3673_v26 = vrot.slane %v3672_v59, 2  ;;  %v12904_v36 = vld [vmem:[#allocation110_spill] sm:$0xff]  ;;  %v1631_v38 = vrot.slane %v1630_v45, 2 }
 0xc43   : > { %v5616_v5 = vadd.f32 %v5615_v15, %v5614_v48  ;;  %v7299_v62 = vpop.xlane.xlu0 %7298  ;;  %v5618_v17 = vadd.f32 %v5617_v13, %v5589_v55  ;;  %v7274_v15 = vadd.f32 %v7264_v10, %v12904_v36  ;;  %v7268_v14 = vmul.f32 0.6931472, %v9208_v27 }
 0xc44   : > { %v7338_v63 = vadd.f32 %v7337_v49, %v7336_v32  ;;  %v1598_v52 = vpop.xlane.xlu1 %1597  ;;  %v7313_v29 = vsub.f32 %v7273_v11, %v7299_v62  ;;  %v1626_v32 = vadd.f32 %v1625_v24, %v1624_v25  ;;  %v3679_v49 = vrot.slane %v3678_v44, 2 }
 0xc45   : > { %v5654_v6 = vmul.f32 0.125, %v5616_v5  ;;  %v1635_v60 = vrot.slane %v1598_v52, 4  ;;  %v5619_v9 = vrot.slane %v5618_v17, 2  ;;  %v3684_v5 = vadd.f32 %v3683_v2, %v3646_v53 }
 0xc46   : > { %v7339_v28 = vrot.slane %v7338_v63, 1  ;;  %v7341_v3 = vrot.slane %v7313_v29, 4  ;;  %v3680_v53 = vadd.f32 %v3679_v49, %v3678_v44 }
 0xc47   : > { %v5686_v18 = vadd.f32 %v5654_v6, %v3734_v23  ;;  %v12168_v23 = vpop.xlane.xlu0 %3648  ;;  %v1636_v48 = vadd.f32 %v1635_v60, %v1598_v52  ;;  %v5620_v41 = vadd.f32 %v5619_v9, %v5618_v17  ;;  %v3685_v57 = vrot.slane %v3684_v5, 2 }
 0xc48   : > { %v7340_v51 = vadd.f32 %v7339_v28, %v7338_v63  ;;  %v5592_v58 = vpop.xlane.xlu1 %5591  ;;  %v7342_v0 = vadd.f32 %v7341_v3, %v7313_v29  ;;  %v3669_v28 = vrot.slane %v3668_v16, 1  ;;  %v3689_v55 = vrot.slane %v12168_v23, 4 }
 0xc49   : > { %v7630_v37 = vmul.f32 0.33333334, %v5686_v18  ;;  %v5623_v7 = vrot.slane %v5592_v58, 4  ;;  %v1637_v63 = vrot.slane %v1636_v48, 2  ;;  %v7266_v18 = vmul.f32 0.6931472, %v9206_v50 }
 0xc4a   : > { %v7368_v56 = vmul.f32 0.125, %v7340_v51  ;;  %v1627_v51 = vrot.slane %v1626_v32, 1  ;;  %v5621_v33 = vrot.slane %v5620_v41, 1  ;;  %v7343_v61 = vrot.slane %v7342_v0, 2 }
 0xc4b   : > { %v12157_v20 = vsel %vm7646_vm7, %v7630_v37, %v7629_v46  ;;  %v7302_v1 = vpop.xlane.xlu0 %7301  ;;  %v3674_v46 = vadd.f32 %v3673_v26, %v3672_v59  ;;  %v5624_v37 = vadd.f32 %v5623_v7, %v5592_v58  ;;  %v1638_v39 = vadd.f32 %v1637_v63, %v1636_v48 }
 0xc4c   : > { %v12160_v19 = vsel %vm7650_vm11, %v7368_v56, %v7649_v42  ;;  %v12175_v8 = vpop.xlane.xlu1 %1600  ;;  %v1621_v42 = vrot.slane %v1620_v47, 1  ;;  %v7314_v12 = vsub.f32 %v7274_v15, %v7302_v1  ;;  %v1632_v56 = vadd.f32 %v1631_v38, %v1630_v45 }
 0xc4d   : > { %v1641_v31 = vrot.slane %v12175_v8, 4  ;;  %v3670_v13 = vadd.f32 %v3669_v28, %v3668_v16  ;;  %v3675_v30 = vrot.slane %v3674_v46, 1  ;;  %v5625_v34 = vrot.slane %v5624_v37, 2 }
 0xc4e   : > { %v1622_v62 = vadd.f32 %v1621_v42, %v1620_v47  ;;  %v7347_v54 = vrot.slane %v7314_v12, 4  ;;  %v7275_v25 = vadd.f32 %v7266_v18, %v12905_v35  ;;  %v1628_v40 = vadd.f32 %v1627_v51, %v1626_v32  ;;  %v12906_v42 = vld [vmem:[#allocation32_spill] sm:$0xff] }
 0xc4f   : > { %v1604_v6 = vpop.xlane.xlu0 %1603  ;;  %v1633_v11 = vrot.slane %v1632_v56, 1  ;;  %v3686_v22 = vadd.f32 %v3685_v57, %v3684_v5  ;;  %v3690_v4 = vadd.f32 %v3689_v55, %v12168_v23  ;;  %v3681_v29 = vrot.slane %v3680_v53, 1 }
 0xc50   : > { %v12181_v43 = vpop.xlane.xlu1 %5594  ;;  %v1655_v17 = vmul.f32 0.125, %v1622_v62  ;;  %v5622_v60 = vadd.f32 %v5621_v33, %v5620_v41  ;;  %v7348_v10 = vadd.f32 %v7347_v54, %v7314_v12  ;;  %v7344_v59 = vadd.f32 %v7343_v61, %v7342_v0 }
 0xc51   : > { %v1639_v1 = vrot.slane %v1638_v39, 1  ;;  %v1642_v24 = vadd.f32 %v1641_v31, %v12175_v8  ;;  %v3703_v2 = vmul.f32 0.125, %v3670_v13  ;;  %v3676_v47 = vadd.f32 %v3675_v30, %v3674_v46 }
 0xc52   : > { %v5626_v44 = vadd.f32 %v5625_v34, %v5624_v37  ;;  %v1647_v9 = vrot.slane %v1604_v6, 4  ;;  %v1656_v3 = vmul.f32 0.125, %v1628_v40  ;;  %v1634_v48 = vadd.f32 %v1633_v11, %v1632_v56 }
 0xc53   : > { %v5598_v58 = vpop.xlane.xlu0 %5597  ;;  %v3687_v16 = vrot.slane %v3686_v22, 1  ;;  %v3691_v26 = vrot.slane %v3690_v4, 2  ;;  %v3682_v7 = vadd.f32 %v3681_v29, %v3680_v53  ;;  %v5655_v23 = vmul.f32 0.125, %v5622_v60 }
 0xc54   : > { %v12185_v52 = vpop.xlane.xlu1 %3651  ;;  %v7349_v36 = vrot.slane %v7348_v10, 2  ;;  %v5629_v15 = vrot.slane %v12181_v43, 4  ;;  %v7345_v32 = vrot.slane %v7344_v59, 1  ;;  %v1640_v38 = vadd.f32 %v1639_v1, %v1638_v39 }
 0xc55   : > { %v1643_v5 = vrot.slane %v1642_v24, 2  ;;  %v7276_v8 = vadd.f32 %v7268_v14, %v12906_v42  ;;  %v3735_v49 = vadd.f32 %v3703_v2, %v1655_v17  ;;  %v3704_v41 = vmul.f32 0.125, %v3676_v47 }
 0xc56   : > { %v5627_v12 = vrot.slane %v5626_v44, 1  ;;  %v1648_v0 = vadd.f32 %v1647_v9, %v1604_v6  ;;  %v1657_v63 = vmul.f32 0.125, %v1634_v48  ;;  %v3688_v18 = vadd.f32 %v3687_v16, %v3686_v22 }
 0xc57   : > { %v7308_v50 = vpop.xlane.xlu0 %7307  ;;  %v3692_v28 = vadd.f32 %v3691_v26, %v3690_v4  ;;  %v5635_v46 = vrot.slane %v5598_v58, 4  ;;  %v3705_v51 = vmul.f32 0.125, %v3682_v7  ;;  %v5687_v56 = vadd.f32 %v5655_v23, %v3735_v49 }
 0xc58   : > { %v7305_v45 = vpop.xlane.xlu1 %7304  ;;  %v7350_v57 = vadd.f32 %v7349_v36, %v7348_v10  ;;  %v5630_v55 = vadd.f32 %v5629_v15, %v12181_v43  ;;  %v7346_v62 = vadd.f32 %v7345_v32, %v7344_v59  ;;  %v1658_v53 = vmul.f32 0.125, %v1640_v38 }
 0xc59   : > { %v1644_v33 = vadd.f32 %v1643_v5, %v1642_v24  ;;  %v3695_v54 = vrot.slane %v12185_v52, 4  ;;  %v3736_v61 = vadd.f32 %v3704_v41, %v1656_v3  ;;  %v5628_v39 = vadd.f32 %v5627_v12, %v5626_v44 }
 0xc5a   : > { %v1649_v31 = vrot.slane %v1648_v0, 2  ;;  %v7315_v27 = vsub.f32 %v7275_v25, %v7305_v45  ;;  %v12195_v13 = vadd.f32 %v3705_v51, %v1657_v63  ;;  %v3706_v30 = vmul.f32 0.125, %v3688_v18 }
 0xc5b   : > { %v5604_v6 = vpop.xlane.xlu0 %5603  ;;  %v3693_v34 = vrot.slane %v3692_v28, 1  ;;  %v5636_v35 = vadd.f32 %v5635_v46, %v5598_v58  ;;  %v12197_v11 = vmul.f32 0.33333334, %v5687_v56  ;;  %v7351_v22 = vrot.slane %v7350_v57, 1 }
 0xc5c   : > { %v5601_v37 = vpop.xlane.xlu1 %5600  ;;  %v5631_v43 = vrot.slane %v5630_v55, 2  ;;  %v7369_v17 = vmul.f32 0.125, %v7346_v62  ;;  %v12199_v29 = vadd.f32 %v3706_v30, %v1658_v53  ;;  %v1645_v60 = vrot.slane %v1644_v33, 1 }
 0xc5d   : > { %v5641_v4 = vrot.slane %v5601_v37, 4  ;;  %v3696_v10 = vadd.f32 %v3695_v54, %v12185_v52  ;;  %v5656_v14 = vmul.f32 0.125, %v5628_v39  ;;  %v1650_v25 = vadd.f32 %v1649_v31, %v1648_v0 }
 0xc5e   : > { %v7353_v59 = vrot.slane %v7315_v27, 4  ;;  %v3694_v45 = vadd.f32 %v3693_v34, %v3692_v28  ;;  %v5637_v2 = vrot.slane %v5636_v35, 2  ;;  %v7316_v58 = vsub.f32 %v7276_v8, %v7308_v50 }
 0xc5f   : > { %v7352_v44 = vadd.f32 %v7351_v22, %v7350_v57  ;;  %v5632_v9 = vadd.f32 %v5631_v43, %v5630_v55  ;;  %v5647_v3 = vrot.slane %v5604_v6, 4  ;;  %v5642_v48 = vadd.f32 %v5641_v4, %v5601_v37 }
 0xc60   : > { %v7653_v16 = vsel %vm7652_vm13, %v7369_v17, %v12160_v19  ;;  %v1646_v26 = vadd.f32 %v1645_v60, %v1644_v33  ;;  %v3697_v7 = vrot.slane %v3696_v10, 2  ;;  %v5688_v52 = vadd.f32 %v5656_v14, %v3736_v61 }
 0xc61   : > { %v1651_v36 = vrot.slane %v1650_v25, 1  ;;  %v7354_v15 = vadd.f32 %v7353_v59, %v7315_v27  ;;  %v3707_v5 = vmul.f32 0.125, %v3694_v45  ;;  %v5638_v42 = vadd.f32 %v5637_v2, %v5636_v35 }
 0xc62   : > { %v7359_v49 = vrot.slane %v7316_v58, 4  ;;  %v7370_v8 = vmul.f32 0.125, %v7352_v44  ;;  %v5633_v41 = vrot.slane %v5632_v9, 1  ;;  %v5648_v12 = vadd.f32 %v5647_v3, %v5604_v6 }
 0xc63   : > { %v5643_v0 = vrot.slane %v5642_v48, 2  ;;  %v1659_v63 = vmul.f32 0.125, %v1646_v26  ;;  %v3698_v18 = vadd.f32 %v3697_v7, %v3696_v10  ;;  %v12204_v46 = vmul.f32 0.33333334, %v5688_v52 }
 0xc64   : > { %v1652_v37 = vadd.f32 %v1651_v36, %v1650_v25  ;;  %v7355_v51 = vrot.slane %v7354_v15, 2  ;;  %v5639_v55 = vrot.slane %v5638_v42, 1  ;;  %v7360_v62 = vadd.f32 %v7359_v49, %v7316_v58 }
 0xc65   : > { %v12207_v54 = vsel %vm12907_vm2, %v7370_v8, %v7653_v16  ;;  %v5634_v61 = vadd.f32 %v5633_v41, %v5632_v9  ;;  %v5649_v39 = vrot.slane %v5648_v12, 2  ;;  %v5644_v31 = vadd.f32 %v5643_v0, %v5642_v48 }
 0xc66   : > { %v12209_v27 = vadd.f32 %v3707_v5, %v1659_v63  ;;  %v3699_v6 = vrot.slane %v3698_v18, 1  ;;  %v12211_v35 = vmul.f32 0.125, %v1652_v37  ;;  %v5640_v60 = vadd.f32 %v5639_v55, %v5638_v42 }
 0xc67   : > { %v7361_v10 = vrot.slane %v7360_v62, 2  ;;  %v5657_v59 = vmul.f32 0.125, %v5634_v61 }
 0xc68   : > { %v3700_v2 = vadd.f32 %v3699_v6, %v3698_v18 }
 0xc69   : > { %v7362_v7 = vadd.f32 %v7361_v10, %v7360_v62  ;;  %v5689_v42 = vadd.f32 %v5657_v59, %v12195_v13 }
 0xc98   : > { %v7543_v40 = vpop.xlane.xlu1 %7542 }
 0xc99   : > { %v7565_v1 = vrot.slane %v7543_v40, 4 }
 0xc9b   : > { %v7566_v32 = vadd.f32 %v7565_v1, %v7543_v40  ;;  %v7356_v40 = vadd.f32 %v7355_v51, %v7354_v15  ;;  %v5650_v1 = vadd.f32 %v5649_v39, %v5648_v12  ;;  %v5658_v15 = vmul.f32 0.125, %v5640_v60 }
 0xc9d   : > { %v7567_v56 = vrot.slane %v7566_v32, 2  ;;  %v7357_v9 = vrot.slane %v7356_v40, 1  ;;  %v5690_v39 = vadd.f32 %v5658_v15, %v12199_v29 }
 0xc9f   : > { %v7546_v24 = vpop.xlane.xlu0 %7545  ;;  %v7568_v22 = vadd.f32 %v7567_v56, %v7566_v32  ;;  %v5651_v32 = vrot.slane %v5650_v1, 1  ;;  %v7358_v41 = vadd.f32 %v7357_v9, %v7356_v40  ;;  %v3708_v56 = vmul.f32 0.125, %v3700_v2 }
 0xca0   : > { %v7571_v47 = vrot.slane %v7546_v24, 4  ;;  %v7708_v9 = vsel %vm7648_vm9, %v12197_v11, %v12157_v20 }
 0xca1   : > { %v7569_v3 = vrot.slane %v7568_v22, 1  ;;  %v5652_v55 = vadd.f32 %v5651_v32, %v5650_v1  ;;  %v7634_v1 = vmul.f32 0.33333334, %v5690_v39 }
 0xca2   : > { %v7572_v23 = vadd.f32 %v7571_v47, %v7546_v24  ;;  %v5645_v24 = vrot.slane %v5644_v31, 1 }
 0xca3   : > { %v7549_v38 = vpop.xlane.xlu1 %7548  ;;  %v7570_v12 = vadd.f32 %v7569_v3, %v7568_v22 }
 0xca4   : > { %v7577_v50 = vrot.slane %v7549_v38, 4  ;;  %v7573_v28 = vrot.slane %v7572_v23, 2 }
 0xca6   : > { %v7578_v19 = vadd.f32 %v7577_v50, %v7549_v38  ;;  %v7574_v30 = vadd.f32 %v7573_v28, %v7572_v23  ;;  %v5646_v38 = vadd.f32 %v5645_v24, %v5644_v31  ;;  %v7371_v31 = vmul.f32 0.125, %v7358_v41 }
 0xca7   : > { %v7552_v57 = vpop.xlane.xlu0 %7551  ;;  %v3740_v24 = vadd.f32 %v3708_v56, %v12211_v35 }
 0xca8   : > { %v7579_v53 = vrot.slane %v7578_v19, 2  ;;  %v7583_v33 = vrot.slane %v7552_v57, 4  ;;  %v7575_v58 = vrot.slane %v7574_v30, 1  ;;  %v5659_v62 = vmul.f32 0.125, %v5646_v38 }
 0xcaa   : > { %v7584_v34 = vadd.f32 %v7583_v33, %v7552_v57  ;;  %v7580_v43 = vadd.f32 %v7579_v53, %v7578_v19  ;;  %v7576_v49 = vadd.f32 %v7575_v58, %v7574_v30  ;;  %v7363_v57 = vrot.slane %v7362_v7, 1 }
 0xcab   : > { %v7555_v4 = vpop.xlane.xlu1 %7554  ;;  %v7561_v17 = vpop.xlane.xlu0 %7560  ;;  %v5691_v60 = vadd.f32 %v5659_v62, %v12209_v27  ;;  %v7657_v58 = vsel %vm12908_vm14, %v7371_v31, %v12207_v54 }
 0xcac   : > { %v7585_v14 = vrot.slane %v7584_v34, 2  ;;  %v7589_v25 = vrot.slane %v7555_v4, 4  ;;  %v7601_v45 = vrot.slane %v7561_v17, 4  ;;  %v7581_v48 = vrot.slane %v7580_v43, 1 }
 0xcad   : > { %v7614_v53 = vmul.f32 0.125, %v7576_v49 }
 0xcae   : > { %v7586_v47 = vadd.f32 %v7585_v14, %v7584_v34  ;;  %v7590_v44 = vadd.f32 %v7589_v25, %v7555_v4  ;;  %v7602_v16 = vadd.f32 %v7601_v45, %v7561_v17  ;;  %v7582_v0 = vadd.f32 %v7581_v48, %v7580_v43 }
 0xcaf   : > { %v7558_v26 = vpop.xlane.xlu1 %7557  ;;  %v7613_v34 = vmul.f32 0.125, %v7570_v12  ;;  %v7633_v4 = vmul.f32 0.33333334, %v5689_v42  ;;  %v7364_v17 = vadd.f32 %v7363_v57, %v7362_v7  ;;  %v5660_v14 = vmul.f32 0.125, %v5652_v55 }
 0xcb0   : > { %v7587_v23 = vrot.slane %v7586_v47, 1  ;;  %v7591_v52 = vrot.slane %v7590_v44, 2  ;;  %v7595_v36 = vrot.slane %v7558_v26, 4  ;;  %v7603_v5 = vrot.slane %v7602_v16, 2 }
 0xcb1   : > { %v7615_v6 = vmul.f32 0.125, %v7582_v0  ;;  %v7671_v25 = vsel %vm7646_vm7, %v7614_v53, %v7613_v34  ;;  %v7372_v3 = vmul.f32 0.125, %v7364_v17  ;;  %v7635_v48 = vmul.f32 0.33333334, %v5691_v60  ;;  %vm12909_vm7 = vmmov %vm12907_vm2 }
 0xcb2   : > { %v7592_v50 = vadd.f32 %v7591_v52, %v7590_v44  ;;  %v7596_v8 = vadd.f32 %v7595_v36, %v7558_v26  ;;  %v7604_v63 = vadd.f32 %v7603_v5, %v7602_v16  ;;  %v7588_v28 = vadd.f32 %v7587_v23, %v7586_v47 }
 0xcb3   : > { %v7564_v18 = vpop.xlane.xlu1 %7563  ;;  %v7672_v45 = vsel %vm7648_vm9, %v7615_v6, %v7671_v25  ;;  %v7709_v16 = vsel %vm7650_vm11, %v12204_v46, %v7708_v9  ;;  %v5692_v26 = vadd.f32 %v5660_v14, %v3740_v24  ;;  %v7659_v52 = vsel %vm7658_vm4, %v7372_v3, %v7657_v58 }
 0xcb4   : > { %v7593_v19 = vrot.slane %v7592_v50, 1  ;;  %v7597_v37 = vrot.slane %v7596_v8, 2  ;;  %v7607_v51 = vrot.slane %v7564_v18, 4  ;;  %v7605_v30 = vrot.slane %v7604_v63, 1 }
 0xcb5   : > { %v7616_v40 = vmul.f32 0.125, %v7588_v28  ;;  %v7710_v23 = vsel %vm7652_vm13, %v7633_v4, %v7709_v16  ;;  %vm7662_vm9 = vcmp.eq.s32.totalorder %v11329_v21, 1  ;;  %v7636_v32 = vmul.f32 0.33333334, %v5692_v26 }
 0xcb6   : > { %v7594_v33 = vadd.f32 %v7593_v19, %v7592_v50  ;;  %v7598_v13 = vadd.f32 %v7597_v37, %v7596_v8  ;;  %v7608_v61 = vadd.f32 %v7607_v51, %v7564_v18  ;;  %v7606_v2 = vadd.f32 %v7605_v30, %v7604_v63  ;;  %v12913_v50 = vld [vmem:[#allocation20_spill] sm:$0xff] }
 0xcb7   : > { %v7673_v47 = vsel %vm7650_vm11, %v7616_v40, %v7672_v45  ;;  %v7711_v20 = vsel %vm12910_vm3, %v7634_v1, %v7710_v23  ;;  %vm7680_vm11 = vcmp.eq.s32.totalorder %v11329_v21, 2  ;;  %v7661_v38 = vsel %vm7637_vm15, %v7659_v52, 0.0 }
 0xcb8   : > { %v7599_v22 = vrot.slane %v7598_v13, 1  ;;  %v7609_v43 = vrot.slane %v7608_v61, 2  ;;  %v7617_v10 = vmul.f32 0.125, %v7594_v33  ;;  %v7619_v36 = vmul.f32 0.125, %v7606_v2 }
 0xcb9   : > { %v7712_v15 = vsel %vm12911_vm5, %v7635_v48, %v7711_v20 }
 0xcba   : > { %v7600_v59 = vadd.f32 %v7599_v22, %v7598_v13  ;;  %v7610_v29 = vadd.f32 %v7609_v43, %v7608_v61  ;;  %v7674_v35 = vsel %vm7652_vm13, %v7617_v10, %v7673_v47  ;;  %vm7698_vm13 = vcmp.eq.s32.totalorder %v11329_v21, 3 }
 0xcbb   : > { %v7713_v49 = vsel %vm7658_vm4, %v7636_v32, %v7712_v15 }
 0xcbc   : > { %v7618_v44 = vmul.f32 0.125, %v7600_v59  ;;  %v7611_v27 = vrot.slane %v7610_v29, 1 }
 0xcbe   : > { %v7675_v54 = vsel %vm12909_vm7, %v7618_v44, %v7674_v35  ;;  %v7612_v7 = vadd.f32 %v7611_v27, %v7610_v29 }
 0xcbf   : > { %v7676_v46 = vsel %vm12912_vm0, %v7619_v36, %v7675_v54 }
 0xcc0   : > { %v7620_v11 = vmul.f32 0.125, %v7612_v7 }
 0xcc2   : > { %v7677_v5 = vsel %vm7658_vm4, %v7620_v11, %v7676_v46 }
 0xcc3   : > { %v7679_v42 = vsel %vm7662_vm9, %v7677_v5, %v7661_v38 }
 0xcc4   : > { %v7697_v8 = vsel %vm7680_vm11, %v12913_v50, %v7679_v42 }
 0xcc5   : > { %v7715_v41 = vsel %vm7698_vm13, %v7713_v49, %v7697_v8 }
 0xcc6   : > { %7716 = vst [vmem:[%s317_s14] sm:$0xff] %v7715_v41 }
 0xcc7 PF: > { %s16_s21 = sadd.s32 1, %s9258_s21  }
 0xcc8   : > { %p13_p5 = scmp.ge.s32.totalorder %s16_s21, 4  }
 0xcca   :  { %15 = sbr.rel (!%p13_p5) target bundleno = 1 (0x1), region = 83 }

</bundles_post_ra>
